<compile_context>
chip_gen: v5e
topology: v5e:2x2
jax: 0.10.0
libtpu: 0.0.40
codegen_flags: <defaults>
</compile_context>

<pallas_src>
import math
import jax
import jax.numpy as jnp
from jax.experimental import pallas as pl
from jax.experimental.pallas import tpu as pltpu

# -------------------- model hyper-parameters (from BaseModel.__init__) --------------------
EVENT_KEYS = ['type', 'bar', 'pos', 'tempo', 'structure', 'chord', 'track', 'pitch', 'duration']
EMB_SIZES = {'type': 64, 'bar': 64, 'pos': 128, 'tempo': 256, 'structure': 256,
             'chord': 512, 'track': 64, 'pitch': 512, 'duration': 512}
# event-class counts come from the dictionary argument; small synthetic values here
CLASS_NUMS = {'type': 8, 'bar': 8, 'pos': 16, 'tempo': 16, 'structure': 16,
              'chord': 32, 'track': 8, 'pitch': 32, 'duration': 32}

D_MODEL = 128        # args.d_model
N_HEADS = 4          # args.song_transformer_n_head
N_LAYERS = 2         # args.song_transformer_n_layer
D_FF = 256           # args.song_transformer_mlp
MAX_LEN = 64
LN_EPS = 1e-5
# dropout rates (args.position_dropout / song_transformer_dropout) taken as 0.0 -> identity

EMB_OFFSETS = {}
_o = 0
for _k in EVENT_KEYS:
    EMB_OFFSETS[_k] = _o
    _o += EMB_SIZES[_k]
SUM_EMB = _o                                             # 2368

OUT_OFFSETS = {}
_o = 0
for _k in EVENT_KEYS:
    OUT_OFFSETS[_k] = _o
    _o += CLASS_NUMS[_k]
OUT_TOTAL = _o                                           # 168
OUT_PAD = 256                                            # padded to multiple of 128 lanes

# ---- bias / LayerNorm slab: every tiny f32 operand packed into one (N_SLAB_ROWS, 384) array ----
SLAB_W = 3 * D_MODEL                                     # 384 lanes (widest bias = bqkv)
_LAYER_BIAS_NAMES = ('bqkv', 'bo', 'ln1_g', 'ln1_b', 'b1', 'b2', 'ln2_g', 'ln2_b')
ROW_ENC_B = 0


def _layer_row(li):
    return 1 + 8 * li


ROW_FIN_G = 1 + 8 * N_LAYERS
ROW_FIN_B = ROW_FIN_G + 1
ROW_TYPE_B = ROW_FIN_G + 2
ROW_PROJ_B = ROW_FIN_G + 3
N_SLAB_ROWS = ROW_FIN_G + 4                              # 21 for N_LAYERS=2


# ------------------------------------ fused Pallas kernel ------------------------------------

def make_fused_kernel(TB, S):
    """TB = sequences per grid block (block contains WHOLE sequences only)."""
    M = TB * S
    D = D_MODEL
    H = N_HEADS
    DH = D // H
    scale = 1.0 / math.sqrt(DH)          # fast_transformers FullAttention softmax_temp
    f32 = jnp.float32
    bf16 = jnp.bfloat16

    def kernel(*refs):
        it = iter(refs)
        x_enc = next(it)          # (M, D)   f32  gathered + folded EncoderEmbLinear output
        ytype = next(it)          # (M, D)   f32  gathered + folded TypeLinear type-emb half
        pe = next(it)             # (S, D)   f32  sinusoidal PE slice
        slab = next(it)           # (N_SLAB_ROWS, 384) f32  all biases / LN params
        layer_w = [[next(it) for _ in range(4)] for _ in range(N_LAYERS)]  # wqkv, wo, w1, w2
        twx_pwa = next(it)        # (D, D + OUT_PAD) bf16  TypeLinear-x | head-0 weights
        pwb = next(it)            # (D, OUT_PAD)     bf16  heads 1..8 <- y_concat
        out_ref = next(it)        # (M, OUT_PAD)     f32

        def bias(row, width):
            return slab[row:row + 1, 0:width]            # (1, width) f32, static slice

        def layernorm(x, g, b):
            mu = jnp.mean(x, axis=-1, keepdims=True)
            var = jnp.mean((x - mu) ** 2, axis=-1, keepdims=True)
            return (x - mu) * jax.lax.rsqrt(var + LN_EPS) * g + b

        def gelu(x):
            # TODO(synk): PyTorch F.gelu is erf-exact; tanh approximation used for Mosaic lowering.
            c = math.sqrt(2.0 / math.pi)
            return 0.5 * x * (1.0 + jnp.tanh(c * (x + 0.044715 * x * x * x)))

        # ---- EncoderEmbLinear bias + PositionalEncoding (dropout p=0 -> identity) ----
        h = x_enc[...] + bias(ROW_ENC_B, D)
        h = (h.reshape(TB, S, D) + pe[...][None]).reshape(M, D)     # f32 (M, D)

        # single (S, S) causal mask shared across layers / heads
        r = jax.lax.broadcasted_iota(jnp.int32, (S, S), 0)
        c = jax.lax.broadcasted_iota(jnp.int32, (S, S), 1)
        causal = (r >= c)[None]                                      # (1, S, S)

        # ---- transformer encoder layers (post-norm, gelu FFN) ----
        for li, (wqkv, wo, w1, w2) in enumerate(layer_w):
            base = _layer_row(li)

            # fused Q/K/V projection: one (D, 3D) matmul
            qkv = jnp.dot(h.astype(bf16), wqkv[...],
                          preferred_element_type=f32) + bias(base + 0, 3 * D)
            qkv3 = qkv.reshape(TB, S, 3 * D)
            wo_full = wo[...]

            # per-head causal attention; head-merge + output projection folded into
            # row-sliced W_o accumulation (no lane-dim concatenate)
            att = None
            for hd in range(H):
                q_h = qkv3[:, :, hd * DH:(hd + 1) * DH]
                k_h = qkv3[:, :, D + hd * DH:D + (hd + 1) * DH]
                v_h = qkv3[:, :, 2 * D + hd * DH:2 * D + (hd + 1) * DH]
                s = jnp.einsum('bqd,bkd->bqk', q_h, k_h,
                               preferred_element_type=f32) * scale   # (TB, S, S)
                s = jnp.where(causal, s, -1e30)
                p = jax.nn.softmax(s, axis=-1)                        # f32 softmax
                oh = jnp.einsum('bqk,bkd->bqd', p, v_h,
                                preferred_element_type=f32).reshape(M, DH)
                contrib = jnp.dot(oh.astype(bf16),
                                  wo_full[hd * DH:(hd + 1) * DH, :],
                                  preferred_element_type=f32)
                att = contrib if att is None else att + contrib
            att = att + bias(base + 1, D)

            # fast_transformers TransformerEncoderLayer (dropout = 0)
            h = layernorm(h + att, bias(base + 2, D), bias(base + 3, D))
            y = gelu(jnp.dot(h.astype(bf16), w1[...],
                             preferred_element_type=f32) + bias(base + 4, D_FF))
            y = jnp.dot(y.astype(bf16), w2[...],
                        preferred_element_type=f32) + bias(base + 5, D)
            h = layernorm(h + y, bias(base + 6, D), bias(base + 7, D))

        x_song = layernorm(h, bias(ROW_FIN_G, D), bias(ROW_FIN_B, D))   # encoder final norm

        # TypeLinear (x_song half) + head-0 projection fused into one 384-wide matmul
        xw = jnp.dot(x_song.astype(bf16), twx_pwa[...], preferred_element_type=f32)
        y_concat = xw[:, 0:D] + ytype[...] + bias(ROW_TYPE_B, D)
        logits = (xw[:, D:D + OUT_PAD]
                  + jnp.dot(y_concat.astype(bf16), pwb[...], preferred_element_type=f32)
                  + bias(ROW_PROJ_B, OUT_PAD))
        out_ref[...] = logits

    return kernel


def fused_forward(params, x_enc, y_type_proj, pe_slice, B, S, seq_block):
    M = B * S
    TB = seq_block
    assert B % TB == 0, "seq_block must divide batch"
    M_blk = TB * S
    assert M_blk % 8 == 0 or M_blk == M, "token block must be sublane-aligned"

    weights = []
    for lyr in params['layers']:
        weights += [lyr['wqkv'], lyr['wo'], lyr['w1'], lyr['w2']]
    weights += [params['twx_pwa'], params['pwb']]

    inputs = [x_enc, y_type_proj, pe_slice, params['bias_slab']] + weights

    tiled = lambda i: (i, 0)     # batch-block tiled (whole sequences per block)
    whole = lambda i: (0, 0)     # constant block index -> weights stay VMEM-resident

    in_specs = ([pl.BlockSpec((M_blk, D_MODEL), tiled),
                 pl.BlockSpec((M_blk, D_MODEL), tiled),
                 pl.BlockSpec(pe_slice.shape, whole),
                 pl.BlockSpec(params['bias_slab'].shape, whole)]
                + [pl.BlockSpec(w.shape, whole) for w in weights])

    return pl.pallas_call(
        make_fused_kernel(TB, S),
        out_shape=jax.ShapeDtypeStruct((M, OUT_PAD), jnp.float32),
        grid=(B // TB,),
        in_specs=in_specs,
        out_specs=pl.BlockSpec((M_blk, OUT_PAD), tiled),
        compiler_params=pltpu.CompilerParams(
            dimension_semantics=("parallel",),           # megacore-shard batch blocks on v7x
            vmem_limit_bytes=32 * 1024 * 1024),          # footprint is ~2 MiB; safe on 64 MiB v7x
    )(*inputs)


# ------------------------------------ parameters ------------------------------------

def pack_bias_slab(enc_b, layer_biases, fin_g, fin_b, type_b, proj_b):
    slab = jnp.zeros((N_SLAB_ROWS, SLAB_W), jnp.float32)

    def put(s, r, v):
        v = jnp.asarray(v, jnp.float32).reshape(-1)
        return s.at[r, :v.shape[0]].set(v)

    slab = put(slab, ROW_ENC_B, enc_b)
    for li, lb in enumerate(layer_biases):
        base = _layer_row(li)
        for j, name in enumerate(_LAYER_BIAS_NAMES):
            slab = put(slab, base + j, lb[name])
    slab = put(slab, ROW_FIN_G, fin_g)
    slab = put(slab, ROW_FIN_B, fin_b)
    slab = put(slab, ROW_TYPE_B, type_b)
    slab = put(slab, ROW_PROJ_B, proj_b)
    return slab


def init_params(key):
    keys = iter(jax.random.split(key, 64))

    def rnd(shape, dtype=jnp.float32):
        return (0.02 * jax.random.normal(next(keys), shape, jnp.float32)).astype(dtype)

    bf16 = jnp.bfloat16
    params = {}

    # embedding tables (f32; gathers + the enc_w / twe folds stay in XLA glue)
    params['emb'] = {k: rnd((CLASS_NUMS[k], EMB_SIZES[k])) for k in EVENT_KEYS}

    # EncoderEmbLinear weight kept f32 host-side; folded per key into 128-wide gather tables
    params['enc_w'] = rnd((SUM_EMB, D_MODEL))
    enc_b = jnp.zeros((D_MODEL,), jnp.float32)

    layers, layer_biases = [], []
    for _ in range(N_LAYERS):
        layers.append({
            'wqkv': rnd((D_MODEL, 3 * D_MODEL), bf16),   # fused Q|K|V
            'wo': rnd((D_MODEL, D_MODEL), bf16),
            'w1': rnd((D_MODEL, D_FF), bf16),
            'w2': rnd((D_FF, D_MODEL), bf16),
        })
        layer_biases.append({
            'bqkv': jnp.zeros((3 * D_MODEL,), jnp.float32),
            'bo': jnp.zeros((D_MODEL,), jnp.float32),
            'ln1_g': jnp.ones((D_MODEL,), jnp.float32),
            'ln1_b': jnp.zeros((D_MODEL,), jnp.float32),
            'b1': jnp.zeros((D_FF,), jnp.float32),
            'b2': jnp.zeros((D_MODEL,), jnp.float32),
            'ln2_g': jnp.ones((D_MODEL,), jnp.float32),
            'ln2_b': jnp.zeros((D_MODEL,), jnp.float32),
        })
    params['layers'] = layers

    # TypeLinear split: type-emb half folded wrapper-side; x_song half fused with head-0 weights
    type_wx = rnd((D_MODEL, D_MODEL))
    params['type_we'] = rnd((EMB_SIZES['type'], D_MODEL))

    wa = jnp.zeros((D_MODEL, OUT_PAD), jnp.float32)      # head 0 ('type') <- x_song
    wb = jnp.zeros((D_MODEL, OUT_PAD), jnp.float32)      # heads 1..8     <- y_concat
    for i, k in enumerate(EVENT_KEYS):
        w = rnd((D_MODEL, CLASS_NUMS[k]))
        off = OUT_OFFSETS[k]
        if i == 0:
            wa = wa.at[:, off:off + CLASS_NUMS[k]].set(w)
        else:
            wb = wb.at[:, off:off + CLASS_NUMS[k]].set(w)
    params['twx_pwa'] = jnp.concatenate([type_wx, wa], axis=1).astype(bf16)   # (D, D+OUT_PAD)
    params['pwb'] = wb.astype(bf16)

    params['bias_slab'] = pack_bias_slab(
        enc_b, layer_biases,
        jnp.ones((D_MODEL,), jnp.float32), jnp.zeros((D_MODEL,), jnp.float32),
        jnp.zeros((D_MODEL,), jnp.float32), jnp.zeros((OUT_PAD,), jnp.float32))

    # sinusoidal positional-encoding table (Annotated-Transformer PositionalEncoding)
    pos = jnp.arange(MAX_LEN, dtype=jnp.float32)[:, None]
    div = jnp.exp(jnp.arange(0, D_MODEL, 2, dtype=jnp.float32) * (-math.log(10000.0) / D_MODEL))
    pe = jnp.zeros((MAX_LEN, D_MODEL), jnp.float32)
    pe = pe.at[:, 0::2].set(jnp.sin(pos * div))
    pe = pe.at[:, 1::2].set(jnp.cos(pos * div))
    params['pe'] = pe
    return params


# ------------------------------------ forward (training path) ------------------------------------

def pick_seq_block(B, S, target_rows=512):
    tb = max(1, min(B, target_rows // max(S, 1)))
    while tb > 1 and B % tb != 0:
        tb -= 1
    if (tb * S) % 8 != 0:
        tb = B                     # full-array block is exempt from the sublane constraint
    return tb


def forward_training(params, x, y_gt, seq_block=None):
    """x, y_gt: (B, S, 9) int32.  Returns list of 9 logit arrays (B, S, n_class[k])."""
    B, S, _ = x.shape
    M = B * S
    if seq_block is None:
        seq_block = pick_seq_block(B, S)

    # forward_emb + EncoderEmbLinear, algebraically folded:
    #   concat_k(emb_k * sqrt(d_k)) @ W  ==  sum_k (emb_k * sqrt(d_k)) @ W[rows of key k]
    # so the kernel consumes a gathered (M, 128) slab instead of a (M, 2432) concat.
    x_enc = jnp.zeros((B, S, D_MODEL), jnp.float32)
    for i, k in enumerate(EVENT_KEYS):
        off = EMB_OFFSETS[k]
        tbl = (params['emb'][k] * math.sqrt(EMB_SIZES[k])) @ \
            params['enc_w'][off:off + EMB_SIZES[k], :]
        x_enc = x_enc + tbl[x[..., i]]                               # gather stays in JAX (glue)
    x_enc = x_enc.reshape(M, D_MODEL)

    # TypeLinear type-embedding half folded the same way
    type_tbl = (params['emb']['type'] * math.sqrt(EMB_SIZES['type'])) @ params['type_we']
    y_type_proj = type_tbl[y_gt[..., 0]].reshape(M, D_MODEL)

    pe_slice = params['pe'][:S]                                      # (S, D) f32

    # one fused, batch-block-tiled kernel: PE + transformer + TypeLinear + all 9 heads
    logits = fused_forward(params, x_enc, y_type_proj, pe_slice, B, S, seq_block)  # (M, 256)

    y_events = []
    for kname in EVENT_KEYS:
        off = OUT_OFFSETS[kname]
        n = CLASS_NUMS[kname]
        y_events.append(logits[:, off:off + n].reshape(B, S, n))
    return y_events


forward_training_jit = jax.jit(forward_training, static_argnames=('seq_block',))


# ------------------------------------ main ------------------------------------

if __name__ == "__main__":
    key = jax.random.PRNGKey(0)
    pkey, xkey, ykey = jax.random.split(key, 3)
    params = init_params(pkey)

    B, S = 2, 8
    xkeys = jax.random.split(xkey, len(EVENT_KEYS))
    ykeys = jax.random.split(ykey, len(EVENT_KEYS))
    x = jnp.stack([jax.random.randint(xkeys[i], (B, S), 0, CLASS_NUMS[k])
                   for i, k in enumerate(EVENT_KEYS)], axis=-1).astype(jnp.int32)
    y_gt = jnp.stack([jax.random.randint(ykeys[i], (B, S), 0, CLASS_NUMS[k])
                      for i, k in enumerate(EVENT_KEYS)], axis=-1).astype(jnp.int32)

    # seq_block=1 -> grid=(2,): exercises the pipelined / megacore-parallel batch-block path.
    outs = forward_training_jit(params, x, y_gt, seq_block=1)
    outs = jax.block_until_ready(outs)

    assert len(outs) == len(EVENT_KEYS)
    for kname, o in zip(EVENT_KEYS, outs):
        assert o.shape == (B, S, CLASS_NUMS[kname]), (kname, o.shape)
        assert o.dtype == jnp.float32
        assert bool(jnp.all(jnp.isfinite(o)))
    print("KERNEL_OK")
</pallas_src>

<mosaic_0001>
module attributes {stable_mosaic.version = 11 : i64} {
  func.func @kernel(%arg0: i32, %arg1: memref<8x128xf32, #tpu.memory_space<vmem>>, %arg2: memref<8x128xf32, #tpu.memory_space<vmem>>, %arg3: memref<8x128xf32, #tpu.memory_space<vmem>>, %arg4: memref<21x384xf32, #tpu.memory_space<vmem>>, %arg5: memref<128x384xbf16, #tpu.memory_space<vmem>>, %arg6: memref<128x128xbf16, #tpu.memory_space<vmem>>, %arg7: memref<128x256xbf16, #tpu.memory_space<vmem>>, %arg8: memref<256x128xbf16, #tpu.memory_space<vmem>>, %arg9: memref<128x384xbf16, #tpu.memory_space<vmem>>, %arg10: memref<128x128xbf16, #tpu.memory_space<vmem>>, %arg11: memref<128x256xbf16, #tpu.memory_space<vmem>>, %arg12: memref<256x128xbf16, #tpu.memory_space<vmem>>, %arg13: memref<128x384xbf16, #tpu.memory_space<vmem>>, %arg14: memref<128x256xbf16, #tpu.memory_space<vmem>>, %arg15: memref<8x256xf32, #tpu.memory_space<vmem>>) attributes {dimension_semantics = [#tpu.dimension_semantics<parallel>], iteration_bounds = array<i64: 2>, scalar_prefetch = 0 : i64, scratch_operands = 0 : i64, tpu.core_type = #tpu.core_type<tc>, window_params = [{transform_indices = @transform_0, window_bounds = array<i64: 8, 128>}, {transform_indices = @transform_1, window_bounds = array<i64: 8, 128>}, {pipeline_mode = #tpu.pipeline_mode<synchronous>, transform_indices = @transform_2, window_bounds = array<i64: 8, 128>}, {pipeline_mode = #tpu.pipeline_mode<synchronous>, transform_indices = @transform_3, window_bounds = array<i64: 21, 384>}, {pipeline_mode = #tpu.pipeline_mode<synchronous>, transform_indices = @transform_4, window_bounds = array<i64: 128, 384>}, {pipeline_mode = #tpu.pipeline_mode<synchronous>, transform_indices = @transform_5, window_bounds = array<i64: 128, 128>}, {pipeline_mode = #tpu.pipeline_mode<synchronous>, transform_indices = @transform_6, window_bounds = array<i64: 128, 256>}, {pipeline_mode = #tpu.pipeline_mode<synchronous>, transform_indices = @transform_7, window_bounds = array<i64: 256, 128>}, {pipeline_mode = #tpu.pipeline_mode<synchronous>, transform_indices = @transform_8, window_bounds = array<i64: 128, 384>}, {pipeline_mode = #tpu.pipeline_mode<synchronous>, transform_indices = @transform_9, window_bounds = array<i64: 128, 128>}, {pipeline_mode = #tpu.pipeline_mode<synchronous>, transform_indices = @transform_10, window_bounds = array<i64: 128, 256>}, {pipeline_mode = #tpu.pipeline_mode<synchronous>, transform_indices = @transform_11, window_bounds = array<i64: 256, 128>}, {pipeline_mode = #tpu.pipeline_mode<synchronous>, transform_indices = @transform_12, window_bounds = array<i64: 128, 384>}, {pipeline_mode = #tpu.pipeline_mode<synchronous>, transform_indices = @transform_13, window_bounds = array<i64: 128, 256>}, {transform_indices = @transform_14, window_bounds = array<i64: 8, 256>}]} {
    %c0 = arith.constant 0 : index
    %c0_0 = arith.constant 0 : index
    %0 = vector.load %arg1[%c0, %c0_0] : memref<8x128xf32, #tpu.memory_space<vmem>>, vector<8x128xf32>
    %c0_1 = arith.constant 0 : index
    %c0_2 = arith.constant 0 : index
    %1 = vector.load %arg4[%c0_1, %c0_2] : memref<21x384xf32, #tpu.memory_space<vmem>>, vector<1x128xf32>
    %2 = vector.broadcast %1 : vector<1x128xf32> to vector<8x128xf32>
    %3 = arith.addf %0, %2 : vector<8x128xf32>
    %4 = vector.shape_cast %3 : vector<8x128xf32> to vector<1x8x128xf32>
    %c0_3 = arith.constant 0 : index
    %c0_4 = arith.constant 0 : index
    %5 = vector.load %arg3[%c0_3, %c0_4] : memref<8x128xf32, #tpu.memory_space<vmem>>, vector<8x128xf32>
    %6 = vector.shape_cast %5 : vector<8x128xf32> to vector<1x8x128xf32>
    %7 = arith.addf %4, %6 : vector<1x8x128xf32>
    %8 = vector.shape_cast %7 : vector<1x8x128xf32> to vector<8x128xf32>
    %9 = tpu.iota {dimensions = array<i32: 0>} : vector<8x8xi32>
    %10 = tpu.iota {dimensions = array<i32: 1>} : vector<8x8xi32>
    %11 = arith.cmpi sge, %9, %10 : vector<8x8xi32>
    %12 = vector.shape_cast %11 : vector<8x8xi1> to vector<1x8x8xi1>
    %13 = arith.truncf %8 : vector<8x128xf32> to vector<8x128xbf16>
    %c0_5 = arith.constant 0 : index
    %c0_6 = arith.constant 0 : index
    %14 = vector.load %arg5[%c0_5, %c0_6] : memref<128x384xbf16, #tpu.memory_space<vmem>>, vector<128x384xbf16>
    %cst = arith.constant dense<0.000000e+00> : vector<8x384xf32>
    %15 = tpu.matmul %13, %14, %cst {dimension_numbers = #tpu.dot_dimension_numbers<[1], [0], [0], [1], [0, 0, 1, 1], [], []>} : vector<8x128xbf16>, vector<128x384xbf16>, vector<8x384xf32> -> vector<8x384xf32>
    %c1 = arith.constant 1 : index
    %c0_7 = arith.constant 0 : index
    %16 = vector.load %arg4[%c1, %c0_7] : memref<21x384xf32, #tpu.memory_space<vmem>>, vector<1x384xf32>
    %17 = vector.broadcast %16 : vector<1x384xf32> to vector<8x384xf32>
    %18 = arith.addf %15, %17 : vector<8x384xf32>
    %19 = vector.shape_cast %18 : vector<8x384xf32> to vector<1x8x384xf32>
    %c0_8 = arith.constant 0 : index
    %c0_9 = arith.constant 0 : index
    %20 = vector.load %arg6[%c0_8, %c0_9] : memref<128x128xbf16, #tpu.memory_space<vmem>>, vector<128x128xbf16>
    %21 = vector.extract_strided_slice %19 {offsets = [0, 0, 0], sizes = [1, 8, 32], strides = [1, 1, 1]} : vector<1x8x384xf32> to vector<1x8x32xf32>
    %22 = vector.extract_strided_slice %19 {offsets = [0, 0, 128], sizes = [1, 8, 32], strides = [1, 1, 1]} : vector<1x8x384xf32> to vector<1x8x32xf32>
    %23 = vector.extract_strided_slice %19 {offsets = [0, 0, 256], sizes = [1, 8, 32], strides = [1, 1, 1]} : vector<1x8x384xf32> to vector<1x8x32xf32>
    "tpu.trace_start"() <{level = 10 : i32, message = "bqd,bkd->bqk"}> : () -> ()
    %cst_10 = arith.constant dense<0.000000e+00> : vector<1x8x8xf32>
    %24 = tpu.matmul %21, %22, %cst_10 {dimension_numbers = #tpu.dot_dimension_numbers<[2], [2], [1], [1], [0, 0, 0, 1, 1, 1], [0], [0]>} : vector<1x8x32xf32>, vector<1x8x32xf32>, vector<1x8x8xf32> -> vector<1x8x8xf32>
    "tpu.trace_stop"() : () -> ()
    %cst_11 = arith.constant 0.176776692 : f32
    %25 = vector.broadcast %cst_11 : f32 to vector<1x8x8xf32>
    %26 = arith.mulf %24, %25 : vector<1x8x8xf32>
    %cst_12 = arith.constant -1.000000e+30 : f32
    %27 = vector.broadcast %cst_12 : f32 to vector<1x8x8xf32>
    %28 = arith.select %12, %26, %27 : vector<1x8x8xi1>, vector<1x8x8xf32>
    %cst_13 = arith.constant dense<0xFF800000> : vector<1x8xf32>
    %29 = vector.multi_reduction <maximumf>, %28, %cst_13 [2] : vector<1x8x8xf32> to vector<1x8xf32>
    %cst_14 = arith.constant 0xFF800000 : f32
    %30 = vector.broadcast %cst_14 : f32 to vector<1x8xf32>
    %31 = arith.maximumf %30, %29 : vector<1x8xf32>
    %32 = vector.shape_cast %31 : vector<1x8xf32> to vector<1x8x1xf32>
    %33 = vector.broadcast %32 : vector<1x8x1xf32> to vector<1x8x8xf32>
    %34 = arith.subf %28, %33 : vector<1x8x8xf32>
    %35 = math.exp %34 : vector<1x8x8xf32>
    %cst_15 = arith.constant dense<0.000000e+00> : vector<1x8xf32>
    %36 = vector.multi_reduction <add>, %35, %cst_15 [2] : vector<1x8x8xf32> to vector<1x8xf32>
    %37 = vector.shape_cast %36 : vector<1x8xf32> to vector<1x8x1xf32>
    %38 = vector.broadcast %37 : vector<1x8x1xf32> to vector<1x8x8xf32>
    %39 = arith.divf %35, %38 : vector<1x8x8xf32>
    "tpu.trace_start"() <{level = 10 : i32, message = "bqk,bkd->bqd"}> : () -> ()
    %cst_16 = arith.constant dense<0.000000e+00> : vector<1x8x32xf32>
    %40 = tpu.matmul %39, %23, %cst_16 {dimension_numbers = #tpu.dot_dimension_numbers<[2], [1], [1], [2], [0, 0, 0, 1, 1, 2], [0], [0]>} : vector<1x8x8xf32>, vector<1x8x32xf32>, vector<1x8x32xf32> -> vector<1x8x32xf32>
    "tpu.trace_stop"() : () -> ()
    %41 = vector.shape_cast %40 : vector<1x8x32xf32> to vector<8x32xf32>
    %42 = arith.truncf %41 : vector<8x32xf32> to vector<8x32xbf16>
    %43 = vector.extract_strided_slice %20 {offsets = [0, 0], sizes = [32, 128], strides = [1, 1]} : vector<128x128xbf16> to vector<32x128xbf16>
    %cst_17 = arith.constant dense<0.000000e+00> : vector<8x128xf32>
    %44 = tpu.matmul %42, %43, %cst_17 {dimension_numbers = #tpu.dot_dimension_numbers<[1], [0], [0], [1], [0, 0, 1, 1], [], []>} : vector<8x32xbf16>, vector<32x128xbf16>, vector<8x128xf32> -> vector<8x128xf32>
    %45 = vector.extract_strided_slice %19 {offsets = [0, 0, 32], sizes = [1, 8, 32], strides = [1, 1, 1]} : vector<1x8x384xf32> to vector<1x8x32xf32>
    %46 = vector.extract_strided_slice %19 {offsets = [0, 0, 160], sizes = [1, 8, 32], strides = [1, 1, 1]} : vector<1x8x384xf32> to vector<1x8x32xf32>
    %47 = vector.extract_strided_slice %19 {offsets = [0, 0, 288], sizes = [1, 8, 32], strides = [1, 1, 1]} : vector<1x8x384xf32> to vector<1x8x32xf32>
    "tpu.trace_start"() <{level = 10 : i32, message = "bqd,bkd->bqk"}> : () -> ()
    %cst_18 = arith.constant dense<0.000000e+00> : vector<1x8x8xf32>
    %48 = tpu.matmul %45, %46, %cst_18 {dimension_numbers = #tpu.dot_dimension_numbers<[2], [2], [1], [1], [0, 0, 0, 1, 1, 1], [0], [0]>} : vector<1x8x32xf32>, vector<1x8x32xf32>, vector<1x8x8xf32> -> vector<1x8x8xf32>
    "tpu.trace_stop"() : () -> ()
    %cst_19 = arith.constant 0.176776692 : f32
    %49 = vector.broadcast %cst_19 : f32 to vector<1x8x8xf32>
    %50 = arith.mulf %48, %49 : vector<1x8x8xf32>
    %cst_20 = arith.constant -1.000000e+30 : f32
    %51 = vector.broadcast %cst_20 : f32 to vector<1x8x8xf32>
    %52 = arith.select %12, %50, %51 : vector<1x8x8xi1>, vector<1x8x8xf32>
    %cst_21 = arith.constant dense<0xFF800000> : vector<1x8xf32>
    %53 = vector.multi_reduction <maximumf>, %52, %cst_21 [2] : vector<1x8x8xf32> to vector<1x8xf32>
    %cst_22 = arith.constant 0xFF800000 : f32
    %54 = vector.broadcast %cst_22 : f32 to vector<1x8xf32>
    %55 = arith.maximumf %54, %53 : vector<1x8xf32>
    %56 = vector.shape_cast %55 : vector<1x8xf32> to vector<1x8x1xf32>
    %57 = vector.broadcast %56 : vector<1x8x1xf32> to vector<1x8x8xf32>
    %58 = arith.subf %52, %57 : vector<1x8x8xf32>
    %59 = math.exp %58 : vector<1x8x8xf32>
    %cst_23 = arith.constant dense<0.000000e+00> : vector<1x8xf32>
    %60 = vector.multi_reduction <add>, %59, %cst_23 [2] : vector<1x8x8xf32> to vector<1x8xf32>
    %61 = vector.shape_cast %60 : vector<1x8xf32> to vector<1x8x1xf32>
    %62 = vector.broadcast %61 : vector<1x8x1xf32> to vector<1x8x8xf32>
    %63 = arith.divf %59, %62 : vector<1x8x8xf32>
    "tpu.trace_start"() <{level = 10 : i32, message = "bqk,bkd->bqd"}> : () -> ()
    %cst_24 = arith.constant dense<0.000000e+00> : vector<1x8x32xf32>
    %64 = tpu.matmul %63, %47, %cst_24 {dimension_numbers = #tpu.dot_dimension_numbers<[2], [1], [1], [2], [0, 0, 0, 1, 1, 2], [0], [0]>} : vector<1x8x8xf32>, vector<1x8x32xf32>, vector<1x8x32xf32> -> vector<1x8x32xf32>
    "tpu.trace_stop"() : () -> ()
    %65 = vector.shape_cast %64 : vector<1x8x32xf32> to vector<8x32xf32>
    %66 = arith.truncf %65 : vector<8x32xf32> to vector<8x32xbf16>
    %67 = vector.extract_strided_slice %20 {offsets = [32, 0], sizes = [32, 128], strides = [1, 1]} : vector<128x128xbf16> to vector<32x128xbf16>
    %cst_25 = arith.constant dense<0.000000e+00> : vector<8x128xf32>
    %68 = tpu.matmul %66, %67, %cst_25 {dimension_numbers = #tpu.dot_dimension_numbers<[1], [0], [0], [1], [0, 0, 1, 1], [], []>} : vector<8x32xbf16>, vector<32x128xbf16>, vector<8x128xf32> -> vector<8x128xf32>
    %69 = arith.addf %44, %68 : vector<8x128xf32>
    %70 = vector.extract_strided_slice %19 {offsets = [0, 0, 64], sizes = [1, 8, 32], strides = [1, 1, 1]} : vector<1x8x384xf32> to vector<1x8x32xf32>
    %71 = vector.extract_strided_slice %19 {offsets = [0, 0, 192], sizes = [1, 8, 32], strides = [1, 1, 1]} : vector<1x8x384xf32> to vector<1x8x32xf32>
    %72 = vector.extract_strided_slice %19 {offsets = [0, 0, 320], sizes = [1, 8, 32], strides = [1, 1, 1]} : vector<1x8x384xf32> to vector<1x8x32xf32>
    "tpu.trace_start"() <{level = 10 : i32, message = "bqd,bkd->bqk"}> : () -> ()
    %cst_26 = arith.constant dense<0.000000e+00> : vector<1x8x8xf32>
    %73 = tpu.matmul %70, %71, %cst_26 {dimension_numbers = #tpu.dot_dimension_numbers<[2], [2], [1], [1], [0, 0, 0, 1, 1, 1], [0], [0]>} : vector<1x8x32xf32>, vector<1x8x32xf32>, vector<1x8x8xf32> -> vector<1x8x8xf32>
    "tpu.trace_stop"() : () -> ()
    %cst_27 = arith.constant 0.176776692 : f32
    %74 = vector.broadcast %cst_27 : f32 to vector<1x8x8xf32>
    %75 = arith.mulf %73, %74 : vector<1x8x8xf32>
    %cst_28 = arith.constant -1.000000e+30 : f32
    %76 = vector.broadcast %cst_28 : f32 to vector<1x8x8xf32>
    %77 = arith.select %12, %75, %76 : vector<1x8x8xi1>, vector<1x8x8xf32>
    %cst_29 = arith.constant dense<0xFF800000> : vector<1x8xf32>
    %78 = vector.multi_reduction <maximumf>, %77, %cst_29 [2] : vector<1x8x8xf32> to vector<1x8xf32>
    %cst_30 = arith.constant 0xFF800000 : f32
    %79 = vector.broadcast %cst_30 : f32 to vector<1x8xf32>
    %80 = arith.maximumf %79, %78 : vector<1x8xf32>
    %81 = vector.shape_cast %80 : vector<1x8xf32> to vector<1x8x1xf32>
    %82 = vector.broadcast %81 : vector<1x8x1xf32> to vector<1x8x8xf32>
    %83 = arith.subf %77, %82 : vector<1x8x8xf32>
    %84 = math.exp %83 : vector<1x8x8xf32>
    %cst_31 = arith.constant dense<0.000000e+00> : vector<1x8xf32>
    %85 = vector.multi_reduction <add>, %84, %cst_31 [2] : vector<1x8x8xf32> to vector<1x8xf32>
    %86 = vector.shape_cast %85 : vector<1x8xf32> to vector<1x8x1xf32>
    %87 = vector.broadcast %86 : vector<1x8x1xf32> to vector<1x8x8xf32>
    %88 = arith.divf %84, %87 : vector<1x8x8xf32>
    "tpu.trace_start"() <{level = 10 : i32, message = "bqk,bkd->bqd"}> : () -> ()
    %cst_32 = arith.constant dense<0.000000e+00> : vector<1x8x32xf32>
    %89 = tpu.matmul %88, %72, %cst_32 {dimension_numbers = #tpu.dot_dimension_numbers<[2], [1], [1], [2], [0, 0, 0, 1, 1, 2], [0], [0]>} : vector<1x8x8xf32>, vector<1x8x32xf32>, vector<1x8x32xf32> -> vector<1x8x32xf32>
    "tpu.trace_stop"() : () -> ()
    %90 = vector.shape_cast %89 : vector<1x8x32xf32> to vector<8x32xf32>
    %91 = arith.truncf %90 : vector<8x32xf32> to vector<8x32xbf16>
    %92 = vector.extract_strided_slice %20 {offsets = [64, 0], sizes = [32, 128], strides = [1, 1]} : vector<128x128xbf16> to vector<32x128xbf16>
    %cst_33 = arith.constant dense<0.000000e+00> : vector<8x128xf32>
    %93 = tpu.matmul %91, %92, %cst_33 {dimension_numbers = #tpu.dot_dimension_numbers<[1], [0], [0], [1], [0, 0, 1, 1], [], []>} : vector<8x32xbf16>, vector<32x128xbf16>, vector<8x128xf32> -> vector<8x128xf32>
    %94 = arith.addf %69, %93 : vector<8x128xf32>
    %95 = vector.extract_strided_slice %19 {offsets = [0, 0, 96], sizes = [1, 8, 32], strides = [1, 1, 1]} : vector<1x8x384xf32> to vector<1x8x32xf32>
    %96 = vector.extract_strided_slice %19 {offsets = [0, 0, 224], sizes = [1, 8, 32], strides = [1, 1, 1]} : vector<1x8x384xf32> to vector<1x8x32xf32>
    %97 = vector.extract_strided_slice %19 {offsets = [0, 0, 352], sizes = [1, 8, 32], strides = [1, 1, 1]} : vector<1x8x384xf32> to vector<1x8x32xf32>
    "tpu.trace_start"() <{level = 10 : i32, message = "bqd,bkd->bqk"}> : () -> ()
    %cst_34 = arith.constant dense<0.000000e+00> : vector<1x8x8xf32>
    %98 = tpu.matmul %95, %96, %cst_34 {dimension_numbers = #tpu.dot_dimension_numbers<[2], [2], [1], [1], [0, 0, 0, 1, 1, 1], [0], [0]>} : vector<1x8x32xf32>, vector<1x8x32xf32>, vector<1x8x8xf32> -> vector<1x8x8xf32>
    "tpu.trace_stop"() : () -> ()
    %cst_35 = arith.constant 0.176776692 : f32
    %99 = vector.broadcast %cst_35 : f32 to vector<1x8x8xf32>
    %100 = arith.mulf %98, %99 : vector<1x8x8xf32>
    %cst_36 = arith.constant -1.000000e+30 : f32
    %101 = vector.broadcast %cst_36 : f32 to vector<1x8x8xf32>
    %102 = arith.select %12, %100, %101 : vector<1x8x8xi1>, vector<1x8x8xf32>
    %cst_37 = arith.constant dense<0xFF800000> : vector<1x8xf32>
    %103 = vector.multi_reduction <maximumf>, %102, %cst_37 [2] : vector<1x8x8xf32> to vector<1x8xf32>
    %cst_38 = arith.constant 0xFF800000 : f32
    %104 = vector.broadcast %cst_38 : f32 to vector<1x8xf32>
    %105 = arith.maximumf %104, %103 : vector<1x8xf32>
    %106 = vector.shape_cast %105 : vector<1x8xf32> to vector<1x8x1xf32>
    %107 = vector.broadcast %106 : vector<1x8x1xf32> to vector<1x8x8xf32>
    %108 = arith.subf %102, %107 : vector<1x8x8xf32>
    %109 = math.exp %108 : vector<1x8x8xf32>
    %cst_39 = arith.constant dense<0.000000e+00> : vector<1x8xf32>
    %110 = vector.multi_reduction <add>, %109, %cst_39 [2] : vector<1x8x8xf32> to vector<1x8xf32>
    %111 = vector.shape_cast %110 : vector<1x8xf32> to vector<1x8x1xf32>
    %112 = vector.broadcast %111 : vector<1x8x1xf32> to vector<1x8x8xf32>
    %113 = arith.divf %109, %112 : vector<1x8x8xf32>
    "tpu.trace_start"() <{level = 10 : i32, message = "bqk,bkd->bqd"}> : () -> ()
    %cst_40 = arith.constant dense<0.000000e+00> : vector<1x8x32xf32>
    %114 = tpu.matmul %113, %97, %cst_40 {dimension_numbers = #tpu.dot_dimension_numbers<[2], [1], [1], [2], [0, 0, 0, 1, 1, 2], [0], [0]>} : vector<1x8x8xf32>, vector<1x8x32xf32>, vector<1x8x32xf32> -> vector<1x8x32xf32>
    "tpu.trace_stop"() : () -> ()
    %115 = vector.shape_cast %114 : vector<1x8x32xf32> to vector<8x32xf32>
    %116 = arith.truncf %115 : vector<8x32xf32> to vector<8x32xbf16>
    %117 = vector.extract_strided_slice %20 {offsets = [96, 0], sizes = [32, 128], strides = [1, 1]} : vector<128x128xbf16> to vector<32x128xbf16>
    %cst_41 = arith.constant dense<0.000000e+00> : vector<8x128xf32>
    %118 = tpu.matmul %116, %117, %cst_41 {dimension_numbers = #tpu.dot_dimension_numbers<[1], [0], [0], [1], [0, 0, 1, 1], [], []>} : vector<8x32xbf16>, vector<32x128xbf16>, vector<8x128xf32> -> vector<8x128xf32>
    %119 = arith.addf %94, %118 : vector<8x128xf32>
    %c2 = arith.constant 2 : index
    %c0_42 = arith.constant 0 : index
    %120 = vector.load %arg4[%c2, %c0_42] : memref<21x384xf32, #tpu.memory_space<vmem>>, vector<1x128xf32>
    %121 = vector.broadcast %120 : vector<1x128xf32> to vector<8x128xf32>
    %122 = arith.addf %119, %121 : vector<8x128xf32>
    %123 = arith.addf %8, %122 : vector<8x128xf32>
    %c3 = arith.constant 3 : index
    %c0_43 = arith.constant 0 : index
    %124 = vector.load %arg4[%c3, %c0_43] : memref<21x384xf32, #tpu.memory_space<vmem>>, vector<1x128xf32>
    %c4 = arith.constant 4 : index
    %c0_44 = arith.constant 0 : index
    %125 = vector.load %arg4[%c4, %c0_44] : memref<21x384xf32, #tpu.memory_space<vmem>>, vector<1x128xf32>
    %cst_45 = arith.constant dense<0.000000e+00> : vector<8xf32>
    %126 = vector.multi_reduction <add>, %123, %cst_45 [1] : vector<8x128xf32> to vector<8xf32>
    %127 = vector.shape_cast %126 : vector<8xf32> to vector<8x1xf32>
    %cst_46 = arith.constant 1.280000e+02 : f32
    %128 = vector.broadcast %cst_46 : f32 to vector<8x1xf32>
    %129 = arith.divf %127, %128 : vector<8x1xf32>
    %130 = vector.broadcast %129 : vector<8x1xf32> to vector<8x128xf32>
    %131 = arith.subf %123, %130 : vector<8x128xf32>
    %132 = arith.mulf %131, %131 : vector<8x128xf32>
    %cst_47 = arith.constant dense<0.000000e+00> : vector<8xf32>
    %133 = vector.multi_reduction <add>, %132, %cst_47 [1] : vector<8x128xf32> to vector<8xf32>
    %134 = vector.shape_cast %133 : vector<8xf32> to vector<8x1xf32>
    %cst_48 = arith.constant 1.280000e+02 : f32
    %135 = vector.broadcast %cst_48 : f32 to vector<8x1xf32>
    %136 = arith.divf %134, %135 : vector<8x1xf32>
    %137 = vector.broadcast %129 : vector<8x1xf32> to vector<8x128xf32>
    %138 = arith.subf %123, %137 : vector<8x128xf32>
    %cst_49 = arith.constant 9.99999974E-6 : f32
    %139 = vector.broadcast %cst_49 : f32 to vector<8x1xf32>
    %140 = arith.addf %136, %139 : vector<8x1xf32>
    %141 = math.rsqrt %140 : vector<8x1xf32>
    %142 = vector.broadcast %141 : vector<8x1xf32> to vector<8x128xf32>
    %143 = arith.mulf %138, %142 : vector<8x128xf32>
    %144 = vector.broadcast %124 : vector<1x128xf32> to vector<8x128xf32>
    %145 = arith.mulf %143, %144 : vector<8x128xf32>
    %146 = vector.broadcast %125 : vector<1x128xf32> to vector<8x128xf32>
    %147 = arith.addf %145, %146 : vector<8x128xf32>
    %148 = arith.truncf %147 : vector<8x128xf32> to vector<8x128xbf16>
    %c0_50 = arith.constant 0 : index
    %c0_51 = arith.constant 0 : index
    %149 = vector.load %arg7[%c0_50, %c0_51] : memref<128x256xbf16, #tpu.memory_space<vmem>>, vector<128x256xbf16>
    %cst_52 = arith.constant dense<0.000000e+00> : vector<8x256xf32>
    %150 = tpu.matmul %148, %149, %cst_52 {dimension_numbers = #tpu.dot_dimension_numbers<[1], [0], [0], [1], [0, 0, 1, 1], [], []>} : vector<8x128xbf16>, vector<128x256xbf16>, vector<8x256xf32> -> vector<8x256xf32>
    %c5 = arith.constant 5 : index
    %c0_53 = arith.constant 0 : index
    %151 = vector.load %arg4[%c5, %c0_53] : memref<21x384xf32, #tpu.memory_space<vmem>>, vector<1x256xf32>
    %152 = vector.broadcast %151 : vector<1x256xf32> to vector<8x256xf32>
    %153 = arith.addf %150, %152 : vector<8x256xf32>
    %cst_54 = arith.constant 5.000000e-01 : f32
    %154 = vector.broadcast %cst_54 : f32 to vector<8x256xf32>
    %155 = arith.mulf %154, %153 : vector<8x256xf32>
    %cst_55 = arith.constant 4.471500e-02 : f32
    %156 = vector.broadcast %cst_55 : f32 to vector<8x256xf32>
    %157 = arith.mulf %156, %153 : vector<8x256xf32>
    %158 = arith.mulf %157, %153 : vector<8x256xf32>
    %159 = arith.mulf %158, %153 : vector<8x256xf32>
    %160 = arith.addf %153, %159 : vector<8x256xf32>
    %cst_56 = arith.constant 0.797884583 : f32
    %161 = vector.broadcast %cst_56 : f32 to vector<8x256xf32>
    %162 = arith.mulf %161, %160 : vector<8x256xf32>
    %163 = math.tanh %162 : vector<8x256xf32>
    %cst_57 = arith.constant 1.000000e+00 : f32
    %164 = vector.broadcast %cst_57 : f32 to vector<8x256xf32>
    %165 = arith.addf %164, %163 : vector<8x256xf32>
    %166 = arith.mulf %155, %165 : vector<8x256xf32>
    %167 = arith.truncf %166 : vector<8x256xf32> to vector<8x256xbf16>
    %c0_58 = arith.constant 0 : index
    %c0_59 = arith.constant 0 : index
    %168 = vector.load %arg8[%c0_58, %c0_59] : memref<256x128xbf16, #tpu.memory_space<vmem>>, vector<256x128xbf16>
    %cst_60 = arith.constant dense<0.000000e+00> : vector<8x128xf32>
    %169 = tpu.matmul %167, %168, %cst_60 {dimension_numbers = #tpu.dot_dimension_numbers<[1], [0], [0], [1], [0, 0, 1, 1], [], []>} : vector<8x256xbf16>, vector<256x128xbf16>, vector<8x128xf32> -> vector<8x128xf32>
    %c6 = arith.constant 6 : index
    %c0_61 = arith.constant 0 : index
    %170 = vector.load %arg4[%c6, %c0_61] : memref<21x384xf32, #tpu.memory_space<vmem>>, vector<1x128xf32>
    %171 = vector.broadcast %170 : vector<1x128xf32> to vector<8x128xf32>
    %172 = arith.addf %169, %171 : vector<8x128xf32>
    %173 = arith.addf %147, %172 : vector<8x128xf32>
    %c7 = arith.constant 7 : index
    %c0_62 = arith.constant 0 : index
    %174 = vector.load %arg4[%c7, %c0_62] : memref<21x384xf32, #tpu.memory_space<vmem>>, vector<1x128xf32>
    %c8 = arith.constant 8 : index
    %c0_63 = arith.constant 0 : index
    %175 = vector.load %arg4[%c8, %c0_63] : memref<21x384xf32, #tpu.memory_space<vmem>>, vector<1x128xf32>
    %cst_64 = arith.constant dense<0.000000e+00> : vector<8xf32>
    %176 = vector.multi_reduction <add>, %173, %cst_64 [1] : vector<8x128xf32> to vector<8xf32>
    %177 = vector.shape_cast %176 : vector<8xf32> to vector<8x1xf32>
    %cst_65 = arith.constant 1.280000e+02 : f32
    %178 = vector.broadcast %cst_65 : f32 to vector<8x1xf32>
    %179 = arith.divf %177, %178 : vector<8x1xf32>
    %180 = vector.broadcast %179 : vector<8x1xf32> to vector<8x128xf32>
    %181 = arith.subf %173, %180 : vector<8x128xf32>
    %182 = arith.mulf %181, %181 : vector<8x128xf32>
    %cst_66 = arith.constant dense<0.000000e+00> : vector<8xf32>
    %183 = vector.multi_reduction <add>, %182, %cst_66 [1] : vector<8x128xf32> to vector<8xf32>
    %184 = vector.shape_cast %183 : vector<8xf32> to vector<8x1xf32>
    %cst_67 = arith.constant 1.280000e+02 : f32
    %185 = vector.broadcast %cst_67 : f32 to vector<8x1xf32>
    %186 = arith.divf %184, %185 : vector<8x1xf32>
    %187 = vector.broadcast %179 : vector<8x1xf32> to vector<8x128xf32>
    %188 = arith.subf %173, %187 : vector<8x128xf32>
    %cst_68 = arith.constant 9.99999974E-6 : f32
    %189 = vector.broadcast %cst_68 : f32 to vector<8x1xf32>
    %190 = arith.addf %186, %189 : vector<8x1xf32>
    %191 = math.rsqrt %190 : vector<8x1xf32>
    %192 = vector.broadcast %191 : vector<8x1xf32> to vector<8x128xf32>
    %193 = arith.mulf %188, %192 : vector<8x128xf32>
    %194 = vector.broadcast %174 : vector<1x128xf32> to vector<8x128xf32>
    %195 = arith.mulf %193, %194 : vector<8x128xf32>
    %196 = vector.broadcast %175 : vector<1x128xf32> to vector<8x128xf32>
    %197 = arith.addf %195, %196 : vector<8x128xf32>
    %198 = arith.truncf %197 : vector<8x128xf32> to vector<8x128xbf16>
    %c0_69 = arith.constant 0 : index
    %c0_70 = arith.constant 0 : index
    %199 = vector.load %arg9[%c0_69, %c0_70] : memref<128x384xbf16, #tpu.memory_space<vmem>>, vector<128x384xbf16>
    %cst_71 = arith.constant dense<0.000000e+00> : vector<8x384xf32>
    %200 = tpu.matmul %198, %199, %cst_71 {dimension_numbers = #tpu.dot_dimension_numbers<[1], [0], [0], [1], [0, 0, 1, 1], [], []>} : vector<8x128xbf16>, vector<128x384xbf16>, vector<8x384xf32> -> vector<8x384xf32>
    %c9 = arith.constant 9 : index
    %c0_72 = arith.constant 0 : index
    %201 = vector.load %arg4[%c9, %c0_72] : memref<21x384xf32, #tpu.memory_space<vmem>>, vector<1x384xf32>
    %202 = vector.broadcast %201 : vector<1x384xf32> to vector<8x384xf32>
    %203 = arith.addf %200, %202 : vector<8x384xf32>
    %204 = vector.shape_cast %203 : vector<8x384xf32> to vector<1x8x384xf32>
    %c0_73 = arith.constant 0 : index
    %c0_74 = arith.constant 0 : index
    %205 = vector.load %arg10[%c0_73, %c0_74] : memref<128x128xbf16, #tpu.memory_space<vmem>>, vector<128x128xbf16>
    %206 = vector.extract_strided_slice %204 {offsets = [0, 0, 0], sizes = [1, 8, 32], strides = [1, 1, 1]} : vector<1x8x384xf32> to vector<1x8x32xf32>
    %207 = vector.extract_strided_slice %204 {offsets = [0, 0, 128], sizes = [1, 8, 32], strides = [1, 1, 1]} : vector<1x8x384xf32> to vector<1x8x32xf32>
    %208 = vector.extract_strided_slice %204 {offsets = [0, 0, 256], sizes = [1, 8, 32], strides = [1, 1, 1]} : vector<1x8x384xf32> to vector<1x8x32xf32>
    "tpu.trace_start"() <{level = 10 : i32, message = "bqd,bkd->bqk"}> : () -> ()
    %cst_75 = arith.constant dense<0.000000e+00> : vector<1x8x8xf32>
    %209 = tpu.matmul %206, %207, %cst_75 {dimension_numbers = #tpu.dot_dimension_numbers<[2], [2], [1], [1], [0, 0, 0, 1, 1, 1], [0], [0]>} : vector<1x8x32xf32>, vector<1x8x32xf32>, vector<1x8x8xf32> -> vector<1x8x8xf32>
    "tpu.trace_stop"() : () -> ()
    %cst_76 = arith.constant 0.176776692 : f32
    %210 = vector.broadcast %cst_76 : f32 to vector<1x8x8xf32>
    %211 = arith.mulf %209, %210 : vector<1x8x8xf32>
    %cst_77 = arith.constant -1.000000e+30 : f32
    %212 = vector.broadcast %cst_77 : f32 to vector<1x8x8xf32>
    %213 = arith.select %12, %211, %212 : vector<1x8x8xi1>, vector<1x8x8xf32>
    %cst_78 = arith.constant dense<0xFF800000> : vector<1x8xf32>
    %214 = vector.multi_reduction <maximumf>, %213, %cst_78 [2] : vector<1x8x8xf32> to vector<1x8xf32>
    %cst_79 = arith.constant 0xFF800000 : f32
    %215 = vector.broadcast %cst_79 : f32 to vector<1x8xf32>
    %216 = arith.maximumf %215, %214 : vector<1x8xf32>
    %217 = vector.shape_cast %216 : vector<1x8xf32> to vector<1x8x1xf32>
    %218 = vector.broadcast %217 : vector<1x8x1xf32> to vector<1x8x8xf32>
    %219 = arith.subf %213, %218 : vector<1x8x8xf32>
    %220 = math.exp %219 : vector<1x8x8xf32>
    %cst_80 = arith.constant dense<0.000000e+00> : vector<1x8xf32>
    %221 = vector.multi_reduction <add>, %220, %cst_80 [2] : vector<1x8x8xf32> to vector<1x8xf32>
    %222 = vector.shape_cast %221 : vector<1x8xf32> to vector<1x8x1xf32>
    %223 = vector.broadcast %222 : vector<1x8x1xf32> to vector<1x8x8xf32>
    %224 = arith.divf %220, %223 : vector<1x8x8xf32>
    "tpu.trace_start"() <{level = 10 : i32, message = "bqk,bkd->bqd"}> : () -> ()
    %cst_81 = arith.constant dense<0.000000e+00> : vector<1x8x32xf32>
    %225 = tpu.matmul %224, %208, %cst_81 {dimension_numbers = #tpu.dot_dimension_numbers<[2], [1], [1], [2], [0, 0, 0, 1, 1, 2], [0], [0]>} : vector<1x8x8xf32>, vector<1x8x32xf32>, vector<1x8x32xf32> -> vector<1x8x32xf32>
    "tpu.trace_stop"() : () -> ()
    %226 = vector.shape_cast %225 : vector<1x8x32xf32> to vector<8x32xf32>
    %227 = arith.truncf %226 : vector<8x32xf32> to vector<8x32xbf16>
    %228 = vector.extract_strided_slice %205 {offsets = [0, 0], sizes = [32, 128], strides = [1, 1]} : vector<128x128xbf16> to vector<32x128xbf16>
    %cst_82 = arith.constant dense<0.000000e+00> : vector<8x128xf32>
    %229 = tpu.matmul %227, %228, %cst_82 {dimension_numbers = #tpu.dot_dimension_numbers<[1], [0], [0], [1], [0, 0, 1, 1], [], []>} : vector<8x32xbf16>, vector<32x128xbf16>, vector<8x128xf32> -> vector<8x128xf32>
    %230 = vector.extract_strided_slice %204 {offsets = [0, 0, 32], sizes = [1, 8, 32], strides = [1, 1, 1]} : vector<1x8x384xf32> to vector<1x8x32xf32>
    %231 = vector.extract_strided_slice %204 {offsets = [0, 0, 160], sizes = [1, 8, 32], strides = [1, 1, 1]} : vector<1x8x384xf32> to vector<1x8x32xf32>
    %232 = vector.extract_strided_slice %204 {offsets = [0, 0, 288], sizes = [1, 8, 32], strides = [1, 1, 1]} : vector<1x8x384xf32> to vector<1x8x32xf32>
    "tpu.trace_start"() <{level = 10 : i32, message = "bqd,bkd->bqk"}> : () -> ()
    %cst_83 = arith.constant dense<0.000000e+00> : vector<1x8x8xf32>
    %233 = tpu.matmul %230, %231, %cst_83 {dimension_numbers = #tpu.dot_dimension_numbers<[2], [2], [1], [1], [0, 0, 0, 1, 1, 1], [0], [0]>} : vector<1x8x32xf32>, vector<1x8x32xf32>, vector<1x8x8xf32> -> vector<1x8x8xf32>
    "tpu.trace_stop"() : () -> ()
    %cst_84 = arith.constant 0.176776692 : f32
    %234 = vector.broadcast %cst_84 : f32 to vector<1x8x8xf32>
    %235 = arith.mulf %233, %234 : vector<1x8x8xf32>
    %cst_85 = arith.constant -1.000000e+30 : f32
    %236 = vector.broadcast %cst_85 : f32 to vector<1x8x8xf32>
    %237 = arith.select %12, %235, %236 : vector<1x8x8xi1>, vector<1x8x8xf32>
    %cst_86 = arith.constant dense<0xFF800000> : vector<1x8xf32>
    %238 = vector.multi_reduction <maximumf>, %237, %cst_86 [2] : vector<1x8x8xf32> to vector<1x8xf32>
    %cst_87 = arith.constant 0xFF800000 : f32
    %239 = vector.broadcast %cst_87 : f32 to vector<1x8xf32>
    %240 = arith.maximumf %239, %238 : vector<1x8xf32>
    %241 = vector.shape_cast %240 : vector<1x8xf32> to vector<1x8x1xf32>
    %242 = vector.broadcast %241 : vector<1x8x1xf32> to vector<1x8x8xf32>
    %243 = arith.subf %237, %242 : vector<1x8x8xf32>
    %244 = math.exp %243 : vector<1x8x8xf32>
    %cst_88 = arith.constant dense<0.000000e+00> : vector<1x8xf32>
    %245 = vector.multi_reduction <add>, %244, %cst_88 [2] : vector<1x8x8xf32> to vector<1x8xf32>
    %246 = vector.shape_cast %245 : vector<1x8xf32> to vector<1x8x1xf32>
    %247 = vector.broadcast %246 : vector<1x8x1xf32> to vector<1x8x8xf32>
    %248 = arith.divf %244, %247 : vector<1x8x8xf32>
    "tpu.trace_start"() <{level = 10 : i32, message = "bqk,bkd->bqd"}> : () -> ()
    %cst_89 = arith.constant dense<0.000000e+00> : vector<1x8x32xf32>
    %249 = tpu.matmul %248, %232, %cst_89 {dimension_numbers = #tpu.dot_dimension_numbers<[2], [1], [1], [2], [0, 0, 0, 1, 1, 2], [0], [0]>} : vector<1x8x8xf32>, vector<1x8x32xf32>, vector<1x8x32xf32> -> vector<1x8x32xf32>
    "tpu.trace_stop"() : () -> ()
    %250 = vector.shape_cast %249 : vector<1x8x32xf32> to vector<8x32xf32>
    %251 = arith.truncf %250 : vector<8x32xf32> to vector<8x32xbf16>
    %252 = vector.extract_strided_slice %205 {offsets = [32, 0], sizes = [32, 128], strides = [1, 1]} : vector<128x128xbf16> to vector<32x128xbf16>
    %cst_90 = arith.constant dense<0.000000e+00> : vector<8x128xf32>
    %253 = tpu.matmul %251, %252, %cst_90 {dimension_numbers = #tpu.dot_dimension_numbers<[1], [0], [0], [1], [0, 0, 1, 1], [], []>} : vector<8x32xbf16>, vector<32x128xbf16>, vector<8x128xf32> -> vector<8x128xf32>
    %254 = arith.addf %229, %253 : vector<8x128xf32>
    %255 = vector.extract_strided_slice %204 {offsets = [0, 0, 64], sizes = [1, 8, 32], strides = [1, 1, 1]} : vector<1x8x384xf32> to vector<1x8x32xf32>
    %256 = vector.extract_strided_slice %204 {offsets = [0, 0, 192], sizes = [1, 8, 32], strides = [1, 1, 1]} : vector<1x8x384xf32> to vector<1x8x32xf32>
    %257 = vector.extract_strided_slice %204 {offsets = [0, 0, 320], sizes = [1, 8, 32], strides = [1, 1, 1]} : vector<1x8x384xf32> to vector<1x8x32xf32>
    "tpu.trace_start"() <{level = 10 : i32, message = "bqd,bkd->bqk"}> : () -> ()
    %cst_91 = arith.constant dense<0.000000e+00> : vector<1x8x8xf32>
    %258 = tpu.matmul %255, %256, %cst_91 {dimension_numbers = #tpu.dot_dimension_numbers<[2], [2], [1], [1], [0, 0, 0, 1, 1, 1], [0], [0]>} : vector<1x8x32xf32>, vector<1x8x32xf32>, vector<1x8x8xf32> -> vector<1x8x8xf32>
    "tpu.trace_stop"() : () -> ()
    %cst_92 = arith.constant 0.176776692 : f32
    %259 = vector.broadcast %cst_92 : f32 to vector<1x8x8xf32>
    %260 = arith.mulf %258, %259 : vector<1x8x8xf32>
    %cst_93 = arith.constant -1.000000e+30 : f32
    %261 = vector.broadcast %cst_93 : f32 to vector<1x8x8xf32>
    %262 = arith.select %12, %260, %261 : vector<1x8x8xi1>, vector<1x8x8xf32>
    %cst_94 = arith.constant dense<0xFF800000> : vector<1x8xf32>
    %263 = vector.multi_reduction <maximumf>, %262, %cst_94 [2] : vector<1x8x8xf32> to vector<1x8xf32>
    %cst_95 = arith.constant 0xFF800000 : f32
    %264 = vector.broadcast %cst_95 : f32 to vector<1x8xf32>
    %265 = arith.maximumf %264, %263 : vector<1x8xf32>
    %266 = vector.shape_cast %265 : vector<1x8xf32> to vector<1x8x1xf32>
    %267 = vector.broadcast %266 : vector<1x8x1xf32> to vector<1x8x8xf32>
    %268 = arith.subf %262, %267 : vector<1x8x8xf32>
    %269 = math.exp %268 : vector<1x8x8xf32>
    %cst_96 = arith.constant dense<0.000000e+00> : vector<1x8xf32>
    %270 = vector.multi_reduction <add>, %269, %cst_96 [2] : vector<1x8x8xf32> to vector<1x8xf32>
    %271 = vector.shape_cast %270 : vector<1x8xf32> to vector<1x8x1xf32>
    %272 = vector.broadcast %271 : vector<1x8x1xf32> to vector<1x8x8xf32>
    %273 = arith.divf %269, %272 : vector<1x8x8xf32>
    "tpu.trace_start"() <{level = 10 : i32, message = "bqk,bkd->bqd"}> : () -> ()
    %cst_97 = arith.constant dense<0.000000e+00> : vector<1x8x32xf32>
    %274 = tpu.matmul %273, %257, %cst_97 {dimension_numbers = #tpu.dot_dimension_numbers<[2], [1], [1], [2], [0, 0, 0, 1, 1, 2], [0], [0]>} : vector<1x8x8xf32>, vector<1x8x32xf32>, vector<1x8x32xf32> -> vector<1x8x32xf32>
    "tpu.trace_stop"() : () -> ()
    %275 = vector.shape_cast %274 : vector<1x8x32xf32> to vector<8x32xf32>
    %276 = arith.truncf %275 : vector<8x32xf32> to vector<8x32xbf16>
    %277 = vector.extract_strided_slice %205 {offsets = [64, 0], sizes = [32, 128], strides = [1, 1]} : vector<128x128xbf16> to vector<32x128xbf16>
    %cst_98 = arith.constant dense<0.000000e+00> : vector<8x128xf32>
    %278 = tpu.matmul %276, %277, %cst_98 {dimension_numbers = #tpu.dot_dimension_numbers<[1], [0], [0], [1], [0, 0, 1, 1], [], []>} : vector<8x32xbf16>, vector<32x128xbf16>, vector<8x128xf32> -> vector<8x128xf32>
    %279 = arith.addf %254, %278 : vector<8x128xf32>
    %280 = vector.extract_strided_slice %204 {offsets = [0, 0, 96], sizes = [1, 8, 32], strides = [1, 1, 1]} : vector<1x8x384xf32> to vector<1x8x32xf32>
    %281 = vector.extract_strided_slice %204 {offsets = [0, 0, 224], sizes = [1, 8, 32], strides = [1, 1, 1]} : vector<1x8x384xf32> to vector<1x8x32xf32>
    %282 = vector.extract_strided_slice %204 {offsets = [0, 0, 352], sizes = [1, 8, 32], strides = [1, 1, 1]} : vector<1x8x384xf32> to vector<1x8x32xf32>
    "tpu.trace_start"() <{level = 10 : i32, message = "bqd,bkd->bqk"}> : () -> ()
    %cst_99 = arith.constant dense<0.000000e+00> : vector<1x8x8xf32>
    %283 = tpu.matmul %280, %281, %cst_99 {dimension_numbers = #tpu.dot_dimension_numbers<[2], [2], [1], [1], [0, 0, 0, 1, 1, 1], [0], [0]>} : vector<1x8x32xf32>, vector<1x8x32xf32>, vector<1x8x8xf32> -> vector<1x8x8xf32>
    "tpu.trace_stop"() : () -> ()
    %cst_100 = arith.constant 0.176776692 : f32
    %284 = vector.broadcast %cst_100 : f32 to vector<1x8x8xf32>
    %285 = arith.mulf %283, %284 : vector<1x8x8xf32>
    %cst_101 = arith.constant -1.000000e+30 : f32
    %286 = vector.broadcast %cst_101 : f32 to vector<1x8x8xf32>
    %287 = arith.select %12, %285, %286 : vector<1x8x8xi1>, vector<1x8x8xf32>
    %cst_102 = arith.constant dense<0xFF800000> : vector<1x8xf32>
    %288 = vector.multi_reduction <maximumf>, %287, %cst_102 [2] : vector<1x8x8xf32> to vector<1x8xf32>
    %cst_103 = arith.constant 0xFF800000 : f32
    %289 = vector.broadcast %cst_103 : f32 to vector<1x8xf32>
    %290 = arith.maximumf %289, %288 : vector<1x8xf32>
    %291 = vector.shape_cast %290 : vector<1x8xf32> to vector<1x8x1xf32>
    %292 = vector.broadcast %291 : vector<1x8x1xf32> to vector<1x8x8xf32>
    %293 = arith.subf %287, %292 : vector<1x8x8xf32>
    %294 = math.exp %293 : vector<1x8x8xf32>
    %cst_104 = arith.constant dense<0.000000e+00> : vector<1x8xf32>
    %295 = vector.multi_reduction <add>, %294, %cst_104 [2] : vector<1x8x8xf32> to vector<1x8xf32>
    %296 = vector.shape_cast %295 : vector<1x8xf32> to vector<1x8x1xf32>
    %297 = vector.broadcast %296 : vector<1x8x1xf32> to vector<1x8x8xf32>
    %298 = arith.divf %294, %297 : vector<1x8x8xf32>
    "tpu.trace_start"() <{level = 10 : i32, message = "bqk,bkd->bqd"}> : () -> ()
    %cst_105 = arith.constant dense<0.000000e+00> : vector<1x8x32xf32>
    %299 = tpu.matmul %298, %282, %cst_105 {dimension_numbers = #tpu.dot_dimension_numbers<[2], [1], [1], [2], [0, 0, 0, 1, 1, 2], [0], [0]>} : vector<1x8x8xf32>, vector<1x8x32xf32>, vector<1x8x32xf32> -> vector<1x8x32xf32>
    "tpu.trace_stop"() : () -> ()
    %300 = vector.shape_cast %299 : vector<1x8x32xf32> to vector<8x32xf32>
    %301 = arith.truncf %300 : vector<8x32xf32> to vector<8x32xbf16>
    %302 = vector.extract_strided_slice %205 {offsets = [96, 0], sizes = [32, 128], strides = [1, 1]} : vector<128x128xbf16> to vector<32x128xbf16>
    %cst_106 = arith.constant dense<0.000000e+00> : vector<8x128xf32>
    %303 = tpu.matmul %301, %302, %cst_106 {dimension_numbers = #tpu.dot_dimension_numbers<[1], [0], [0], [1], [0, 0, 1, 1], [], []>} : vector<8x32xbf16>, vector<32x128xbf16>, vector<8x128xf32> -> vector<8x128xf32>
    %304 = arith.addf %279, %303 : vector<8x128xf32>
    %c10 = arith.constant 10 : index
    %c0_107 = arith.constant 0 : index
    %305 = vector.load %arg4[%c10, %c0_107] : memref<21x384xf32, #tpu.memory_space<vmem>>, vector<1x128xf32>
    %306 = vector.broadcast %305 : vector<1x128xf32> to vector<8x128xf32>
    %307 = arith.addf %304, %306 : vector<8x128xf32>
    %308 = arith.addf %197, %307 : vector<8x128xf32>
    %c11 = arith.constant 11 : index
    %c0_108 = arith.constant 0 : index
    %309 = vector.load %arg4[%c11, %c0_108] : memref<21x384xf32, #tpu.memory_space<vmem>>, vector<1x128xf32>
    %c12 = arith.constant 12 : index
    %c0_109 = arith.constant 0 : index
    %310 = vector.load %arg4[%c12, %c0_109] : memref<21x384xf32, #tpu.memory_space<vmem>>, vector<1x128xf32>
    %cst_110 = arith.constant dense<0.000000e+00> : vector<8xf32>
    %311 = vector.multi_reduction <add>, %308, %cst_110 [1] : vector<8x128xf32> to vector<8xf32>
    %312 = vector.shape_cast %311 : vector<8xf32> to vector<8x1xf32>
    %cst_111 = arith.constant 1.280000e+02 : f32
    %313 = vector.broadcast %cst_111 : f32 to vector<8x1xf32>
    %314 = arith.divf %312, %313 : vector<8x1xf32>
    %315 = vector.broadcast %314 : vector<8x1xf32> to vector<8x128xf32>
    %316 = arith.subf %308, %315 : vector<8x128xf32>
    %317 = arith.mulf %316, %316 : vector<8x128xf32>
    %cst_112 = arith.constant dense<0.000000e+00> : vector<8xf32>
    %318 = vector.multi_reduction <add>, %317, %cst_112 [1] : vector<8x128xf32> to vector<8xf32>
    %319 = vector.shape_cast %318 : vector<8xf32> to vector<8x1xf32>
    %cst_113 = arith.constant 1.280000e+02 : f32
    %320 = vector.broadcast %cst_113 : f32 to vector<8x1xf32>
    %321 = arith.divf %319, %320 : vector<8x1xf32>
    %322 = vector.broadcast %314 : vector<8x1xf32> to vector<8x128xf32>
    %323 = arith.subf %308, %322 : vector<8x128xf32>
    %cst_114 = arith.constant 9.99999974E-6 : f32
    %324 = vector.broadcast %cst_114 : f32 to vector<8x1xf32>
    %325 = arith.addf %321, %324 : vector<8x1xf32>
    %326 = math.rsqrt %325 : vector<8x1xf32>
    %327 = vector.broadcast %326 : vector<8x1xf32> to vector<8x128xf32>
    %328 = arith.mulf %323, %327 : vector<8x128xf32>
    %329 = vector.broadcast %309 : vector<1x128xf32> to vector<8x128xf32>
    %330 = arith.mulf %328, %329 : vector<8x128xf32>
    %331 = vector.broadcast %310 : vector<1x128xf32> to vector<8x128xf32>
    %332 = arith.addf %330, %331 : vector<8x128xf32>
    %333 = arith.truncf %332 : vector<8x128xf32> to vector<8x128xbf16>
    %c0_115 = arith.constant 0 : index
    %c0_116 = arith.constant 0 : index
    %334 = vector.load %arg11[%c0_115, %c0_116] : memref<128x256xbf16, #tpu.memory_space<vmem>>, vector<128x256xbf16>
    %cst_117 = arith.constant dense<0.000000e+00> : vector<8x256xf32>
    %335 = tpu.matmul %333, %334, %cst_117 {dimension_numbers = #tpu.dot_dimension_numbers<[1], [0], [0], [1], [0, 0, 1, 1], [], []>} : vector<8x128xbf16>, vector<128x256xbf16>, vector<8x256xf32> -> vector<8x256xf32>
    %c13 = arith.constant 13 : index
    %c0_118 = arith.constant 0 : index
    %336 = vector.load %arg4[%c13, %c0_118] : memref<21x384xf32, #tpu.memory_space<vmem>>, vector<1x256xf32>
    %337 = vector.broadcast %336 : vector<1x256xf32> to vector<8x256xf32>
    %338 = arith.addf %335, %337 : vector<8x256xf32>
    %cst_119 = arith.constant 5.000000e-01 : f32
    %339 = vector.broadcast %cst_119 : f32 to vector<8x256xf32>
    %340 = arith.mulf %339, %338 : vector<8x256xf32>
    %cst_120 = arith.constant 4.471500e-02 : f32
    %341 = vector.broadcast %cst_120 : f32 to vector<8x256xf32>
    %342 = arith.mulf %341, %338 : vector<8x256xf32>
    %343 = arith.mulf %342, %338 : vector<8x256xf32>
    %344 = arith.mulf %343, %338 : vector<8x256xf32>
    %345 = arith.addf %338, %344 : vector<8x256xf32>
    %cst_121 = arith.constant 0.797884583 : f32
    %346 = vector.broadcast %cst_121 : f32 to vector<8x256xf32>
    %347 = arith.mulf %346, %345 : vector<8x256xf32>
    %348 = math.tanh %347 : vector<8x256xf32>
    %cst_122 = arith.constant 1.000000e+00 : f32
    %349 = vector.broadcast %cst_122 : f32 to vector<8x256xf32>
    %350 = arith.addf %349, %348 : vector<8x256xf32>
    %351 = arith.mulf %340, %350 : vector<8x256xf32>
    %352 = arith.truncf %351 : vector<8x256xf32> to vector<8x256xbf16>
    %c0_123 = arith.constant 0 : index
    %c0_124 = arith.constant 0 : index
    %353 = vector.load %arg12[%c0_123, %c0_124] : memref<256x128xbf16, #tpu.memory_space<vmem>>, vector<256x128xbf16>
    %cst_125 = arith.constant dense<0.000000e+00> : vector<8x128xf32>
    %354 = tpu.matmul %352, %353, %cst_125 {dimension_numbers = #tpu.dot_dimension_numbers<[1], [0], [0], [1], [0, 0, 1, 1], [], []>} : vector<8x256xbf16>, vector<256x128xbf16>, vector<8x128xf32> -> vector<8x128xf32>
    %c14 = arith.constant 14 : index
    %c0_126 = arith.constant 0 : index
    %355 = vector.load %arg4[%c14, %c0_126] : memref<21x384xf32, #tpu.memory_space<vmem>>, vector<1x128xf32>
    %356 = vector.broadcast %355 : vector<1x128xf32> to vector<8x128xf32>
    %357 = arith.addf %354, %356 : vector<8x128xf32>
    %358 = arith.addf %332, %357 : vector<8x128xf32>
    %c15 = arith.constant 15 : index
    %c0_127 = arith.constant 0 : index
    %359 = vector.load %arg4[%c15, %c0_127] : memref<21x384xf32, #tpu.memory_space<vmem>>, vector<1x128xf32>
    %c16 = arith.constant 16 : index
    %c0_128 = arith.constant 0 : index
    %360 = vector.load %arg4[%c16, %c0_128] : memref<21x384xf32, #tpu.memory_space<vmem>>, vector<1x128xf32>
    %cst_129 = arith.constant dense<0.000000e+00> : vector<8xf32>
    %361 = vector.multi_reduction <add>, %358, %cst_129 [1] : vector<8x128xf32> to vector<8xf32>
    %362 = vector.shape_cast %361 : vector<8xf32> to vector<8x1xf32>
    %cst_130 = arith.constant 1.280000e+02 : f32
    %363 = vector.broadcast %cst_130 : f32 to vector<8x1xf32>
    %364 = arith.divf %362, %363 : vector<8x1xf32>
    %365 = vector.broadcast %364 : vector<8x1xf32> to vector<8x128xf32>
    %366 = arith.subf %358, %365 : vector<8x128xf32>
    %367 = arith.mulf %366, %366 : vector<8x128xf32>
    %cst_131 = arith.constant dense<0.000000e+00> : vector<8xf32>
    %368 = vector.multi_reduction <add>, %367, %cst_131 [1] : vector<8x128xf32> to vector<8xf32>
    %369 = vector.shape_cast %368 : vector<8xf32> to vector<8x1xf32>
    %cst_132 = arith.constant 1.280000e+02 : f32
    %370 = vector.broadcast %cst_132 : f32 to vector<8x1xf32>
    %371 = arith.divf %369, %370 : vector<8x1xf32>
    %372 = vector.broadcast %364 : vector<8x1xf32> to vector<8x128xf32>
    %373 = arith.subf %358, %372 : vector<8x128xf32>
    %cst_133 = arith.constant 9.99999974E-6 : f32
    %374 = vector.broadcast %cst_133 : f32 to vector<8x1xf32>
    %375 = arith.addf %371, %374 : vector<8x1xf32>
    %376 = math.rsqrt %375 : vector<8x1xf32>
    %377 = vector.broadcast %376 : vector<8x1xf32> to vector<8x128xf32>
    %378 = arith.mulf %373, %377 : vector<8x128xf32>
    %379 = vector.broadcast %359 : vector<1x128xf32> to vector<8x128xf32>
    %380 = arith.mulf %378, %379 : vector<8x128xf32>
    %381 = vector.broadcast %360 : vector<1x128xf32> to vector<8x128xf32>
    %382 = arith.addf %380, %381 : vector<8x128xf32>
    %c17 = arith.constant 17 : index
    %c0_134 = arith.constant 0 : index
    %383 = vector.load %arg4[%c17, %c0_134] : memref<21x384xf32, #tpu.memory_space<vmem>>, vector<1x128xf32>
    %c18 = arith.constant 18 : index
    %c0_135 = arith.constant 0 : index
    %384 = vector.load %arg4[%c18, %c0_135] : memref<21x384xf32, #tpu.memory_space<vmem>>, vector<1x128xf32>
    %cst_136 = arith.constant dense<0.000000e+00> : vector<8xf32>
    %385 = vector.multi_reduction <add>, %382, %cst_136 [1] : vector<8x128xf32> to vector<8xf32>
    %386 = vector.shape_cast %385 : vector<8xf32> to vector<8x1xf32>
    %cst_137 = arith.constant 1.280000e+02 : f32
    %387 = vector.broadcast %cst_137 : f32 to vector<8x1xf32>
    %388 = arith.divf %386, %387 : vector<8x1xf32>
    %389 = vector.broadcast %388 : vector<8x1xf32> to vector<8x128xf32>
    %390 = arith.subf %382, %389 : vector<8x128xf32>
    %391 = arith.mulf %390, %390 : vector<8x128xf32>
    %cst_138 = arith.constant dense<0.000000e+00> : vector<8xf32>
    %392 = vector.multi_reduction <add>, %391, %cst_138 [1] : vector<8x128xf32> to vector<8xf32>
    %393 = vector.shape_cast %392 : vector<8xf32> to vector<8x1xf32>
    %cst_139 = arith.constant 1.280000e+02 : f32
    %394 = vector.broadcast %cst_139 : f32 to vector<8x1xf32>
    %395 = arith.divf %393, %394 : vector<8x1xf32>
    %396 = vector.broadcast %388 : vector<8x1xf32> to vector<8x128xf32>
    %397 = arith.subf %382, %396 : vector<8x128xf32>
    %cst_140 = arith.constant 9.99999974E-6 : f32
    %398 = vector.broadcast %cst_140 : f32 to vector<8x1xf32>
    %399 = arith.addf %395, %398 : vector<8x1xf32>
    %400 = math.rsqrt %399 : vector<8x1xf32>
    %401 = vector.broadcast %400 : vector<8x1xf32> to vector<8x128xf32>
    %402 = arith.mulf %397, %401 : vector<8x128xf32>
    %403 = vector.broadcast %383 : vector<1x128xf32> to vector<8x128xf32>
    %404 = arith.mulf %402, %403 : vector<8x128xf32>
    %405 = vector.broadcast %384 : vector<1x128xf32> to vector<8x128xf32>
    %406 = arith.addf %404, %405 : vector<8x128xf32>
    %407 = arith.truncf %406 : vector<8x128xf32> to vector<8x128xbf16>
    %c0_141 = arith.constant 0 : index
    %c0_142 = arith.constant 0 : index
    %408 = vector.load %arg13[%c0_141, %c0_142] : memref<128x384xbf16, #tpu.memory_space<vmem>>, vector<128x384xbf16>
    %cst_143 = arith.constant dense<0.000000e+00> : vector<8x384xf32>
    %409 = tpu.matmul %407, %408, %cst_143 {dimension_numbers = #tpu.dot_dimension_numbers<[1], [0], [0], [1], [0, 0, 1, 1], [], []>} : vector<8x128xbf16>, vector<128x384xbf16>, vector<8x384xf32> -> vector<8x384xf32>
    %410 = vector.extract_strided_slice %409 {offsets = [0, 0], sizes = [8, 128], strides = [1, 1]} : vector<8x384xf32> to vector<8x128xf32>
    %c0_144 = arith.constant 0 : index
    %c0_145 = arith.constant 0 : index
    %411 = vector.load %arg2[%c0_144, %c0_145] : memref<8x128xf32, #tpu.memory_space<vmem>>, vector<8x128xf32>
    %412 = arith.addf %410, %411 : vector<8x128xf32>
    %c19 = arith.constant 19 : index
    %c0_146 = arith.constant 0 : index
    %413 = vector.load %arg4[%c19, %c0_146] : memref<21x384xf32, #tpu.memory_space<vmem>>, vector<1x128xf32>
    %414 = vector.broadcast %413 : vector<1x128xf32> to vector<8x128xf32>
    %415 = arith.addf %412, %414 : vector<8x128xf32>
    %416 = vector.extract_strided_slice %409 {offsets = [0, 128], sizes = [8, 256], strides = [1, 1]} : vector<8x384xf32> to vector<8x256xf32>
    %417 = arith.truncf %415 : vector<8x128xf32> to vector<8x128xbf16>
    %c0_147 = arith.constant 0 : index
    %c0_148 = arith.constant 0 : index
    %418 = vector.load %arg14[%c0_147, %c0_148] : memref<128x256xbf16, #tpu.memory_space<vmem>>, vector<128x256xbf16>
    %cst_149 = arith.constant dense<0.000000e+00> : vector<8x256xf32>
    %419 = tpu.matmul %417, %418, %cst_149 {dimension_numbers = #tpu.dot_dimension_numbers<[1], [0], [0], [1], [0, 0, 1, 1], [], []>} : vector<8x128xbf16>, vector<128x256xbf16>, vector<8x256xf32> -> vector<8x256xf32>
    %420 = arith.addf %416, %419 : vector<8x256xf32>
    %c20 = arith.constant 20 : index
    %c0_150 = arith.constant 0 : index
    %421 = vector.load %arg4[%c20, %c0_150] : memref<21x384xf32, #tpu.memory_space<vmem>>, vector<1x256xf32>
    %422 = vector.broadcast %421 : vector<1x256xf32> to vector<8x256xf32>
    %423 = arith.addf %420, %422 : vector<8x256xf32>
    %c0_151 = arith.constant 0 : index
    %c0_152 = arith.constant 0 : index
    %424 = vector.load %arg15[%c0_151, %c0_152] : memref<8x256xf32, #tpu.memory_space<vmem>>, vector<8x256xf32>
    tpu.vector_store %arg15[%c0_151, %c0_152], %423 {strides = array<i32>} : memref<8x256xf32, #tpu.memory_space<vmem>>, vector<8x256xf32>,
    return
  }
  func.func @transform_0(%arg0: i32) -> (i32, i32) {
    %c0_i32 = arith.constant 0 : i32
    %c0_i32_0 = arith.constant 0 : i32
    return %arg0, %c0_i32 : i32, i32
  }
  func.func @transform_1(%arg0: i32) -> (i32, i32) {
    %c0_i32 = arith.constant 0 : i32
    %c0_i32_0 = arith.constant 0 : i32
    return %arg0, %c0_i32 : i32, i32
  }
  func.func @transform_2(%arg0: i32) -> (i32, i32) {
    %c0_i32 = arith.constant 0 : i32
    %c0_i32_0 = arith.constant 0 : i32
    %c0_i32_1 = arith.constant 0 : i32
    return %c0_i32, %c0_i32_0 : i32, i32
  }
  func.func @transform_3(%arg0: i32) -> (i32, i32) {
    %c0_i32 = arith.constant 0 : i32
    %c0_i32_0 = arith.constant 0 : i32
    %c0_i32_1 = arith.constant 0 : i32
    return %c0_i32, %c0_i32_0 : i32, i32
  }
  func.func @transform_4(%arg0: i32) -> (i32, i32) {
    %c0_i32 = arith.constant 0 : i32
    %c0_i32_0 = arith.constant 0 : i32
    %c0_i32_1 = arith.constant 0 : i32
    return %c0_i32, %c0_i32_0 : i32, i32
  }
  func.func @transform_5(%arg0: i32) -> (i32, i32) {
    %c0_i32 = arith.constant 0 : i32
    %c0_i32_0 = arith.constant 0 : i32
    %c0_i32_1 = arith.constant 0 : i32
    return %c0_i32, %c0_i32_0 : i32, i32
  }
  func.func @transform_6(%arg0: i32) -> (i32, i32) {
    %c0_i32 = arith.constant 0 : i32
    %c0_i32_0 = arith.constant 0 : i32
    %c0_i32_1 = arith.constant 0 : i32
    return %c0_i32, %c0_i32_0 : i32, i32
  }
  func.func @transform_7(%arg0: i32) -> (i32, i32) {
    %c0_i32 = arith.constant 0 : i32
    %c0_i32_0 = arith.constant 0 : i32
    %c0_i32_1 = arith.constant 0 : i32
    return %c0_i32, %c0_i32_0 : i32, i32
  }
  func.func @transform_8(%arg0: i32) -> (i32, i32) {
    %c0_i32 = arith.constant 0 : i32
    %c0_i32_0 = arith.constant 0 : i32
    %c0_i32_1 = arith.constant 0 : i32
    return %c0_i32, %c0_i32_0 : i32, i32
  }
  func.func @transform_9(%arg0: i32) -> (i32, i32) {
    %c0_i32 = arith.constant 0 : i32
    %c0_i32_0 = arith.constant 0 : i32
    %c0_i32_1 = arith.constant 0 : i32
    return %c0_i32, %c0_i32_0 : i32, i32
  }
  func.func @transform_10(%arg0: i32) -> (i32, i32) {
    %c0_i32 = arith.constant 0 : i32
    %c0_i32_0 = arith.constant 0 : i32
    %c0_i32_1 = arith.constant 0 : i32
    return %c0_i32, %c0_i32_0 : i32, i32
  }
  func.func @transform_11(%arg0: i32) -> (i32, i32) {
    %c0_i32 = arith.constant 0 : i32
    %c0_i32_0 = arith.constant 0 : i32
    %c0_i32_1 = arith.constant 0 : i32
    return %c0_i32, %c0_i32_0 : i32, i32
  }
  func.func @transform_12(%arg0: i32) -> (i32, i32) {
    %c0_i32 = arith.constant 0 : i32
    %c0_i32_0 = arith.constant 0 : i32
    %c0_i32_1 = arith.constant 0 : i32
    return %c0_i32, %c0_i32_0 : i32, i32
  }
  func.func @transform_13(%arg0: i32) -> (i32, i32) {
    %c0_i32 = arith.constant 0 : i32
    %c0_i32_0 = arith.constant 0 : i32
    %c0_i32_1 = arith.constant 0 : i32
    return %c0_i32, %c0_i32_0 : i32, i32
  }
  func.func @transform_14(%arg0: i32) -> (i32, i32) {
    %c0_i32 = arith.constant 0 : i32
    %c0_i32_0 = arith.constant 0 : i32
    return %arg0, %c0_i32 : i32, i32
  }
}

</mosaic_0001>

<bundles_post_ra>
// kernel: forward_training.1
= control target key start
LH: loop header
LB: loop body
LE: loop exit
PB: predicated region body
PF: predicated region fallthrough
CT: control target
= control target key end

     0   :  { %s4005_s29 = smov 0   ;;  %s5139_s0 = inlined_call_operand.vmem [shape: f32[16,128], index: 0, kind: input, shape index: {}]   ;;  %s5140_s1 = inlined_call_operand.vmem [shape: f32[16,128], index: 1, kind: input, shape index: {}]   ;;  %s5141_s2 = inlined_call_operand.vmem [shape: f32[8,128], index: 2, kind: input, shape index: {}]   ;;  %s5142_s3 = inlined_call_operand.vmem [shape: f32[21,384], index: 3, kind: input, shape index: {}]   ;;  %s5143_s4 = inlined_call_operand.vmem [shape: bf16[128,384], index: 4, kind: input, shape index: {}]   ;;  %s5144_s5 = inlined_call_operand.vmem [shape: bf16[128,128], index: 5, kind: input, shape index: {}]   ;;  %s5145_s6 = inlined_call_operand.vmem [shape: bf16[128,256], index: 6, kind: input, shape index: {}]   ;;  %s5146_s7 = inlined_call_operand.vmem [shape: bf16[256,128], index: 7, kind: input, shape index: {}]   ;;  %s5147_s8 = inlined_call_operand.vmem [shape: bf16[128,384], index: 8, kind: input, shape index: {}]   ;;  %s5148_s9 = inlined_call_operand.vmem [shape: bf16[128,128], index: 9, kind: input, shape index: {}]   ;;  %s5149_s10 = inlined_call_operand.vmem [shape: bf16[128,256], index: 10, kind: input, shape index: {}]   ;;  %s5150_s11 = inlined_call_operand.vmem [shape: bf16[256,128], index: 11, kind: input, shape index: {}]   ;;  %s5151_s12 = inlined_call_operand.vmem [shape: bf16[128,384], index: 12, kind: input, shape index: {}]   ;;  %s5152_s13 = inlined_call_operand.vmem [shape: bf16[128,256], index: 13, kind: input, shape index: {}]   ;;  %s5153_s14 = inlined_call_operand.vmem [shape: f32[16,256], index: 14, kind: output, shape index: {}]  }
   0x1 LB: > { %s2965_s30 = sadd.s32 4294967295, %s3924_s29   ;;  %p2969_p0 = scmp.ge.s32.totalorder %s3924_s29, 1  ;;  %s3924_s29 = sphi %s4005_s29, %s24_s29  }
   0x2   : > { %p420_p1 = scmp.lt.s32.totalorder %s3924_s29, 3 }
   0x4   : > { %p421_p2 = pnand %p2969_p0, %p420_p1 }
   0x5   : > { %p469_p3 = scmp.lt.s32.totalorder (!%p421_p2), %s2965_s30, 1  ;;  %s3926_s27 = smov (!%p421_p2), 64  }
   0x6   : > { %424 = sbr.rel (%p421_p2) target bundleno = 5215 (0x145f), region = 76  ;;  %s3927_s28 = smov (!%p421_p2), 96  }
   0x7   : > { %s3928_s15 = smov (!%p421_p2), 32  }
   0xb   : > { %v3061_v0 = vld [vmem:[%s5143_s4 + $0xa8] sm:$0xf]  ;;  %v3708_v1 = vld [vmem:[%s5143_s4 + $0xb0] sm:$0xf0]  ;;  %v3707_v2 = vld [vmem:[%s5143_s4 + $0xac] sm:$0xf] }
   0xc   : > { %v3062_v3 = vor.u32 %v3708_v1, %v3061_v0  ;;  %v3063_v4 = vld [vmem:[%s5143_s4 + $0xb4] sm:$0xf0]  ;;  %v3049_v5 = vld [vmem:[%s5143_s4 + $0x90] sm:$0xf]  ;;  %v3705_v6 = vld [vmem:[%s5143_s4 + $0x98] sm:$0xf0] }
   0xd   : > { %v3066_v7 = vor.u32 %v3707_v2, %v3063_v4  ;;  %v3704_v8 = vld [vmem:[%s5143_s4 + $0x94] sm:$0xf]  ;;  %v3051_v9 = vld [vmem:[%s5143_s4 + $0x9c] sm:$0xf0]  ;;  %v3050_v10 = vor.u32 %v3705_v6, %v3049_v5  ;;  %v3037_v12 = vld [vmem:[%s5143_s4 + $0x78] sm:$0xf] }
   0xe   : > { %663 = vmatpush.bf16.msra.mxu0 %v3062_v3  ;;  %v3054_v11 = vor.u32 %v3704_v8, %v3051_v9  ;;  %v3702_v13 = vld [vmem:[%s5143_s4 + $0x80] sm:$0xf0]  ;;  %v3701_v14 = vld [vmem:[%s5143_s4 + $0x7c] sm:$0xf]  ;;  %v3039_v15 = vld [vmem:[%s5143_s4 + $0x84] sm:$0xf0] }
   0xf   : > { %676 = vmatpush.bf16.msra.mxu1 %v3066_v7  ;;  %v3038_v16 = vor.u32 %v3702_v13, %v3037_v12  ;;  %v3042_v17 = vor.u32 %v3701_v14, %v3039_v15  ;;  %v3025_v18 = vld [vmem:[%s5143_s4 + $0x60] sm:$0xf]  ;;  %v3699_v19 = vld [vmem:[%s5143_s4 + $0x68] sm:$0xf0]  ;;  %v3698_v20 = vld [vmem:[%s5143_s4 + $0x64] sm:$0xf] }
  0x10   : > { %v3027_v21 = vld [vmem:[%s5143_s4 + $0x6c] sm:$0xf0]  ;;  %v3013_v22 = vld [vmem:[%s5143_s4 + $0x48] sm:$0xf]  ;;  %v3026_v23 = vor.u32 %v3699_v19, %v3025_v18  ;;  %v3696_v24 = vld [vmem:[%s5143_s4 + $0x50] sm:$0xf0] }
  0x11   : > { %v3069_v25 = vld [vmem:[%s5143_s4 + $0xb0] sm:$0xf]  ;;  %v3709_v26 = vld [vmem:[%s5143_s4 + $0xb8] sm:$0xf0]  ;;  %v3030_v27 = vor.u32 %v3698_v20, %v3027_v21  ;;  %s5159_s30 = smov (!%p469_p3, %s2965_s30), 1  ;;  %v3014_v34 = vor.u32 %v3696_v24, %v3013_v22  ;;  %v486_v56 = vld [vmem:[%s5141_s2] sm:$0xff] }
  0x12   : > { %664 = vmatpush.bf16.msra.mxu0 %v3050_v10  ;;  %v3070_v28 = vor.u32 %v3709_v26, %v3069_v25  ;;  %v3057_v29 = vld [vmem:[%s5143_s4 + $0x98] sm:$0xf]  ;;  %v3706_v30 = vld [vmem:[%s5143_s4 + $0xa0] sm:$0xf0]  ;;  %v3695_v31 = vld [vmem:[%s5143_s4 + $0x4c] sm:$0xf] }
  0x13   : > { %677 = vmatpush.bf16.msra.mxu1 %v3054_v11  ;;  %v3015_v32 = vld [vmem:[%s5143_s4 + $0x54] sm:$0xf0]  ;;  %s5154_s21 = sshll.u32 %s5159_s30, 3  ;;  %v3058_v33 = vor.u32 %v3706_v30, %v3057_v29  ;;  %v3045_v35 = vld [vmem:[%s5143_s4 + $0x80] sm:$0xf]  ;;  %vm718_vm0 = vcmask 261120   ;;  %v488_v30 = vlaneseq }
  0x14   : > { %689 = vmatpush.bf16.msra.mxu2 %v3070_v28  ;;  %v3703_v36 = vld [vmem:[%s5143_s4 + $0x88] sm:$0xf0]  ;;  %v3018_v37 = vor.u32 %v3695_v31, %v3015_v32  ;;  %v3001_v38 = vld [vmem:[%s5143_s4 + $0x30] sm:$0xf]  ;;  %v3693_v39 = vld [vmem:[%s5143_s4 + $0x38] sm:$0xf0]  ;;  %s472_s18 = scalar_lea.vmem %s5139_s0, %s5154_s21 }
  0x15   : > { %v3692_v40 = vld [vmem:[%s5143_s4 + $0x34] sm:$0xf]  ;;  %v3003_v41 = vld [vmem:[%s5143_s4 + $0x3c] sm:$0xf0]  ;;  %v3046_v43 = vor.u32 %v3703_v36, %v3045_v35  ;;  %v3002_v44 = vor.u32 %v3693_v39, %v3001_v38  ;;  %v3033_v46 = vld [vmem:[%s5143_s4 + $0x68] sm:$0xf] }
  0x16   : > { %665 = vmatpush.bf16.msra.mxu0 %v3038_v16  ;;  %v484_v42 = vld [vmem:[%s5142_s3] ss:$0 sm:$0xff]  ;;  %v3700_v47 = vld [vmem:[%s5143_s4 + $0x70] sm:$0xf0]  ;;  %v3006_v48 = vor.u32 %v3692_v40, %v3003_v41  ;;  %v2989_v49 = vld [vmem:[%s5143_s4 + $0x18] sm:$0xf] }
  0x17   : > { %678 = vmatpush.bf16.msra.mxu1 %v3042_v17  ;;  %v483_v45 = vld [vmem:[%s472_s18] sm:$0xff]  ;;  %v3689_v51 = vld [vmem:[%s5143_s4 + $0x1c] sm:$0xf]  ;;  %v2991_v52 = vld [vmem:[%s5143_s4 + $0x24] sm:$0xf0]  ;;  %v3034_v54 = vor.u32 %v3700_v47, %v3033_v46  ;;  %v489_v31 = vshrl.u32 %v488_v30, 7 }
  0x18   : > { %690 = vmatpush.bf16.msra.mxu2 %v3058_v33  ;;  %v3690_v50 = vld [vmem:[%s5143_s4 + $0x20] sm:$0xf0]  ;;  %v485_v53 = vadd.f32 %v484_v42, %v483_v45  ;;  %v3021_v57 = vld [vmem:[%s5143_s4 + $0x50] sm:$0xf]  ;;  %v3697_v58 = vld [vmem:[%s5143_s4 + $0x58] sm:$0xf0]  ;;  %v2994_v59 = vor.u32 %v3689_v51, %v2991_v52 }
  0x19   : > { %v2990_v55 = vor.u32 %v3690_v50, %v2989_v49  ;;  %v2977_v60 = vld [vmem:[%s5143_s4] sm:$0xf]  ;;  %v3687_v61 = vld [vmem:[%s5143_s4 + $0x8] sm:$0xf0]  ;;  %v3686_v62 = vld [vmem:[%s5143_s4 + $0x4] sm:$0xf]  ;;  %v3022_v1 = vor.u32 %v3697_v58, %v3021_v57 }
  0x1a   : > { %666 = vmatpush.bf16.msra.mxu0 %v3026_v23  ;;  %v2979_v63 = vld [vmem:[%s5143_s4 + $0xc] sm:$0xf0]  ;;  %v4157_v0 = vadd.f32 %v486_v56, %v485_v53  ;;  %v2978_v2 = vor.u32 %v3687_v61, %v2977_v60  ;;  %v3009_v3 = vld [vmem:[%s5143_s4 + $0x38] sm:$0xf]  ;;  %v3694_v4 = vld [vmem:[%s5143_s4 + $0x40] sm:$0xf0] }
  0x1b   : > { %679 = vmatpush.bf16.msra.mxu1 %v3030_v27  ;;  %v2982_v5 = vor.u32 %v3686_v62, %v2979_v63  ;;  %v3010_v7 = vor.u32 %v3694_v4, %v3009_v3  ;;  %v2997_v8 = vld [vmem:[%s5143_s4 + $0x20] sm:$0xf]  ;;  %v3691_v9 = vld [vmem:[%s5143_s4 + $0x28] sm:$0xf0]  ;;  %v2985_v11 = vld [vmem:[%s5143_s4 + $0x8] sm:$0xf] }
  0x1c   : > { %691 = vmatpush.bf16.msra.mxu2 %v3046_v43  ;;  %v493_v6 = vpack.c.bf16 %v4157_v0, %v4157_v0  ;;  %v2998_v10 = vor.u32 %v3691_v9, %v2997_v8  ;;  %v3688_v12 = vld [vmem:[%s5143_s4 + $0x10] sm:$0xf0]  ;;  %v2974_v14 = vld [vmem:[%s5142_s3 + $0x1] ss:$8 sm:$0x7]  ;;  %v491_v32 = vand.u32 127, %v488_v30 }
  0x1d   : > { %v2986_v13 = vor.u32 %v3688_v12, %v2985_v11  ;;  %v530_v15 = vperm.slane %v2974_v14, 1  ;;  %v529_v16 = vperm.slane %v2974_v14, 0  ;;  %v531_v23 = vperm.slane %v2974_v14, 2  ;;  %v3711_v63 = vld [vmem:[%s5144_s5 + $0x8] sm:$0xff]  ;;  %v3713_v30 = vld [vmem:[%s5144_s5 + $0x18] sm:$0xff]  ;;  %s5157_s23 = sshll.u32 %s5159_s30, 3 }
  0x1e   : > { %667 = vmatpush.bf16.msra.mxu0 %v3014_v34  ;;  %vm4195_vm1 = vcmp.ge.s32.totalorder %v489_v31, %v491_v32  ;;  %vm747_vm2 = vcmask 64512   ;;  %v3712_v31 = vld [vmem:[%s5144_s5 + $0x10] sm:$0xff]  ;;  %v3781_v34 = vld [vmem:[%s5148_s9 + $0x38] sm:$0xff]  ;;  %s476_s26 = scalar_lea.vmem %s5140_s1, %s5157_s23 }
  0x1f   : > { %680 = vmatpush.bf16.msra.mxu1 %v3018_v37 }
  0x20   : > { %692 = vmatpush.bf16.msra.mxu2 %v3034_v54 }
  0x22   : > { %668 = vmatpush.bf16.msra.mxu0 %v3002_v44 }
  0x23   : > { %681 = vmatpush.bf16.msra.mxu1 %v3006_v48 }
  0x24   : > { %693 = vmatpush.bf16.msra.mxu2 %v3022_v1  ;;  %v3710_v1 = vld [vmem:[%s5144_s5] sm:$0xff] }
  0x26   : > { %669 = vmatpush.bf16.msra.mxu0 %v2990_v55 }
  0x27   : > { %682 = vmatpush.bf16.msra.mxu1 %v2994_v59 }
  0x28   : > { %694 = vmatpush.bf16.msra.mxu2 %v3010_v7 }
  0x2a   : > { %670 = vmatpush.bf16.msra.mxu0 %v2978_v2 }
  0x2b   : > { %683 = vmatpush.bf16.msra.mxu1 %v2982_v5 }
  0x2c   : > { %695 = vmatpush.bf16.msra.mxu2 %v2998_v10 }
  0x2d   : > { %671 = vmatmul.bf16.vlgmr.msra.gmra.mxu0 %v493_v6 }
  0x2e   : > { %684 = vmatmul.bf16.vlgmr.msra.gmra.mxu1 %v493_v6  ;;  %927 = vmatpush.bf16.msrb.mxu0 %v3711_v63 }
  0x30   : > { %696 = vmatpush.bf16.msra.mxu2 %v2986_v13 }
  0x32   : > { %928 = vmatpush.bf16.msrb.mxu0 %v3710_v1 }
  0x33   : > { %697 = vmatmul.bf16.vlgmr.msra.gmra.mxu2 %v493_v6 }
  0xaa   : > { %v672_v17 = vpop.f32.mrf.mxu0 }
  0xab   : > { %v685_v18 = vpop.f32.mrf.mxu1  ;;  %v673_v20 = vadd.f32 %v672_v17, %v529_v16 }
  0xac   : > { %v686_v19 = vadd.f32 %v685_v18, %v530_v15 }
  0xae   : > { %936 = vrot.lane.b32.xlu2 %v686_v19, %s3926_s27  ;;  %798 = vrot.lane.b32.xlu1 %v686_v19, %s3927_s28 }
  0xaf   : > { %3071 = vmatpush.xpose.msk.msra.mxu3 %vm718_vm0, %v686_v19 }
  0xb2   : > { %3072 = vmatmul.msk.f32.vlgmr.msra.gmra.mxu3 %vm718_vm0, %v673_v20  ;;  %v674_v21 = vpop.f32.mrf.mxu0 }
  0xb3   : > { %v687_v22 = vpop.f32.mrf.mxu1 }
  0xb6   : > { %934 = vrot.lane.b32.xlu2 %v673_v20, %s3926_s27  ;;  %796 = vrot.lane.b32.xlu1 %v673_v20, %s3927_s28  ;;  %v698_v24 = vpop.f32.mrf.mxu2 }
  0xb7   : > { %v4189_v25 = vadd.f32 %v698_v24, %v531_v23 }
  0xb9   : > { %790 = vmatpush.msrb.mxu3 %v4189_v25 }
  0xbe   : > { %1044 = vrot.lane.b32.xlu1 %v673_v20, %s3928_s15  ;;  %v700_v26 = vpop.f32.mrf.mxu2 }
 0x108   : > { %v937_v27 = vpop.permute.xlu2 %936 }
 0x109   : > { %3095 = vmatpush.xpose.msk.msrb.mxu1 %vm718_vm0, %v937_v27 }
 0x110   : > { %v935_v28 = vpop.permute.xlu2 %934 }
 0x111   : > { %3096 = vmatmul.msk.f32.vlgmr.msrb.gmra.mxu1 %vm718_vm0, %v935_v28 }
 0x120   : > { %v799_v29 = vpop.permute.xlu1 %798 }
 0x121   : > { %3074 = vmatpush.xpose.msk.msra.mxu3 %vm718_vm0, %v799_v29 }
 0x128   : > { %v797_v52 = vpop.permute.xlu1 %796 }
 0x130   : > { %v1045_v61 = vpop.permute.xlu1 %1044 }
 0x135   : > { %v742_v33 = vpop.f32.mrf.mxu3 }
 0x136   : > { %v745_v35 = vmul.f32 0.17677669, %v742_v33 }
 0x138   : > { %v746_v36 = vsel %vm4195_vm1, %v745_v35, -1e+30 }
 0x139   : > { %v748_v37 = vsel %vm747_vm2, %v746_v36, -inf }
 0x13a   : > { %749 = vmax.xlane.f32.xlu0 %v748_v37 }
 0x18e   : > { %v959_v43 = vpop.f32.mrf.mxu1 }
 0x18f   : > { %v962_v44 = vmul.f32 0.17677669, %v959_v43 }
 0x191   : > { %v963_v45 = vsel %vm4195_vm1, %v962_v44, -1e+30 }
 0x192   : > { %v964_v46 = vsel %vm747_vm2, %v963_v45, -inf }
 0x1ad   : > { %v750_v38 = vpop.xlane.xlu0 %749 }
 0x1ae   : > { %v751_v39 = vsub.f32 %v746_v36, %v750_v38 }
 0x1b0   : > { %v752_v40 = vmul.f32 1.442695, %v751_v39 }
 0x1b2   : > { %3866 = vpow2.f32 %v752_v40 }
 0x1b8   : > { %v3867_v41 = vpop.eup %3866 }
 0x1b9   : > { %v754_v42 = vsel %vm747_vm2, %v3867_v41, 0.0 }
 0x1ba   : > { %755 = vadd.xlane.f32.xlu0 %v754_v42 }
 0x1ce   : > { %1046 = vrot.lane.b32.xlu0 %v686_v19, %s3928_s15 }
 0x1d6   : > { %851 = vrot.lane.b32.xlu0 %v4189_v25, %s3927_s28 }
 0x200   : > { %965 = vmax.xlane.f32.xlu0 %v964_v46 }
 0x22d   : > { %v756_v47 = vpop.xlane.xlu0 %755 }
 0x22e   : > { %3868 = vrcp.f32 %v756_v47  ;;  %v768_v51 = vand.u32 2147483648, %v756_v47  ;;  %v766_v54 = vand.u32 2147483647, %v756_v47  ;;  %vm762_vm4 = vweird.f32 %v756_v47 }
 0x230   : > { %v769_v56 = vor.u32 1.1754944e-38, %v768_v51  ;;  %vm767_vm6 = vcmp.eq.f32.partialorder %v766_v54, 8.507059e+37 }
 0x234   : > { %v3869_v48 = vpop.eup %3868 }
 0x235   : > { %v758_v49 = vmul.f32 %v3869_v48, %v756_v47  ;;  %vm763_vm3 = vweird.f32 %v3869_v48 }
 0x236   : > { %vm764_vm5 = vmor %vm762_vm4, %vm763_vm3 }
 0x237   : > { %v759_v50 = vsub.f32 1.0, %v758_v49 }
 0x239   : > { %v760_v53 = vmul.f32 %v3869_v48, %v759_v50 }
 0x23b   : > { %v761_v55 = vadd.f32 %v3869_v48, %v760_v53 }
 0x23d   : > { %v765_v57 = vsel %vm764_vm5, %v3869_v48, %v761_v55 }
 0x23e   : > { %v770_v58 = vsel %vm767_vm6, %v769_v56, %v765_v57 }
 0x23f   : > { %v771_v59 = vmul.f32 %v3867_v41, %v770_v58 }
 0x240   : > { %v1047_v60 = vpop.permute.xlu0 %1046 }
 0x241   : > { %3073 = vmatmul.msk.f32.vlgmr.msrb.gmra.mxu3 %vm747_vm2, %v771_v59  ;;  %3107 = vmatpush.xpose.msk.msra.mxu1 %vm718_vm0, %v1047_v60  ;;  %v3717_v59 = vld [vmem:[%s5144_s5 + $0x38] sm:$0xff]  ;;  %v3716_v60 = vld [vmem:[%s5144_s5 + $0x30] sm:$0xff] }
 0x244   : > { %3108 = vmatmul.msk.f32.vlgmr.msra.gmra.mxu1 %vm718_vm0, %v1045_v61 }
 0x248   : > { %v852_v62 = vpop.permute.xlu0 %851 }
 0x249   : > { %3075 = vmatmul.msk.f32.vlgmr.msra.gmra.mxu3 %vm718_vm0, %v797_v52 }
 0x24a   : > { %872 = vmatpush.msrb.mxu3 %v852_v62 }
 0x24c   : > { %899 = vmatpush.bf16.msra.mxu3 %v3713_v30 }
 0x250   : > { %900 = vmatpush.bf16.msra.mxu3 %v3712_v31  ;;  %v3929_v31 = vmov 128.0  }
 0x273   : > { %v966_v4 = vpop.xlane.xlu0 %965 }
 0x274   : > { %v967_v8 = vsub.f32 %v963_v45, %v966_v4 }
 0x276   : > { %v968_v12 = vmul.f32 1.442695, %v967_v8 }
 0x278   : > { %3870 = vpow2.f32 %v968_v12 }
 0x27e   : > { %v4226_v15 = vpop.eup %3870 }
 0x27f   : > { %v970_v16 = vsel %vm747_vm2, %v4226_v15, 0.0 }
 0x2c1   : > { %v1069_v7 = vpop.f32.mrf.mxu1 }
 0x2c2   : > { %v1072_v11 = vmul.f32 0.17677669, %v1069_v7 }
 0x2c4   : > { %v792_v2 = vpop.f32.mrf.mxu3  ;;  %v1073_v13 = vsel %vm4195_vm1, %v1072_v11, -1e+30 }
 0x2c5   : > { %v795_v3 = vpack.c.bf16 %v792_v2, %v792_v2  ;;  %v1074_v14 = vsel %vm747_vm2, %v1073_v13, -inf }
 0x2c7   : > { %3094 = vmatmul.msk.bf16.vlgmr.msrb.gmra.mxu0 %vm718_vm0, %v795_v3 }
 0x2cc   : > { %v821_v5 = vpop.f32.mrf.mxu3 }
 0x2cd   : > { %v824_v6 = vmul.f32 0.17677669, %v821_v5 }
 0x2cf   : > { %v825_v9 = vsel %vm4195_vm1, %v824_v6, -1e+30 }
 0x2d0   : > { %v826_v10 = vsel %vm747_vm2, %v825_v9, -inf }
 0x2d1   : > { %827 = vmax.xlane.f32.xlu2 %v826_v10 }
 0x2d9   : > { %1075 = vmax.xlane.f32.xlu2 %v1074_v14  ;;  %v3714_v14 = vld [vmem:[%s5144_s5 + $0x20] sm:$0xff] }
 0x2e1   : > { %971 = vadd.xlane.f32.xlu2 %v970_v16 }
 0x2f9   : > { %988 = vrot.lane.b32.xlu2 %v4189_v25, %s3926_s27 }
 0x344   : > { %v828_v17 = vpop.xlane.xlu2 %827  ;;  %v4232_v18 = vpop.f32.mrf.mxu0 }
 0x345   : > { %v829_v19 = vsub.f32 %v825_v9, %v828_v17 }
 0x347   : > { %v830_v20 = vmul.f32 1.442695, %v829_v19 }
 0x349   : > { %3872 = vpow2.f32 %v830_v20 }
 0x34c   : > { %v932_v21 = vpop.f32.mrf.mxu0  ;;  %v1076_v22 = vpop.xlane.xlu2 %1075 }
 0x34d   : > { %v1077_v23 = vsub.f32 %v1073_v13, %v1076_v22  ;;  %v3715_v13 = vld [vmem:[%s5144_s5 + $0x28] sm:$0xff] }
 0x34f   : > { %v3873_v24 = vpop.eup %3872  ;;  %v1078_v26 = vmul.f32 1.442695, %v1077_v23 }
 0x350   : > { %v832_v27 = vsel %vm747_vm2, %v3873_v24, 0.0 }
 0x351   : > { %3874 = vpow2.f32 %v1078_v26  ;;  %833 = vadd.xlane.f32.xlu1 %v832_v27  ;;  %v1154_v26 = vld [vmem:[%s5142_s3 + $0x2] ss:$0 sm:$0xff] }
 0x354   : > { %v972_v37 = vpop.xlane.xlu2 %971 }
 0x355   : > { %v984_v5 = vand.u32 2147483648, %v972_v37  ;;  %vm978_vm3 = vweird.f32 %v972_v37  ;;  %v982_v7 = vand.u32 2147483647, %v972_v37 }
 0x357   : > { %v3875_v28 = vpop.eup %3874  ;;  %v985_v10 = vor.u32 1.1754944e-38, %v984_v5  ;;  %vm983_vm5 = vcmp.eq.f32.partialorder %v982_v7, 8.507059e+37  ;;  %v3148_v5 = vld [vmem:[%s5145_s6 + $0x38] sm:$0xf0]  ;;  %v3138_v7 = vld [vmem:[%s5145_s6 + $0x20] sm:$0xf] }
 0x358   : > { %v1080_v29 = vsel %vm747_vm2, %v3875_v28, 0.0 }
 0x359   : > { %1081 = vadd.xlane.f32.xlu1 %v1080_v29 }
 0x35c   : > { %v989_v49 = vpop.permute.xlu2 %988 }
 0x372   : > { %1098 = vrot.lane.b32.xlu1 %v4189_v25, %s3928_s15 }
 0x3c4   : > { %v834_v32 = vpop.xlane.xlu1 %833 }
 0x3c5   : > { %3876 = vrcp.f32 %v834_v32  ;;  %v846_v39 = vand.u32 2147483648, %v834_v32  ;;  %v844_v40 = vand.u32 2147483647, %v834_v32  ;;  %vm840_vm8 = vweird.f32 %v834_v32 }
 0x3c7   : > { %v847_v43 = vor.u32 1.1754944e-38, %v846_v39  ;;  %vm845_vm10 = vcmp.eq.f32.partialorder %v844_v40, 8.507059e+37 }
 0x3cb   : > { %v3877_v33 = vpop.eup %3876 }
 0x3cc   : > { %v836_v35 = vmul.f32 %v3877_v33, %v834_v32  ;;  %v1082_v36 = vpop.xlane.xlu1 %1081  ;;  %vm841_vm7 = vweird.f32 %v3877_v33  ;;  %v3178_v32 = vld [vmem:[%s5145_s6 + $0x70] sm:$0xf] }
 0x3cd   : > { %3878 = vrcp.f32 %v1082_v36  ;;  %vm842_vm9 = vmor %vm840_vm8, %vm841_vm7  ;;  %v1094_v52 = vand.u32 2147483648, %v1082_v36  ;;  %vm1088_vm12 = vweird.f32 %v1082_v36  ;;  %v1092_v53 = vand.u32 2147483647, %v1082_v36 }
 0x3ce   : > { %v837_v38 = vsub.f32 1.0, %v836_v35  ;;  %3880 = vrcp.f32 %v972_v37 }
 0x3cf   : > { %v1095_v55 = vor.u32 1.1754944e-38, %v1094_v52  ;;  %vm1093_vm14 = vcmp.eq.f32.partialorder %v1092_v53, 8.507059e+37  ;;  %3882 = vrcp.f32 %v3929_v31  ;;  %v3162_v52 = vld [vmem:[%s5145_s6 + $0x50] sm:$0xf]  ;;  %v3729_v53 = vld [vmem:[%s5145_s6 + $0x54] sm:$0xf0] }
 0x3d0   : > { %v838_v25 = vmul.f32 %v3877_v33, %v837_v38 }
 0x3d2   : > { %v839_v41 = vadd.f32 %v3877_v33, %v838_v25 }
 0x3d3   : > { %v3879_v42 = vpop.eup %3878 }
 0x3d4   : > { %v843_v44 = vsel %vm842_vm9, %v3877_v33, %v839_v41  ;;  %v1084_v45 = vmul.f32 %v3879_v42, %v1082_v36  ;;  %vm1089_vm11 = vweird.f32 %v3879_v42  ;;  %v3881_v61 = vpop.eup %3880  ;;  %v3732_v33 = vld [vmem:[%s5145_s6 + $0x74] sm:$0xf] }
 0x3d5   : > { %v848_v46 = vsel %vm845_vm10, %v847_v43, %v843_v44  ;;  %vm1090_vm13 = vmor %vm1088_vm12, %vm1089_vm11  ;;  %v974_v62 = vmul.f32 %v3881_v61, %v972_v37  ;;  %vm979_vm15 = vweird.f32 %v3881_v61  ;;  %v3883_v37 = vpop.eup %3882 }
 0x3d6   : > { %v1085_v47 = vsub.f32 1.0, %v1084_v45  ;;  %v849_v48 = vmul.f32 %v3873_v24, %v848_v46  ;;  %vm980_vm4 = vmor %vm978_vm3, %vm979_vm15  ;;  %v1162_v38 = vmul.f32 128.0, %v3883_v37  ;;  %vm1166_vm6 = vweird.f32 %v3883_v37  ;;  %v3170_v46 = vld [vmem:[%s5145_s6 + $0x60] sm:$0xf] }
 0x3d7   : > { %v975_v63 = vsub.f32 1.0, %v974_v62  ;;  %v3156_v62 = vld [vmem:[%s5145_s6 + $0x48] sm:$0xf0] }
 0x3d8   : > { %v1086_v50 = vmul.f32 %v3879_v42, %v1085_v47  ;;  %3076 = vmatmul.msk.f32.vlgmr.msrb.gmra.mxu3 %vm747_vm2, %v849_v48  ;;  %v1163_v39 = vsub.f32 1.0, %v1162_v38  ;;  %v3731_v47 = vld [vmem:[%s5145_s6 + $0x64] sm:$0xf0]  ;;  %v3730_v48 = vld [vmem:[%s5145_s6 + $0x64] sm:$0xf] }
 0x3d9   : > { %1009 = vmatpush.msrb.mxu3 %v989_v49  ;;  %v976_v3 = vmul.f32 %v3881_v61, %v975_v63  ;;  %v3171_v49 = vor.u32 %v3731_v47, %v3170_v46  ;;  %v1157_v38 = vld [vmem:[%s5142_s3 + $0x3] ss:$0 sm:$0xff]  ;;  %v3740_v46 = vld [vmem:[%s5146_s7 + $0x30] sm:$0xff] }
 0x3da   : > { %v1087_v51 = vadd.f32 %v3879_v42, %v1086_v50  ;;  %v1164_v25 = vmul.f32 %v3883_v37, %v1163_v39  ;;  %v3172_v50 = vld [vmem:[%s5145_s6 + $0x68] sm:$0xf0]  ;;  %v3746_v47 = vld [vmem:[%s5146_s7 + $0x60] sm:$0xff] }
 0x3db   : > { %v977_v4 = vadd.f32 %v3881_v61, %v976_v3  ;;  %v3724_v3 = vld [vmem:[%s5145_s6 + $0x34] sm:$0xf] }
 0x3dc   : > { %v1091_v54 = vsel %vm1090_vm13, %v3879_v42, %v1087_v51  ;;  %v1165_v40 = vadd.f32 %v3883_v37, %v1164_v25  ;;  %v3175_v51 = vor.u32 %v3730_v48, %v3172_v50  ;;  %v1158_v25 = vld [vmem:[%s5142_s3 + $0x4] ss:$0 sm:$0xff]  ;;  %v3739_v48 = vld [vmem:[%s5146_s7 + $0x28] sm:$0xff] }
 0x3dd   : > { %v1096_v56 = vsel %vm1093_vm14, %v1095_v55, %v1091_v54  ;;  %v981_v9 = vsel %vm980_vm4, %v3881_v61, %v977_v4  ;;  %v3728_v54 = vld [vmem:[%s5145_s6 + $0x54] sm:$0xf]  ;;  %v3163_v55 = vor.u32 %v3729_v53, %v3162_v52  ;;  %v3738_v50 = vld [vmem:[%s5146_s7 + $0x20] sm:$0xff]  ;;  %v3737_v52 = vld [vmem:[%s5146_s7 + $0x18] sm:$0xff] }
 0x3de   : > { %v1097_v58 = vmul.f32 %v3875_v28, %v1096_v56  ;;  %v986_v11 = vsel %vm983_vm5, %v985_v10, %v981_v9  ;;  %v4280_v41 = vsel %vm1166_vm6, %v3883_v37, %v1165_v40  ;;  %v3164_v56 = vld [vmem:[%s5145_s6 + $0x58] sm:$0xf0]  ;;  %v3722_v9 = vld [vmem:[%s5145_s6 + $0x24] sm:$0xf]  ;;  %v3743_v53 = vld [vmem:[%s5146_s7 + $0x48] sm:$0xff] }
 0x3df   : > { %v987_v12 = vmul.f32 %v4226_v15, %v986_v11  ;;  %v3140_v11 = vld [vmem:[%s5145_s6 + $0x28] sm:$0xf0] }
 0x3e4   : > { %v1099_v57 = vpop.permute.xlu1 %1098 }
 0x3e5   : > { %1119 = vmatpush.msra.mxu0 %v1099_v57  ;;  %v3167_v57 = vor.u32 %v3728_v54, %v3164_v56  ;;  %v3736_v54 = vld [vmem:[%s5146_s7 + $0x10] sm:$0xff]  ;;  %v3735_v56 = vld [vmem:[%s5146_s7 + $0x8] sm:$0xff] }
 0x3e6   : > { %3109 = vmatmul.msk.f32.vlgmr.msra.gmra.mxu0 %vm747_vm2, %v1097_v58  ;;  %v3154_v58 = vld [vmem:[%s5145_s6 + $0x40] sm:$0xf] }
 0x3e7   : > { %1146 = vmatpush.bf16.msrb.mxu0 %v3717_v59  ;;  %v3727_v59 = vld [vmem:[%s5145_s6 + $0x44] sm:$0xf0] }
 0x3e8   : > { %v3155_v61 = vor.u32 %v3727_v59, %v3154_v58  ;;  %v3734_v58 = vld [vmem:[%s5146_s7] sm:$0xff] }
 0x3eb   : > { %1147 = vmatpush.bf16.msrb.mxu0 %v3716_v60  ;;  %v3726_v60 = vld [vmem:[%s5145_s6 + $0x44] sm:$0xf] }
 0x3ec   : > { %v3159_v63 = vor.u32 %v3726_v60, %v3156_v62 }
 0x45b   : > { %v874_v1 = vpop.f32.mrf.mxu3 }
 0x45c   : > { %v877_v2 = vpack.c.bf16 %v874_v1, %v874_v1  ;;  %v3146_v1 = vld [vmem:[%s5145_s6 + $0x30] sm:$0xf] }
 0x45e   : > { %3085 = vmatmul.msk.bf16.vlgmr.msra.gmra.mxu3 %vm718_vm0, %v877_v2  ;;  %v3725_v2 = vld [vmem:[%s5145_s6 + $0x34] sm:$0xf0] }
 0x45f   : > { %1036 = vmatpush.bf16.msra.mxu3 %v3715_v13  ;;  %v3147_v4 = vor.u32 %v3725_v2, %v3146_v1  ;;  %v3130_v13 = vld [vmem:[%s5145_s6 + $0x10] sm:$0xf] }
 0x463   : > { %v1121_v6 = vpop.f32.mrf.mxu0  ;;  %1037 = vmatpush.bf16.msra.mxu3 %v3714_v14  ;;  %v3721_v14 = vld [vmem:[%s5145_s6 + $0x14] sm:$0xf0] }
 0x464   : > { %v1124_v8 = vpack.c.bf16 %v1121_v6, %v1121_v6  ;;  %v3151_v6 = vor.u32 %v3724_v3, %v3148_v5 }
 0x466   : > { %3118 = vmatmul.msk.bf16.vlgmr.msrb.gmra.mxu0 %vm718_vm0, %v1124_v8  ;;  %v3723_v8 = vld [vmem:[%s5145_s6 + $0x24] sm:$0xf0] }
 0x467   : > { %v3139_v10 = vor.u32 %v3723_v8, %v3138_v7 }
 0x46e   : > { %3097 = vmatmul.msk.f32.vlgmr.msrb.gmra.mxu3 %vm747_vm2, %v987_v12  ;;  %v3143_v12 = vor.u32 %v3722_v9, %v3140_v11 }
 0x4e1   : > { %v902_v16 = vpop.f32.mrf.mxu3 }
 0x4e2   : > { %v931_v15 = vadd.f32 %v4232_v18, %v902_v16  ;;  %v3733_v18 = vld [vmem:[%s5145_s6 + $0x74] sm:$0xf0]  ;;  %v3720_v16 = vld [vmem:[%s5145_s6 + $0x14] sm:$0xf] }
 0x4e3   : > { %v1149_v17 = vpop.f32.mrf.mxu0  ;;  %v3179_v35 = vor.u32 %v3733_v18, %v3178_v32 }
 0x4e5   : > { %1292 = vmatpush.bf16.msrb.mxu3 %v3179_v35 }
 0x4e9   : > { %v904_v19 = vpop.f32.mrf.mxu3  ;;  %1293 = vmatpush.bf16.msrb.mxu3 %v3171_v49  ;;  %v3745_v49 = vld [vmem:[%s5146_s7 + $0x58] sm:$0xff] }
 0x4ea   : > { %v3132_v19 = vld [vmem:[%s5145_s6 + $0x18] sm:$0xf0] }
 0x4eb   : > { %v1151_v20 = vpop.f32.mrf.mxu0 }
 0x4ec   : > { %v3122_v20 = vld [vmem:[%s5145_s6] sm:$0xf] }
 0x4ed   : > { %1294 = vmatpush.bf16.msrb.mxu3 %v3163_v55  ;;  %v3742_v55 = vld [vmem:[%s5146_s7 + $0x40] sm:$0xff] }
 0x4f1   : > { %v1011_v21 = vpop.f32.mrf.mxu3  ;;  %1295 = vmatpush.bf16.msrb.mxu3 %v3155_v61 }
 0x4f2   : > { %v1014_v22 = vpack.c.bf16 %v1011_v21, %v1011_v21  ;;  %v3719_v21 = vld [vmem:[%s5145_s6 + $0x4] sm:$0xf0] }
 0x4f4   : > { %3106 = vmatmul.msk.bf16.vlgmr.msra.gmra.mxu3 %vm718_vm0, %v1014_v22  ;;  %v3135_v22 = vor.u32 %v3720_v16, %v3132_v19 }
 0x4f5   : > { %1296 = vmatpush.bf16.msrb.mxu3 %v3147_v4 }
 0x4f9   : > { %1297 = vmatpush.bf16.msrb.mxu3 %v3139_v10 }
 0x577   : > { %v1039_v23 = vpop.f32.mrf.mxu3 }
 0x578   : > { %v1043_v24 = vadd.f32 %v1039_v23, %v931_v15  ;;  %v3718_v15 = vld [vmem:[%s5145_s6 + $0x4] sm:$0xf]  ;;  %v3124_v23 = vld [vmem:[%s5145_s6 + $0x8] sm:$0xf0] }
 0x57a   : > { %v1153_v27 = vadd.f32 %v1149_v17, %v1043_v24  ;;  %v3131_v17 = vor.u32 %v3721_v14, %v3130_v13  ;;  %v3123_v24 = vor.u32 %v3719_v21, %v3122_v20 }
 0x57c   : > { %v1155_v28 = vadd.f32 %v1154_v26, %v1153_v27  ;;  %1298 = vmatpush.bf16.msrb.mxu3 %v3131_v17  ;;  %v3127_v26 = vor.u32 %v3718_v15, %v3124_v23  ;;  %v3749_v27 = vld [vmem:[%s5146_s7 + $0x78] sm:$0xff] }
 0x57d   : > { %1480 = vmatpush.bf16.msra.mxu0 %v3749_v27 }
 0x57e   : > { %v1156_v29 = vadd.f32 %v1155_v28, %v4157_v0  ;;  %v3180_v0 = vld [vmem:[%s5145_s6 + $0x78] sm:$0xf0] }
 0x57f   : > { %v1041_v30 = vpop.f32.mrf.mxu3  ;;  %v3183_v36 = vor.u32 %v3732_v33, %v3180_v0 }
 0x580   : > { %1159 = vadd.xlane.f32.xlu0 %v1156_v29  ;;  %1299 = vmatpush.bf16.msrb.mxu3 %v3123_v24  ;;  %v3748_v30 = vld [vmem:[%s5146_s7 + $0x70] sm:$0xff] }
 0x581   : > { %1305 = vmatpush.bf16.msrb.mxu1 %v3183_v36  ;;  %1481 = vmatpush.bf16.msra.mxu0 %v3748_v30 }
 0x585   : > { %1306 = vmatpush.bf16.msrb.mxu1 %v3175_v51  ;;  %v3744_v51 = vld [vmem:[%s5146_s7 + $0x50] sm:$0xff] }
 0x589   : > { %1307 = vmatpush.bf16.msrb.mxu1 %v3167_v57  ;;  %v3119_v57 = vld [vmem:[%s5142_s3 + $0x5] ss:$8 sm:$0x3] }
 0x58a   : > { %v1209_v59 = vperm.slane %v3119_v57, 1 }
 0x58d   : > { %1308 = vmatpush.bf16.msrb.mxu1 %v3159_v63  ;;  %v1208_v63 = vperm.slane %v3119_v57, 0  ;;  %v3765_v57 = vld [vmem:[%s5147_s8 + $0x7c] sm:$0xf] }
 0x591   : > { %1309 = vmatpush.bf16.msrb.mxu1 %v3151_v6 }
 0x595   : > { %1310 = vmatpush.bf16.msrb.mxu1 %v3143_v12 }
 0x599   : > { %1311 = vmatpush.bf16.msrb.mxu1 %v3135_v22 }
 0x59d   : > { %1312 = vmatpush.bf16.msrb.mxu1 %v3127_v26 }
 0x5f3   : > { %v1160_v42 = vpop.xlane.xlu0 %1159 }
 0x5f4   : > { %v1168_v43 = vmul.f32 %v4280_v41, %v1160_v42 }
 0x5f6   : > { %v4283_v44 = vsub.f32 %v1156_v29, %v1168_v43 }
 0x5f8   : > { %v1170_v45 = vmul.f32 %v4283_v44, %v4283_v44 }
 0x5fa   : > { %1171 = vadd.xlane.f32.xlu0 %v1170_v45  ;;  %v3741_v45 = vld [vmem:[%s5146_s7 + $0x38] sm:$0xff] }
 0x5fb   : > { %1467 = vmatpush.bf16.msrb.mxu2 %v3741_v45 }
 0x5ff   : > { %1468 = vmatpush.bf16.msrb.mxu2 %v3740_v46  ;;  %v3323_v46 = vld [vmem:[%s5147_s8 + $0x90] sm:$0xf] }
 0x603   : > { %1469 = vmatpush.bf16.msrb.mxu2 %v3739_v48  ;;  %v3768_v48 = vld [vmem:[%s5147_s8 + $0x94] sm:$0xf] }
 0x607   : > { %1470 = vmatpush.bf16.msrb.mxu2 %v3738_v50  ;;  %v3325_v50 = vld [vmem:[%s5147_s8 + $0x9c] sm:$0xf0] }
 0x60b   : > { %1471 = vmatpush.bf16.msrb.mxu2 %v3737_v52  ;;  %v3770_v52 = vld [vmem:[%s5147_s8 + $0xa0] sm:$0xf0] }
 0x60f   : > { %1472 = vmatpush.bf16.msrb.mxu2 %v3736_v54 }
 0x613   : > { %1473 = vmatpush.bf16.msrb.mxu2 %v3735_v56  ;;  %v3766_v56 = vld [vmem:[%s5147_s8 + $0x80] sm:$0xf0] }
 0x617   : > { %1474 = vmatpush.bf16.msrb.mxu2 %v3734_v58 }
 0x66d   : > { %v1172_v28 = vpop.xlane.xlu0 %1171 }
 0x66e   : > { %v1173_v29 = vmul.f32 %v1172_v28, %v4280_v41  ;;  %v1370_v28 = vld [vmem:[%s5142_s3 + $0x6] ss:$0 sm:$0xff] }
 0x670   : > { %v1174_v31 = vadd.f32 1e-05, %v1173_v29 }
 0x672   : > { %3884 = vrsqrt.f32 %v1174_v31  ;;  %vm1181_vm8 = vweird.f32 %v1174_v31 }
 0x678   : > { %v3885_v32 = vpop.eup %3884 }
 0x679   : > { %v1176_v18 = vmul.f32 %v3885_v32, %v1174_v31  ;;  %vm1182_vm7 = vweird.f32 %v3885_v32 }
 0x67a   : > { %vm1183_vm9 = vmor %vm1181_vm8, %vm1182_vm7 }
 0x67b   : > { %v1177_v33 = vmul.f32 %v3885_v32, %v1176_v18 }
 0x67d   : > { %v1178_v35 = vmul.f32 0.5, %v1177_v33  ;;  %v3335_v33 = vld [vmem:[%s5147_s8 + $0xa8] sm:$0xf] }
 0x67f   : > { %v1179_v0 = vsub.f32 1.5, %v1178_v35  ;;  %v3772_v35 = vld [vmem:[%s5147_s8 + $0xb0] sm:$0xf0] }
 0x681   : > { %v1180_v36 = vmul.f32 %v3885_v32, %v1179_v0  ;;  %v3771_v0 = vld [vmem:[%s5147_s8 + $0xac] sm:$0xf] }
 0x683   : > { %v1184_v37 = vsel %vm1183_vm9, %v3885_v32, %v1180_v36  ;;  %v3336_v36 = vor.u32 %v3772_v35, %v3335_v33  ;;  %v3265_v33 = vld [vmem:[%s5147_s8 + $0x24] sm:$0xf0]  ;;  %v3271_v35 = vld [vmem:[%s5147_s8 + $0x20] sm:$0xf] }
 0x684   : > { %v1185_v39 = vmul.f32 %v1184_v37, %v4283_v44  ;;  %v3747_v44 = vld [vmem:[%s5146_s7 + $0x68] sm:$0xff]  ;;  %v3337_v37 = vld [vmem:[%s5147_s8 + $0xb4] sm:$0xf0] }
 0x685   : > { %1482 = vmatpush.bf16.msra.mxu0 %v3747_v44  ;;  %1688 = vmatpush.bf16.msra.mxu3 %v3336_v36 }
 0x686   : > { %v1186_v40 = vmul.f32 %v1185_v39, %v1157_v38  ;;  %v3343_v38 = vld [vmem:[%s5147_s8 + $0xb0] sm:$0xf]  ;;  %v3773_v39 = vld [vmem:[%s5147_s8 + $0xb8] sm:$0xf0] }
 0x688   : > { %v4385_v42 = vadd.f32 %v1186_v40, %v1158_v25  ;;  %v3340_v25 = vor.u32 %v3771_v0, %v3337_v37  ;;  %v3344_v40 = vor.u32 %v3773_v39, %v3343_v38  ;;  %v3755_v0 = vld [vmem:[%s5147_s8 + $0x28] sm:$0xf0]  ;;  %v3251_v38 = vld [vmem:[%s5147_s8] sm:$0xf] }
 0x689   : > { %1483 = vmatpush.bf16.msra.mxu0 %v3746_v47  ;;  %v3769_v47 = vld [vmem:[%s5147_s8 + $0x98] sm:$0xf0]  ;;  %v3272_v37 = vor.u32 %v3755_v0, %v3271_v35  ;;  %v3751_v39 = vld [vmem:[%s5147_s8 + $0x8] sm:$0xf0] }
 0x68a   : > { %v1188_v43 = vpack.c.bf16 %v4385_v42, %v4385_v42  ;;  %1701 = vmatpush.bf16.msra.mxu1 %v3340_v25  ;;  %1714 = vmatpush.bf16.msra.mxu2 %v3344_v40  ;;  %v3750_v25 = vld [vmem:[%s5147_s8 + $0x4] sm:$0xf]  ;;  %v3252_v40 = vor.u32 %v3751_v39, %v3251_v38 }
 0x68c   : > { %1300 = vmatmul.bf16.vlgmr.msrb.gmra.mxu3 %v1188_v43  ;;  %1313 = vmatmul.bf16.vlgmr.msrb.gmra.mxu1 %v1188_v43 }
 0x68d   : > { %1484 = vmatpush.bf16.msra.mxu0 %v3745_v49  ;;  %v3324_v49 = vor.u32 %v3769_v47, %v3323_v46 }
 0x68f   : > { %1689 = vmatpush.bf16.msra.mxu3 %v3324_v49 }
 0x691   : > { %1485 = vmatpush.bf16.msra.mxu0 %v3744_v51  ;;  %v3331_v51 = vld [vmem:[%s5147_s8 + $0x98] sm:$0xf] }
 0x692   : > { %v3332_v54 = vor.u32 %v3770_v52, %v3331_v51 }
 0x694   : > { %1715 = vmatpush.bf16.msra.mxu2 %v3332_v54 }
 0x695   : > { %1486 = vmatpush.bf16.msra.mxu0 %v3743_v53  ;;  %v3328_v53 = vor.u32 %v3768_v48, %v3325_v50 }
 0x697   : > { %1702 = vmatpush.bf16.msra.mxu1 %v3328_v53 }
 0x699   : > { %1487 = vmatpush.bf16.msra.mxu0 %v3742_v55  ;;  %v3311_v55 = vld [vmem:[%s5147_s8 + $0x78] sm:$0xf] }
 0x69a   : > { %v3312_v58 = vor.u32 %v3766_v56, %v3311_v55 }
 0x69c   : > { %1690 = vmatpush.bf16.msra.mxu3 %v3312_v58  ;;  %v1494_v58 = vld [vmem:[%s5142_s3 + $0x7] ss:$0 sm:$0xff] }
 0x709   : > { %v1314_v60 = vpop.f32.mrf.mxu1 }
 0x70a   : > { %v1315_v61 = vadd.f32 %v1314_v60, %v1209_v59  ;;  %v3313_v59 = vld [vmem:[%s5147_s8 + $0x84] sm:$0xf0]  ;;  %v3319_v60 = vld [vmem:[%s5147_s8 + $0x80] sm:$0xf] }
 0x70c   : > { %v1321_v62 = vmul.f32 0.044715, %v1315_v61  ;;  %v1319_v16 = vmul.f32 0.5, %v1315_v61 }
 0x70e   : > { %v1323_v1 = vmul.f32 %v1321_v62, %v1315_v61  ;;  %v3316_v62 = vor.u32 %v3765_v57, %v3313_v59 }
 0x70f   : > { %v1301_v2 = vpop.f32.mrf.mxu3 }
 0x710   : > { %v1325_v3 = vmul.f32 %v1323_v1, %v1315_v61  ;;  %v1302_v4 = vadd.f32 %v1301_v2, %v1208_v63  ;;  %1703 = vmatpush.bf16.msra.mxu1 %v3316_v62  ;;  %v3299_v1 = vld [vmem:[%s5147_s8 + $0x60] sm:$0xf]  ;;  %v3763_v2 = vld [vmem:[%s5147_s8 + $0x68] sm:$0xf0] }
 0x711   : > { %v1316_v5 = vpop.f32.mrf.mxu1 }
 0x712   : > { %v1320_v6 = vmul.f32 0.044715, %v1302_v4  ;;  %v1327_v7 = vadd.f32 %v1325_v3, %v1315_v61  ;;  %v1318_v22 = vmul.f32 0.5, %v1302_v4  ;;  %v3767_v61 = vld [vmem:[%s5147_s8 + $0x88] sm:$0xf0] }
 0x713   : > { %v3320_v63 = vor.u32 %v3767_v61, %v3319_v60  ;;  %v3762_v3 = vld [vmem:[%s5147_s8 + $0x64] sm:$0xf]  ;;  %v3301_v5 = vld [vmem:[%s5147_s8 + $0x6c] sm:$0xf0]  ;;  %v1495_v60 = vld [vmem:[%s5142_s3 + $0x18] ss:$0 sm:$0xff] }
 0x714   : > { %v1322_v8 = vmul.f32 %v1320_v6, %v1302_v4  ;;  %v1329_v9 = vmul.f32 0.7978846, %v1327_v7  ;;  %v3307_v6 = vld [vmem:[%s5147_s8 + $0x68] sm:$0xf]  ;;  %v3764_v7 = vld [vmem:[%s5147_s8 + $0x70] sm:$0xf0] }
 0x715   : > { %1716 = vmatpush.bf16.msra.mxu2 %v3320_v63 }
 0x716   : > { %3886 = vtanh.f32 %v1329_v9  ;;  %v1324_v10 = vmul.f32 %v1322_v8, %v1302_v4  ;;  %v3304_v8 = vor.u32 %v3762_v3, %v3301_v5  ;;  %v3308_v9 = vor.u32 %v3764_v7, %v3307_v6 }
 0x717   : > { %v1303_v11 = vpop.f32.mrf.mxu3 }
 0x718   : > { %v1326_v12 = vadd.f32 %v1324_v10, %v1302_v4  ;;  %v3300_v4 = vor.u32 %v3763_v2, %v3299_v1  ;;  %1704 = vmatpush.bf16.msra.mxu1 %v3304_v8  ;;  %v3287_v10 = vld [vmem:[%s5147_s8 + $0x48] sm:$0xf]  ;;  %v3760_v11 = vld [vmem:[%s5147_s8 + $0x50] sm:$0xf0] }
 0x719   : > { %1717 = vmatpush.bf16.msra.mxu2 %v3308_v9  ;;  %v3248_v1 = vld [vmem:[%s5142_s3 + $0x19] ss:$8 sm:$0x7] }
 0x71a   : > { %v1328_v13 = vmul.f32 0.7978846, %v1326_v12  ;;  %1691 = vmatpush.bf16.msra.mxu3 %v3300_v4  ;;  %v3759_v12 = vld [vmem:[%s5147_s8 + $0x4c] sm:$0xf]  ;;  %v1555_v2 = vperm.slane %v3248_v1, 1  ;;  %v1554_v4 = vperm.slane %v3248_v1, 0 }
 0x71b   : > { %v1556_v5 = vperm.slane %v3248_v1, 2 }
 0x71c   : > { %v3887_v14 = vpop.eup %3886  ;;  %3888 = vtanh.f32 %v1328_v13  ;;  %v3288_v13 = vor.u32 %v3760_v11, %v3287_v10 }
 0x71d   : > { %v1333_v17 = vadd.f32 1.0, %v3887_v14  ;;  %v3289_v14 = vld [vmem:[%s5147_s8 + $0x54] sm:$0xf0] }
 0x71e   : > { %1692 = vmatpush.bf16.msra.mxu3 %v3288_v13 }
 0x71f   : > { %v1335_v19 = vmul.f32 %v1333_v17, %v1319_v16  ;;  %v3295_v16 = vld [vmem:[%s5147_s8 + $0x50] sm:$0xf]  ;;  %v3761_v17 = vld [vmem:[%s5147_s8 + $0x58] sm:$0xf0] }
 0x721   : > { %v1337_v20 = vpack.c.bf16 %v1335_v19, %v1335_v19  ;;  %v3292_v19 = vor.u32 %v3759_v12, %v3289_v14 }
 0x722   : > { %v3889_v21 = vpop.eup %3888 }
 0x723   : > { %1488 = vmatmul.bf16.vlgmr.msra.gmra.mxu0 %v1337_v20  ;;  %v1332_v15 = vadd.f32 1.0, %v3889_v21  ;;  %v3296_v20 = vor.u32 %v3761_v17, %v3295_v16  ;;  %1705 = vmatpush.bf16.msra.mxu1 %v3292_v19  ;;  %v3275_v21 = vld [vmem:[%s5147_s8 + $0x30] sm:$0xf] }
 0x725   : > { %v1334_v23 = vmul.f32 %v1332_v15, %v1318_v22  ;;  %1718 = vmatpush.bf16.msra.mxu2 %v3296_v20  ;;  %v3757_v22 = vld [vmem:[%s5147_s8 + $0x38] sm:$0xf0]  ;;  %v3756_v15 = vld [vmem:[%s5147_s8 + $0x34] sm:$0xf] }
 0x727   : > { %v1336_v24 = vpack.c.bf16 %v1334_v23, %v1334_v23  ;;  %v3276_v23 = vor.u32 %v3757_v22, %v3275_v21 }
 0x729   : > { %1475 = vmatmul.bf16.vlgmr.msrb.gmra.mxu2 %v1336_v24  ;;  %v3277_v24 = vld [vmem:[%s5147_s8 + $0x3c] sm:$0xf0]  ;;  %1693 = vmatpush.bf16.msra.mxu3 %v3276_v23 }
 0x7a0   : > { %v1489_v26 = vpop.f32.mrf.mxu0 }
 0x7a8   : > { %v1491_v27 = vpop.f32.mrf.mxu0 }
 0x7a9   : > { %v3758_v27 = vld [vmem:[%s5147_s8 + $0x40] sm:$0xf0] }
 0x7ac   : > { %v1476_v29 = vpop.f32.mrf.mxu2 }
 0x7ad   : > { %v1477_v30 = vadd.f32 %v1476_v29, %v1370_v28  ;;  %v3280_v28 = vor.u32 %v3756_v15, %v3277_v24  ;;  %v3775_v24 = vld [vmem:[%s5148_s9 + $0x8] sm:$0xff] }
 0x7af   : > { %v1490_v31 = vadd.f32 %v1489_v26, %v1477_v30  ;;  %v3283_v26 = vld [vmem:[%s5147_s8 + $0x38] sm:$0xf]  ;;  %1706 = vmatpush.bf16.msra.mxu1 %v3280_v28 }
 0x7b0   : > { %v3284_v29 = vor.u32 %v3758_v27, %v3283_v26  ;;  %v3263_v30 = vld [vmem:[%s5147_s8 + $0x18] sm:$0xf] }
 0x7b1   : > { %v1493_v32 = vadd.f32 %v1490_v31, %v4385_v42  ;;  %v3754_v31 = vld [vmem:[%s5147_s8 + $0x20] sm:$0xf0] }
 0x7b2   : > { %1719 = vmatpush.bf16.msra.mxu2 %v3284_v29 }
 0x7b3   : > { %1496 = vadd.xlane.f32.xlu2 %v1493_v32 }
 0x7b4   : > { %v1478_v18 = vpop.f32.mrf.mxu2 }
 0x7b5   : > { %v3264_v18 = vor.u32 %v3754_v31, %v3263_v30 }
 0x7b6   : > { %1720 = vmatpush.bf16.msra.mxu2 %v3272_v37 }
 0x7b7   : > { %1694 = vmatpush.bf16.msra.mxu3 %v3264_v18 }
 0x7bb   : > { %1695 = vmatpush.bf16.msra.mxu3 %v3252_v40 }
 0x826   : > { %v1497_v42 = vpop.xlane.xlu2 %1496 }
 0x827   : > { %v1498_v43 = vmul.f32 %v1497_v42, %v4280_v41  ;;  %v3253_v42 = vld [vmem:[%s5147_s8 + $0xc] sm:$0xf0] }
 0x828   : > { %v3256_v46 = vor.u32 %v3750_v25, %v3253_v42  ;;  %v3774_v25 = vld [vmem:[%s5148_s9] sm:$0xff] }
 0x829   : > { %v4457_v45 = vsub.f32 %v1493_v32, %v1498_v43  ;;  %v3753_v32 = vld [vmem:[%s5147_s8 + $0x1c] sm:$0xf]  ;;  %v3259_v43 = vld [vmem:[%s5147_s8 + $0x8] sm:$0xf] }
 0x82a   : > { %v3268_v36 = vor.u32 %v3753_v32, %v3265_v33 }
 0x82b   : > { %v1500_v44 = vmul.f32 %v4457_v45, %v4457_v45 }
 0x82c   : > { %1707 = vmatpush.bf16.msra.mxu1 %v3268_v36 }
 0x82d   : > { %1501 = vadd.xlane.f32.xlu1 %v1500_v44  ;;  %v3752_v44 = vld [vmem:[%s5147_s8 + $0x10] sm:$0xf0] }
 0x82e   : > { %v3260_v47 = vor.u32 %v3752_v44, %v3259_v43 }
 0x830   : > { %1708 = vmatpush.bf16.msra.mxu1 %v3256_v46  ;;  %1721 = vmatpush.bf16.msra.mxu2 %v3260_v47 }
 0x834   : > { %1950 = vmatpush.bf16.msrb.mxu1 %v3775_v24 }
 0x838   : > { %1951 = vmatpush.bf16.msrb.mxu1 %v3774_v25 }
 0x8a0   : > { %v1502_v48 = vpop.xlane.xlu1 %1501 }
 0x8a1   : > { %v1503_v49 = vmul.f32 %v1502_v48, %v4280_v41 }
 0x8a3   : > { %v1504_v50 = vadd.f32 1e-05, %v1503_v49 }
 0x8a5   : > { %3890 = vrsqrt.f32 %v1504_v50  ;;  %vm1511_vm11 = vweird.f32 %v1504_v50 }
 0x8ab   : > { %v3891_v51 = vpop.eup %3890 }
 0x8ac   : > { %v1506_v52 = vmul.f32 %v3891_v51, %v1504_v50  ;;  %vm1512_vm10 = vweird.f32 %v3891_v51 }
 0x8ad   : > { %vm1513_vm12 = vmor %vm1511_vm11, %vm1512_vm10 }
 0x8ae   : > { %v1507_v53 = vmul.f32 %v3891_v51, %v1506_v52 }
 0x8b0   : > { %v1508_v54 = vmul.f32 0.5, %v1507_v53 }
 0x8b2   : > { %v1509_v55 = vsub.f32 1.5, %v1508_v54 }
 0x8b4   : > { %v1510_v56 = vmul.f32 %v3891_v51, %v1509_v55 }
 0x8b6   : > { %v1514_v57 = vsel %vm1513_vm12, %v3891_v51, %v1510_v56 }
 0x8b7   : > { %v1515_v59 = vmul.f32 %v1514_v57, %v4457_v45 }
 0x8b9   : > { %v1516_v61 = vmul.f32 %v1515_v59, %v1494_v58 }
 0x8bb   : > { %v4595_v62 = vadd.f32 %v1516_v61, %v1495_v60 }
 0x8bd   : > { %v1518_v63 = vpack.c.bf16 %v4595_v62, %v4595_v62 }
 0x8bf   : > { %1696 = vmatmul.bf16.vlgmr.msra.gmra.mxu3 %v1518_v63  ;;  %1709 = vmatmul.bf16.vlgmr.msra.gmra.mxu1 %v1518_v63 }
 0x8c0   : > { %1722 = vmatmul.bf16.vlgmr.msra.gmra.mxu2 %v1518_v63  ;;  %2169 = vmatpush.bf16.msra.mxu1 %v3781_v34  ;;  %v3785_v34 = vld [vmem:[%s5149_s10 + $0x14] sm:$0xf0] }
 0x93c   : > { %v1710_v3 = vpop.f32.mrf.mxu1 }
 0x93d   : > { %v4602_v45 = vadd.f32 %v1710_v3, %v1555_v2  ;;  %v3777_v2 = vld [vmem:[%s5148_s9 + $0x18] sm:$0xff]  ;;  %v3776_v3 = vld [vmem:[%s5148_s9 + $0x10] sm:$0xff] }
 0x93f   : > { %3345 = vmatpush.xpose.msk.msrb.mxu0 %vm718_vm0, %v4602_v45 }
 0x942   : > { %v1697_v6 = vpop.f32.mrf.mxu3 }
 0x943   : > { %v4606_v7 = vadd.f32 %v1697_v6, %v1554_v4  ;;  %v1723_v8 = vpop.f32.mrf.mxu2 }
 0x944   : > { %v4608_v9 = vadd.f32 %v1723_v8, %v1556_v5  ;;  %v1712_v10 = vpop.f32.mrf.mxu1 }
 0x945   : > { %1957 = vrot.lane.b32.xlu1 %v4606_v7, %s3926_s27  ;;  %1819 = vrot.lane.b32.xlu2 %v4606_v7, %s3927_s28 }
 0x946   : > { %1813 = vmatpush.msra.mxu0 %v4608_v9 }
 0x947   : > { %3346 = vmatmul.msk.f32.vlgmr.msrb.gmra.mxu0 %vm718_vm0, %v4606_v7 }
 0x94a   : > { %v1699_v11 = vpop.f32.mrf.mxu3 }
 0x94b   : > { %v1725_v12 = vpop.f32.mrf.mxu2 }
 0x99f   : > { %v1820_v39 = vpop.permute.xlu2 %1819 }
 0x9b7   : > { %v1958_v38 = vpop.permute.xlu1 %1957 }
 0x9c4   : > { %v1766_v13 = vpop.f32.mrf.mxu0 }
 0x9c5   : > { %v1769_v14 = vmul.f32 0.17677669, %v1766_v13 }
 0x9c7   : > { %v1770_v16 = vsel %vm4195_vm1, %v1769_v14, -1e+30 }
 0x9c8   : > { %v1771_v17 = vsel %vm747_vm2, %v1770_v16, -inf }
 0x9c9   : > { %1772 = vmax.xlane.f32.xlu0 %v1771_v17 }
 0x9dd   : > { %1821 = vrot.lane.b32.xlu0 %v4602_v45, %s3927_s28 }
 0xa3c   : > { %v1773_v19 = vpop.xlane.xlu0 %1772 }
 0xa3d   : > { %v1774_v20 = vsub.f32 %v1770_v16, %v1773_v19 }
 0xa3f   : > { %v1775_v21 = vmul.f32 1.442695, %v1774_v20 }
 0xa41   : > { %3892 = vpow2.f32 %v1775_v21 }
 0xa47   : > { %v3893_v22 = vpop.eup %3892 }
 0xa48   : > { %v1777_v15 = vsel %vm747_vm2, %v3893_v22, 0.0 }
 0xa49   : > { %1778 = vadd.xlane.f32.xlu0 %v1777_v15 }
 0xa4f   : > { %v1822_v23 = vpop.permute.xlu0 %1821 }
 0xa50   : > { %3348 = vmatpush.xpose.msk.msrb.mxu0 %vm718_vm0, %v1822_v23 }
 0xa5d   : > { %1959 = vrot.lane.b32.xlu0 %v4602_v45, %s3926_s27 }
 0xabc   : > { %v1779_v26 = vpop.xlane.xlu0 %1778 }
 0xabd   : > { %3894 = vrcp.f32 %v1779_v26  ;;  %v1791_v30 = vand.u32 2147483648, %v1779_v26  ;;  %v1789_v32 = vand.u32 2147483647, %v1779_v26  ;;  %vm1785_vm14 = vweird.f32 %v1779_v26 }
 0xabf   : > { %v1792_v33 = vor.u32 1.1754944e-38, %v1791_v30  ;;  %vm1790_vm3 = vcmp.eq.f32.partialorder %v1789_v32, 8.507059e+37 }
 0xac3   : > { %v3895_v27 = vpop.eup %3894 }
 0xac4   : > { %v1781_v28 = vmul.f32 %v3895_v27, %v1779_v26  ;;  %vm1786_vm13 = vweird.f32 %v3895_v27 }
 0xac5   : > { %vm1787_vm15 = vmor %vm1785_vm14, %vm1786_vm13 }
 0xac6   : > { %v1782_v29 = vsub.f32 1.0, %v1781_v28 }
 0xac8   : > { %v1783_v31 = vmul.f32 %v3895_v27, %v1782_v29 }
 0xaca   : > { %v1784_v18 = vadd.f32 %v3895_v27, %v1783_v31 }
 0xacc   : > { %v1788_v35 = vsel %vm1787_vm15, %v3895_v27, %v1784_v18 }
 0xacd   : > { %v1793_v0 = vsel %vm1790_vm3, %v1792_v33, %v1788_v35  ;;  %v3779_v33 = vld [vmem:[%s5148_s9 + $0x28] sm:$0xff]  ;;  %v3778_v35 = vld [vmem:[%s5148_s9 + $0x20] sm:$0xff] }
 0xace   : > { %v1794_v36 = vmul.f32 %v3893_v22, %v1793_v0 }
 0xacf   : > { %v1960_v37 = vpop.permute.xlu0 %1959 }
 0xad0   : > { %3347 = vmatmul.msk.f32.vlgmr.msra.gmra.mxu0 %vm747_vm2, %v1794_v36  ;;  %3369 = vmatpush.xpose.msk.msrb.mxu2 %vm718_vm0, %v1960_v37 }
 0xad1   : > { %1922 = vmatpush.bf16.msra.mxu0 %v3777_v2 }
 0xad3   : > { %3370 = vmatmul.msk.f32.vlgmr.msrb.gmra.mxu2 %vm718_vm0, %v1958_v38 }
 0xad4   : > { %2059 = vmatpush.bf16.msra.mxu2 %v3779_v33  ;;  %v3438_v33 = vld [vmem:[%s5149_s10 + $0x58] sm:$0xf0] }
 0xad5   : > { %1923 = vmatpush.bf16.msra.mxu0 %v3776_v3 }
 0xad8   : > { %3349 = vmatmul.msk.f32.vlgmr.msrb.gmra.mxu0 %vm718_vm0, %v1820_v39  ;;  %2060 = vmatpush.bf16.msra.mxu2 %v3778_v35 }
 0xb4d   : > { %v1815_v40 = vpop.f32.mrf.mxu0 }
 0xb4e   : > { %v1818_v42 = vpack.c.bf16 %v1815_v40, %v1815_v40 }
 0xb50   : > { %3368 = vmatmul.msk.bf16.vlgmr.msrb.gmra.mxu1 %vm718_vm0, %v1818_v42 }
 0xb55   : > { %v1844_v43 = vpop.f32.mrf.mxu0 }
 0xb56   : > { %v1847_v44 = vmul.f32 0.17677669, %v1844_v43  ;;  %v1982_v46 = vpop.f32.mrf.mxu2 }
 0xb57   : > { %v1985_v47 = vmul.f32 0.17677669, %v1982_v46 }
 0xb58   : > { %v1848_v48 = vsel %vm4195_vm1, %v1847_v44, -1e+30 }
 0xb59   : > { %v1849_v49 = vsel %vm747_vm2, %v1848_v48, -inf  ;;  %v1986_v50 = vsel %vm4195_vm1, %v1985_v47, -1e+30 }
 0xb5a   : > { %1850 = vmax.xlane.f32.xlu0 %v1849_v49  ;;  %v1987_v51 = vsel %vm747_vm2, %v1986_v50, -inf }
 0xb5b   : > { %1988 = vmax.xlane.f32.xlu2 %v1987_v51 }
 0xb73   : > { %2011 = vrot.lane.b32.xlu2 %v4608_v9, %s3926_s27  ;;  %s3685_s27 = sshll.u32 %s5159_s30, 4 }
 0xb74   : > { %s481_s18 = scalar_lea.vmem %s5153_s14, %s3685_s27 }
 0xbcd   : > { %v4645_v52 = vpop.f32.mrf.mxu1  ;;  %v1851_v53 = vpop.xlane.xlu0 %1850 }
 0xbce   : > { %v1852_v54 = vsub.f32 %v1848_v48, %v1851_v53  ;;  %v1989_v55 = vpop.xlane.xlu2 %1988 }
 0xbcf   : > { %v1990_v56 = vsub.f32 %v1986_v50, %v1989_v55 }
 0xbd0   : > { %v1853_v57 = vmul.f32 1.442695, %v1852_v54 }
 0xbd1   : > { %v1991_v58 = vmul.f32 1.442695, %v1990_v56 }
 0xbd2   : > { %3896 = vpow2.f32 %v1853_v57 }
 0xbd3   : > { %3898 = vpow2.f32 %v1991_v58 }
 0xbd5   : > { %v1955_v59 = vpop.f32.mrf.mxu1 }
 0xbd6   : > { %v2012_v26 = vpop.permute.xlu2 %2011 }
 0xbd8   : > { %v3897_v60 = vpop.eup %3896 }
 0xbd9   : > { %v3899_v61 = vpop.eup %3898  ;;  %v1855_v63 = vsel %vm747_vm2, %v3897_v60, 0.0 }
 0xbda   : > { %1856 = vadd.xlane.f32.xlu1 %v1855_v63  ;;  %v1993_v1 = vsel %vm747_vm2, %v3899_v61, 0.0 }
 0xbdb   : > { %1994 = vadd.xlane.f32.xlu0 %v1993_v1 }
 0xbef   : > { %1874 = vrot.lane.b32.xlu0 %v4608_v9, %s3927_s28 }
 0xbf3   : > { %2069 = vrot.lane.b32.xlu1 %v4602_v45, %s3928_s15 }
 0xbf7   : > { %2067 = vrot.lane.b32.xlu0 %v4606_v7, %s3928_s15 }
 0xbfb   : > { %2121 = vrot.lane.b32.xlu1 %v4608_v9, %s3928_s15 }
 0xc4d   : > { %v1857_v4 = vpop.xlane.xlu1 %1856 }
 0xc4e   : > { %3900 = vrcp.f32 %v1857_v4  ;;  %v1995_v5 = vpop.xlane.xlu0 %1994  ;;  %v1869_v9 = vand.u32 2147483648, %v1857_v4  ;;  %v1867_v13 = vand.u32 2147483647, %v1857_v4  ;;  %vm1863_vm5 = vweird.f32 %v1857_v4 }
 0xc4f   : > { %3902 = vrcp.f32 %v1995_v5  ;;  %v2007_v22 = vand.u32 2147483648, %v1995_v5  ;;  %vm2001_vm9 = vweird.f32 %v1995_v5  ;;  %v2005_v15 = vand.u32 2147483647, %v1995_v5 }
 0xc50   : > { %v1870_v17 = vor.u32 1.1754944e-38, %v1869_v9  ;;  %vm1868_vm7 = vcmp.eq.f32.partialorder %v1867_v13, 8.507059e+37  ;;  %v3452_v13 = vld [vmem:[%s5149_s10 + $0x70] sm:$0xf] }
 0xc51   : > { %v2008_v28 = vor.u32 1.1754944e-38, %v2007_v22  ;;  %vm2006_vm11 = vcmp.eq.f32.partialorder %v2005_v15, 8.507059e+37 }
 0xc54   : > { %v3901_v45 = vpop.eup %3900 }
 0xc55   : > { %v3903_v6 = vpop.eup %3902  ;;  %v1859_v7 = vmul.f32 %v3901_v45, %v1857_v4  ;;  %vm1864_vm4 = vweird.f32 %v3901_v45 }
 0xc56   : > { %v1997_v8 = vmul.f32 %v3903_v6, %v1995_v5  ;;  %vm1865_vm6 = vmor %vm1863_vm5, %vm1864_vm4  ;;  %vm2002_vm8 = vweird.f32 %v3903_v6  ;;  %v3780_v5 = vld [vmem:[%s5148_s9 + $0x30] sm:$0xff] }
 0xc57   : > { %v1860_v10 = vsub.f32 1.0, %v1859_v7  ;;  %vm2003_vm10 = vmor %vm2001_vm9, %vm2002_vm8  ;;  %2170 = vmatpush.bf16.msra.mxu1 %v3780_v5 }
 0xc58   : > { %v1998_v11 = vsub.f32 1.0, %v1997_v8  ;;  %v2177_v8 = vld [vmem:[%s5142_s3 + $0x1a] ss:$0 sm:$0xff] }
 0xc59   : > { %v1861_v12 = vmul.f32 %v3901_v45, %v1860_v10 }
 0xc5a   : > { %v1999_v16 = vmul.f32 %v3903_v6, %v1998_v11 }
 0xc5b   : > { %v1862_v14 = vadd.f32 %v3901_v45, %v1861_v12 }
 0xc5c   : > { %v2000_v21 = vadd.f32 %v3903_v6, %v1999_v16  ;;  %v3796_v16 = vld [vmem:[%s5149_s10 + $0x74] sm:$0xf] }
 0xc5d   : > { %v1866_v19 = vsel %vm1865_vm6, %v3901_v45, %v1862_v14  ;;  %v3797_v14 = vld [vmem:[%s5149_s10 + $0x74] sm:$0xf0] }
 0xc5e   : > { %v1871_v20 = vsel %vm1868_vm7, %v1870_v17, %v1866_v19  ;;  %v2004_v27 = vsel %vm2003_vm10, %v3903_v6, %v2000_v21  ;;  %v3453_v17 = vor.u32 %v3797_v14, %v3452_v13  ;;  %v3454_v19 = vld [vmem:[%s5149_s10 + $0x78] sm:$0xf0] }
 0xc5f   : > { %v1872_v24 = vmul.f32 %v3897_v60, %v1871_v20  ;;  %v2009_v30 = vsel %vm2006_vm11, %v2008_v28, %v2004_v27  ;;  %v3446_v28 = vld [vmem:[%s5149_s10 + $0x68] sm:$0xf0] }
 0xc60   : > { %v2010_v31 = vmul.f32 %v3899_v61, %v2009_v30  ;;  %2308 = vmatpush.bf16.msrb.mxu2 %v3453_v17  ;;  %v3436_v30 = vld [vmem:[%s5149_s10 + $0x50] sm:$0xf]  ;;  %v2180_v17 = vld [vmem:[%s5142_s3 + $0x1b] ss:$0 sm:$0xff] }
 0xc61   : > { %v1875_v23 = vpop.permute.xlu0 %1874 }
 0xc62   : > { %1895 = vmatpush.msrb.mxu3 %v1875_v23  ;;  %v3444_v23 = vld [vmem:[%s5149_s10 + $0x60] sm:$0xf] }
 0xc63   : > { %3350 = vmatmul.msk.f32.vlgmr.msrb.gmra.mxu3 %vm747_vm2, %v1872_v24  ;;  %v3795_v24 = vld [vmem:[%s5149_s10 + $0x64] sm:$0xf0] }
 0xc64   : > { %2032 = vmatpush.msra.mxu3 %v2012_v26  ;;  %v3794_v26 = vld [vmem:[%s5149_s10 + $0x64] sm:$0xf]  ;;  %v3445_v27 = vor.u32 %v3795_v24, %v3444_v23  ;;  %v3803_v23 = vld [vmem:[%s5150_s11 + $0x28] sm:$0xff] }
 0xc65   : > { %v2070_v29 = vpop.permute.xlu1 %2069  ;;  %v3802_v24 = vld [vmem:[%s5150_s11 + $0x20] sm:$0xff] }
 0xc66   : > { %3381 = vmatpush.xpose.msk.msrb.mxu3 %vm718_vm0, %v2070_v29  ;;  %v3449_v29 = vor.u32 %v3794_v26, %v3446_v28  ;;  %2309 = vmatpush.bf16.msrb.mxu2 %v3445_v27  ;;  %v3810_v26 = vld [vmem:[%s5150_s11 + $0x60] sm:$0xff]  ;;  %v3801_v27 = vld [vmem:[%s5150_s11 + $0x18] sm:$0xff] }
 0xc67   : > { %v3809_v28 = vld [vmem:[%s5150_s11 + $0x58] sm:$0xff] }
 0xc69   : > { %v2068_v18 = vpop.permute.xlu0 %2067 }
 0xc6b   : > { %3371 = vmatmul.msk.f32.vlgmr.msra.gmra.mxu3 %vm747_vm2, %v2010_v31  ;;  %v3793_v31 = vld [vmem:[%s5149_s10 + $0x54] sm:$0xf0] }
 0xc6d   : > { %v2122_v32 = vpop.permute.xlu1 %2121 }
 0xc6e   : > { %2142 = vmatpush.msrb.mxu0 %v2122_v32  ;;  %v3792_v32 = vld [vmem:[%s5149_s10 + $0x54] sm:$0xf] }
 0xc6f   : > { %v3441_v35 = vor.u32 %v3792_v32, %v3438_v33  ;;  %v3807_v32 = vld [vmem:[%s5150_s11 + $0x48] sm:$0xff]  ;;  %v3806_v33 = vld [vmem:[%s5150_s11 + $0x40] sm:$0xff] }
 0xc73   : > { %3382 = vmatmul.msk.f32.vlgmr.msrb.gmra.mxu3 %vm718_vm0, %v2068_v18  ;;  %v3437_v18 = vor.u32 %v3793_v31, %v3436_v30  ;;  %v3808_v30 = vld [vmem:[%s5150_s11 + $0x50] sm:$0xff]  ;;  %v3799_v31 = vld [vmem:[%s5150_s11 + $0x8] sm:$0xff] }
 0xc75   : > { %2310 = vmatpush.bf16.msrb.mxu2 %v3437_v18  ;;  %v3798_v18 = vld [vmem:[%s5150_s11] sm:$0xff] }
 0xce6   : > { %v1897_v0 = vpop.f32.mrf.mxu3 }
 0xce7   : > { %v1900_v36 = vpack.c.bf16 %v1897_v0, %v1897_v0  ;;  %v3428_v0 = vld [vmem:[%s5149_s10 + $0x40] sm:$0xf] }
 0xce9   : > { %3359 = vmatmul.msk.bf16.vlgmr.msra.gmra.mxu0 %vm718_vm0, %v1900_v36  ;;  %v3791_v36 = vld [vmem:[%s5149_s10 + $0x44] sm:$0xf0] }
 0xcee   : > { %v2034_v37 = vpop.f32.mrf.mxu3 }
 0xcef   : > { %v2037_v38 = vpack.c.bf16 %v2034_v37, %v2034_v37  ;;  %v3790_v37 = vld [vmem:[%s5149_s10 + $0x44] sm:$0xf] }
 0xcf1   : > { %3380 = vmatmul.msk.bf16.vlgmr.msra.gmra.mxu2 %vm718_vm0, %v2037_v38  ;;  %v3429_v38 = vor.u32 %v3791_v36, %v3428_v0 }
 0xcf3   : > { %2311 = vmatpush.bf16.msrb.mxu2 %v3429_v38 }
 0xcf6   : > { %v2092_v39 = vpop.f32.mrf.mxu3 }
 0xcf7   : > { %v2095_v25 = vmul.f32 0.17677669, %v2092_v39  ;;  %v3430_v39 = vld [vmem:[%s5149_s10 + $0x48] sm:$0xf0] }
 0xcf9   : > { %v2096_v40 = vsel %vm4195_vm1, %v2095_v25, -1e+30  ;;  %v3433_v25 = vor.u32 %v3790_v37, %v3430_v39 }
 0xcfa   : > { %v2097_v42 = vsel %vm747_vm2, %v2096_v40, -inf }
 0xcfb   : > { %2098 = vmax.xlane.f32.xlu0 %v2097_v42  ;;  %v3789_v42 = vld [vmem:[%s5149_s10 + $0x34] sm:$0xf0] }
 0xd66   : > { %v1925_v43 = vpop.f32.mrf.mxu0 }
 0xd67   : > { %v1954_v49 = vadd.f32 %v4645_v52, %v1925_v43  ;;  %v3788_v43 = vld [vmem:[%s5149_s10 + $0x34] sm:$0xf] }
 0xd6e   : > { %v1927_v44 = vpop.f32.mrf.mxu0  ;;  %v2099_v46 = vpop.xlane.xlu0 %2098 }
 0xd6f   : > { %v2100_v47 = vsub.f32 %v2096_v40, %v2099_v46  ;;  %v3420_v40 = vld [vmem:[%s5149_s10 + $0x30] sm:$0xf]  ;;  %v3422_v46 = vld [vmem:[%s5149_s10 + $0x38] sm:$0xf0] }
 0xd70   : > { %v3421_v44 = vor.u32 %v3789_v42, %v3420_v40 }
 0xd71   : > { %v2101_v48 = vmul.f32 1.442695, %v2100_v47  ;;  %v3425_v47 = vor.u32 %v3788_v43, %v3422_v46 }
 0xd72   : > { %2312 = vmatpush.bf16.msrb.mxu2 %v3421_v44 }
 0xd73   : > { %3904 = vpow2.f32 %v2101_v48  ;;  %v3412_v48 = vld [vmem:[%s5149_s10 + $0x20] sm:$0xf] }
 0xd74   : > { %v2062_v50 = vpop.f32.mrf.mxu2 }
 0xd75   : > { %v2066_v51 = vadd.f32 %v2062_v50, %v1954_v49  ;;  %v3787_v49 = vld [vmem:[%s5149_s10 + $0x24] sm:$0xf0]  ;;  %v3786_v50 = vld [vmem:[%s5149_s10 + $0x24] sm:$0xf] }
 0xd79   : > { %v3905_v53 = vpop.eup %3904 }
 0xd7a   : > { %v2103_v54 = vsel %vm747_vm2, %v3905_v53, 0.0 }
 0xd7b   : > { %2104 = vadd.xlane.f32.xlu2 %v2103_v54 }
 0xd7c   : > { %v2064_v55 = vpop.f32.mrf.mxu2 }
 0xd7d   : > { %v3404_v55 = vld [vmem:[%s5149_s10 + $0x10] sm:$0xf] }
 0xdee   : > { %v2105_v56 = vpop.xlane.xlu2 %2104 }
 0xdef   : > { %3906 = vrcp.f32 %v2105_v56  ;;  %v2117_v60 = vand.u32 2147483648, %v2105_v56  ;;  %v2115_v61 = vand.u32 2147483647, %v2105_v56  ;;  %vm2111_vm12 = vweird.f32 %v2105_v56 }
 0xdf1   : > { %v2118_v1 = vor.u32 1.1754944e-38, %v2117_v60  ;;  %vm2116_vm14 = vcmp.eq.f32.partialorder %v2115_v61, 8.507059e+37  ;;  %v3783_v60 = vld [vmem:[%s5149_s10 + $0x4] sm:$0xf0]  ;;  %v3782_v61 = vld [vmem:[%s5149_s10 + $0x4] sm:$0xf] }
 0xdf5   : > { %v3907_v57 = vpop.eup %3906 }
 0xdf6   : > { %v2107_v58 = vmul.f32 %v3907_v57, %v2105_v56  ;;  %vm2112_vm1 = vweird.f32 %v3907_v57  ;;  %v3784_v56 = vld [vmem:[%s5149_s10 + $0x14] sm:$0xf] }
 0xdf7   : > { %vm2113_vm13 = vmor %vm2111_vm12, %vm2112_vm1 }
 0xdf8   : > { %v2108_v59 = vsub.f32 1.0, %v2107_v58  ;;  %v3406_v58 = vld [vmem:[%s5149_s10 + $0x18] sm:$0xf0] }
 0xdfa   : > { %v2109_v52 = vmul.f32 %v3907_v57, %v2108_v59  ;;  %v3396_v59 = vld [vmem:[%s5149_s10] sm:$0xf] }
 0xdfc   : > { %v2110_v63 = vadd.f32 %v3907_v57, %v2109_v52  ;;  %v3409_v52 = vor.u32 %v3784_v56, %v3406_v58 }
 0xdfe   : > { %v2114_v2 = vsel %vm2113_vm13, %v3907_v57, %v2110_v63  ;;  %v3405_v57 = vor.u32 %v3785_v34, %v3404_v55  ;;  %v3398_v63 = vld [vmem:[%s5149_s10 + $0x8] sm:$0xf0] }
 0xdff   : > { %v2119_v3 = vsel %vm2116_vm14, %v2118_v1, %v2114_v2  ;;  %v3397_v1 = vor.u32 %v3783_v60, %v3396_v59  ;;  %v3401_v2 = vor.u32 %v3782_v61, %v3398_v63 }
 0xe00   : > { %v2120_v4 = vmul.f32 %v3905_v53, %v2119_v3  ;;  %v3414_v53 = vld [vmem:[%s5149_s10 + $0x28] sm:$0xf0]  ;;  %v3805_v3 = vld [vmem:[%s5150_s11 + $0x38] sm:$0xff] }
 0xe01   : > { %v3417_v54 = vor.u32 %v3786_v50, %v3414_v53  ;;  %2483 = vmatpush.bf16.msra.mxu0 %v3805_v3 }
 0xe02   : > { %3383 = vmatmul.msk.f32.vlgmr.msrb.gmra.mxu0 %vm747_vm2, %v2120_v4  ;;  %v3813_v4 = vld [vmem:[%s5150_s11 + $0x78] sm:$0xff] }
 0xe03   : > { %2496 = vmatpush.bf16.msrb.mxu1 %v3813_v4 }
 0xe7f   : > { %v2144_v45 = vpop.f32.mrf.mxu0 }
 0xe80   : > { %v2147_v6 = vpack.c.bf16 %v2144_v45, %v2144_v45 }
 0xe82   : > { %3392 = vmatmul.msk.bf16.vlgmr.msra.gmra.mxu1 %vm718_vm0, %v2147_v6  ;;  %v3804_v6 = vld [vmem:[%s5150_s11 + $0x30] sm:$0xff] }
 0xe83   : > { %2484 = vmatpush.bf16.msra.mxu0 %v3804_v6 }
 0xe87   : > { %2485 = vmatpush.bf16.msra.mxu0 %v3803_v23 }
 0xe8b   : > { %2486 = vmatpush.bf16.msra.mxu0 %v3802_v24  ;;  %v2511_v24 = vld [vmem:[%s5142_s3 + $0x30] ss:$0 sm:$0xff] }
 0xe8f   : > { %2487 = vmatpush.bf16.msra.mxu0 %v3801_v27 }
 0xeff   : > { %v2172_v7 = vpop.f32.mrf.mxu1 }
 0xf00   : > { %v2176_v10 = vadd.f32 %v2172_v7, %v2066_v51  ;;  %v3413_v51 = vor.u32 %v3787_v49, %v3412_v48  ;;  %v3812_v7 = vld [vmem:[%s5150_s11 + $0x70] sm:$0xff] }
 0xf01   : > { %2497 = vmatpush.bf16.msrb.mxu1 %v3812_v7 }
 0xf02   : > { %v2178_v9 = vadd.f32 %v2177_v8, %v2176_v10  ;;  %2313 = vmatpush.bf16.msrb.mxu2 %v3413_v51 }
 0xf04   : > { %v2179_v11 = vadd.f32 %v2178_v9, %v4595_v62  ;;  %v3457_v62 = vor.u32 %v3796_v16, %v3454_v19 }
 0xf06   : > { %2182 = vadd.xlane.f32.xlu1 %v2179_v11  ;;  %2321 = vmatpush.bf16.msra.mxu3 %v3457_v62  ;;  %v2181_v62 = vld [vmem:[%s5142_s3 + $0x1c] ss:$0 sm:$0xff] }
 0xf07   : > { %v2174_v12 = vpop.f32.mrf.mxu1  ;;  %2314 = vmatpush.bf16.msrb.mxu2 %v3405_v57 }
 0xf0a   : > { %2322 = vmatpush.bf16.msra.mxu3 %v3449_v29  ;;  %v3800_v29 = vld [vmem:[%s5150_s11 + $0x10] sm:$0xff] }
 0xf0b   : > { %2315 = vmatpush.bf16.msrb.mxu2 %v3397_v1  ;;  %2488 = vmatpush.bf16.msra.mxu0 %v3800_v29  ;;  %v2386_v1 = vld [vmem:[%s5142_s3 + $0x1e] ss:$0 sm:$0xff]  ;;  %v3836_v29 = vld [vmem:[%s5151_s12 + $0xb0] sm:$0xf0] }
 0xf0e   : > { %2323 = vmatpush.bf16.msra.mxu3 %v3441_v35  ;;  %v3393_v35 = vld [vmem:[%s5142_s3 + $0x1d] ss:$8 sm:$0x3] }
 0xf0f   : > { %2489 = vmatpush.bf16.msra.mxu0 %v3799_v31  ;;  %v2224_v0 = vperm.slane %v3393_v35, 0  ;;  %v2225_v36 = vperm.slane %v3393_v35, 1 }
 0xf12   : > { %2324 = vmatpush.bf16.msra.mxu3 %v3433_v25 }
 0xf13   : > { %2490 = vmatpush.bf16.msra.mxu0 %v3798_v18  ;;  %v3616_v18 = vld [vmem:[%s5151_s12 + $0xb0] sm:$0xf] }
 0xf16   : > { %2325 = vmatpush.bf16.msra.mxu3 %v3425_v47 }
 0xf1a   : > { %2326 = vmatpush.bf16.msra.mxu3 %v3417_v54 }
 0xf1e   : > { %2327 = vmatpush.bf16.msra.mxu3 %v3409_v52 }
 0xf22   : > { %2328 = vmatpush.bf16.msra.mxu3 %v3401_v2 }
 0xf79   : > { %v2183_v20 = vpop.xlane.xlu1 %2182 }
 0xf7a   : > { %v2184_v21 = vmul.f32 %v2183_v20, %v4280_v41 }
 0xf7c   : > { %v4705_v22 = vsub.f32 %v2179_v11, %v2184_v21 }
 0xf7e   : > { %v2186_v15 = vmul.f32 %v4705_v22, %v4705_v22 }
 0xf80   : > { %2187 = vadd.xlane.f32.xlu0 %v2186_v15 }
 0xff3   : > { %v2188_v5 = vpop.xlane.xlu0 %2187 }
 0xff4   : > { %v2189_v45 = vmul.f32 %v2188_v5, %v4280_v41 }
 0xff6   : > { %v2190_v8 = vadd.f32 1e-05, %v2189_v45 }
 0xff8   : > { %3908 = vrsqrt.f32 %v2190_v8  ;;  %vm2197_vm2 = vweird.f32 %v2190_v8 }
 0xffe   : > { %v3909_v10 = vpop.eup %3908 }
 0xfff   : > { %v2192_v9 = vmul.f32 %v3909_v10, %v2190_v8  ;;  %vm2198_vm0 = vweird.f32 %v3909_v10 }
0x1000   : > { %vm2199_vm15 = vmor %vm2197_vm2, %vm2198_vm0 }
0x1001   : > { %v2193_v11 = vmul.f32 %v3909_v10, %v2192_v9 }
0x1003   : > { %v2194_v12 = vmul.f32 0.5, %v2193_v11 }
0x1005   : > { %v2195_v13 = vsub.f32 1.5, %v2194_v12 }
0x1007   : > { %v2196_v14 = vmul.f32 %v3909_v10, %v2195_v13 }
0x1009   : > { %v2200_v16 = vsel %vm2199_vm15, %v3909_v10, %v2196_v14 }
0x100a   : > { %v2201_v19 = vmul.f32 %v2200_v16, %v4705_v22  ;;  %v3811_v22 = vld [vmem:[%s5150_s11 + $0x68] sm:$0xff] }
0x100b   : > { %2498 = vmatpush.bf16.msrb.mxu1 %v3811_v22 }
0x100c   : > { %v2202_v20 = vmul.f32 %v2201_v19, %v2180_v17 }
0x100e   : > { %v4813_v21 = vadd.f32 %v2202_v20, %v2181_v62 }
0x100f   : > { %2499 = vmatpush.bf16.msrb.mxu1 %v3810_v26 }
0x1010   : > { %v2204_v15 = vpack.c.bf16 %v4813_v21, %v4813_v21 }
0x1012   : > { %2316 = vmatmul.bf16.vlgmr.msrb.gmra.mxu2 %v2204_v15  ;;  %2329 = vmatmul.bf16.vlgmr.msra.gmra.mxu3 %v2204_v15  ;;  %v2510_v15 = vld [vmem:[%s5142_s3 + $0x1f] ss:$0 sm:$0xff] }
0x1013   : > { %2500 = vmatpush.bf16.msrb.mxu1 %v3809_v28  ;;  %v3608_v28 = vld [vmem:[%s5151_s12 + $0xa8] sm:$0xf] }
0x1014   : > { %v3609_v31 = vor.u32 %v3836_v29, %v3608_v28  ;;  %v3544_v28 = vld [vmem:[%s5151_s12 + $0x20] sm:$0xf]  ;;  %v3819_v29 = vld [vmem:[%s5151_s12 + $0x28] sm:$0xf0] }
0x1016   : > { %2719 = vmatpush.bf16.msra.mxu2 %v3609_v31  ;;  %v3545_v31 = vor.u32 %v3819_v29, %v3544_v28  ;;  %v3628_v29 = vld [vmem:[%s5152_s13 + $0x10] sm:$0xf] }
0x1017   : > { %2501 = vmatpush.bf16.msrb.mxu1 %v3808_v30  ;;  %v3835_v30 = vld [vmem:[%s5151_s12 + $0xac] sm:$0xf] }
0x101b   : > { %2502 = vmatpush.bf16.msrb.mxu1 %v3807_v32  ;;  %v3610_v32 = vld [vmem:[%s5151_s12 + $0xb4] sm:$0xf0] }
0x101c   : > { %v3613_v35 = vor.u32 %v3835_v30, %v3610_v32  ;;  %v3524_v32 = vld [vmem:[%s5151_s12] sm:$0xf] }
0x101e   : > { %2732 = vmatpush.bf16.msrb.mxu3 %v3613_v35 }
0x101f   : > { %2503 = vmatpush.bf16.msrb.mxu1 %v3806_v33  ;;  %v3837_v33 = vld [vmem:[%s5151_s12 + $0xb8] sm:$0xf0] }
0x1095   : > { %v2317_v37 = vpop.f32.mrf.mxu2  ;;  %v2330_v38 = vpop.f32.mrf.mxu3 }
0x1096   : > { %v2318_v39 = vadd.f32 %v2317_v37, %v2224_v0  ;;  %v2331_v25 = vadd.f32 %v2330_v38, %v2225_v36  ;;  %v3617_v0 = vor.u32 %v3837_v33, %v3616_v18  ;;  %v3815_v18 = vld [vmem:[%s5151_s12 + $0x8] sm:$0xf0]  ;;  %v3814_v33 = vld [vmem:[%s5151_s12 + $0x4] sm:$0xf] }
0x1097   : > { %v3525_v35 = vor.u32 %v3815_v18, %v3524_v32  ;;  %v3630_v18 = vld [vmem:[%s5152_s13 + $0x18] sm:$0xf0] }
0x1098   : > { %v2336_v40 = vmul.f32 0.044715, %v2318_v39  ;;  %v2337_v42 = vmul.f32 0.044715, %v2331_v25  ;;  %v2334_v56 = vmul.f32 0.5, %v2318_v39  ;;  %v2335_v58 = vmul.f32 0.5, %v2331_v25  ;;  %2745 = vmatpush.bf16.msrb.mxu0 %v3617_v0 }
0x1099   : > { %v3526_v0 = vld [vmem:[%s5151_s12 + $0xc] sm:$0xf0] }
0x109a   : > { %v2338_v43 = vmul.f32 %v2336_v40, %v2318_v39  ;;  %v2339_v44 = vmul.f32 %v2337_v42, %v2331_v25  ;;  %v3833_v40 = vld [vmem:[%s5151_s12 + $0x98] sm:$0xf0]  ;;  %v3832_v42 = vld [vmem:[%s5151_s12 + $0x94] sm:$0xf] }
0x109c   : > { %v2340_v46 = vmul.f32 %v2338_v43, %v2318_v39  ;;  %v2341_v47 = vmul.f32 %v2339_v44, %v2331_v25  ;;  %v3598_v44 = vld [vmem:[%s5151_s12 + $0x9c] sm:$0xf0] }
0x109d   : > { %v2319_v48 = vpop.f32.mrf.mxu2  ;;  %v2332_v49 = vpop.f32.mrf.mxu3 }
0x109e   : > { %v2342_v50 = vadd.f32 %v2340_v46, %v2318_v39  ;;  %v2343_v51 = vadd.f32 %v2341_v47, %v2331_v25  ;;  %v3596_v25 = vld [vmem:[%s5151_s12 + $0x90] sm:$0xf]  ;;  %v3604_v46 = vld [vmem:[%s5151_s12 + $0x98] sm:$0xf]  ;;  %v3834_v47 = vld [vmem:[%s5151_s12 + $0xa0] sm:$0xf0]  ;;  %v3601_v48 = vor.u32 %v3832_v42, %v3598_v44 }
0x109f   : > { %v3597_v43 = vor.u32 %v3833_v40, %v3596_v25  ;;  %v3605_v49 = vor.u32 %v3834_v47, %v3604_v46  ;;  %v3676_v42 = vld [vmem:[%s5152_s13 + $0x70] sm:$0xf]  ;;  %v3852_v44 = vld [vmem:[%s5152_s13 + $0x74] sm:$0xf] }
0x10a0   : > { %v2344_v53 = vmul.f32 0.7978846, %v2342_v50  ;;  %v2345_v54 = vmul.f32 0.7978846, %v2343_v51  ;;  %2733 = vmatpush.bf16.msrb.mxu3 %v3601_v48  ;;  %v3584_v50 = vld [vmem:[%s5151_s12 + $0x78] sm:$0xf] }
0x10a1   : > { %2720 = vmatpush.bf16.msra.mxu2 %v3597_v43  ;;  %2746 = vmatpush.bf16.msrb.mxu0 %v3605_v49  ;;  %v3830_v51 = vld [vmem:[%s5151_s12 + $0x80] sm:$0xf0]  ;;  %v3853_v43 = vld [vmem:[%s5152_s13 + $0x74] sm:$0xf0]  ;;  %v3678_v48 = vld [vmem:[%s5152_s13 + $0x78] sm:$0xf0] }
0x10a2   : > { %3910 = vtanh.f32 %v2344_v53  ;;  %v3829_v53 = vld [vmem:[%s5151_s12 + $0x7c] sm:$0xf]  ;;  %v3677_v47 = vor.u32 %v3853_v43, %v3676_v42  ;;  %v3668_v49 = vld [vmem:[%s5152_s13 + $0x60] sm:$0xf] }
0x10a3   : > { %3912 = vtanh.f32 %v2345_v54  ;;  %v3585_v54 = vor.u32 %v3830_v51, %v3584_v50  ;;  %v3851_v50 = vld [vmem:[%s5152_s13 + $0x64] sm:$0xf0]  ;;  %v3681_v51 = vor.u32 %v3852_v44, %v3678_v48  ;;  %v2758_v42 = vld [vmem:[%s476_s26] sm:$0xff]  ;;  %v2760_v44 = vld [vmem:[%s5142_s3 + $0x33] ss:$0 sm:$0xff] }
0x10a4   : > { %2859 = vmatpush.bf16.msra.mxu1 %v3677_v47 }
0x10a5   : > { %2721 = vmatpush.bf16.msra.mxu2 %v3585_v54 }
0x10a8   : > { %v3911_v55 = vpop.eup %3910 }
0x10a9   : > { %v3913_v34 = vpop.eup %3912  ;;  %v2348_v57 = vadd.f32 1.0, %v3911_v55  ;;  %v3586_v55 = vld [vmem:[%s5151_s12 + $0x84] sm:$0xf0] }
0x10aa   : > { %v2349_v59 = vadd.f32 1.0, %v3913_v34  ;;  %v3592_v34 = vld [vmem:[%s5151_s12 + $0x80] sm:$0xf] }
0x10ab   : > { %v2350_v60 = vmul.f32 %v2348_v57, %v2334_v56  ;;  %v3831_v56 = vld [vmem:[%s5151_s12 + $0x88] sm:$0xf0]  ;;  %v3589_v57 = vor.u32 %v3829_v53, %v3586_v55  ;;  %v3850_v53 = vld [vmem:[%s5152_s13 + $0x64] sm:$0xf]  ;;  %v3669_v55 = vor.u32 %v3851_v50, %v3668_v49 }
0x10ac   : > { %v2351_v52 = vmul.f32 %v2349_v59, %v2335_v58  ;;  %v3593_v58 = vor.u32 %v3831_v56, %v3592_v34  ;;  %v3572_v59 = vld [vmem:[%s5151_s12 + $0x60] sm:$0xf]  ;;  %v3660_v56 = vld [vmem:[%s5152_s13 + $0x50] sm:$0xf] }
0x10ad   : > { %v2352_v61 = vpack.c.bf16 %v2350_v60, %v2350_v60  ;;  %2734 = vmatpush.bf16.msrb.mxu3 %v3589_v57  ;;  %v3827_v60 = vld [vmem:[%s5151_s12 + $0x68] sm:$0xf0]  ;;  %v3849_v57 = vld [vmem:[%s5152_s13 + $0x54] sm:$0xf0]  ;;  %2860 = vmatpush.bf16.msra.mxu1 %v3669_v55 }
0x10ae   : > { %v2353_v63 = vpack.c.bf16 %v2351_v52, %v2351_v52  ;;  %2747 = vmatpush.bf16.msrb.mxu0 %v3593_v58  ;;  %v3826_v52 = vld [vmem:[%s5151_s12 + $0x64] sm:$0xf]  ;;  %v3848_v58 = vld [vmem:[%s5152_s13 + $0x54] sm:$0xf] }
0x10af   : > { %2491 = vmatmul.bf16.vlgmr.msra.gmra.mxu0 %v2352_v61  ;;  %v3573_v61 = vor.u32 %v3827_v60, %v3572_v59  ;;  %v3662_v59 = vld [vmem:[%s5152_s13 + $0x58] sm:$0xf0]  ;;  %v3661_v60 = vor.u32 %v3849_v57, %v3660_v56 }
0x10b0   : > { %2504 = vmatmul.bf16.vlgmr.msrb.gmra.mxu1 %v2353_v63  ;;  %v3574_v63 = vld [vmem:[%s5151_s12 + $0x6c] sm:$0xf0] }
0x10b1   : > { %2722 = vmatpush.bf16.msra.mxu2 %v3573_v61  ;;  %v3652_v61 = vld [vmem:[%s5152_s13 + $0x40] sm:$0xf]  ;;  %2861 = vmatpush.bf16.msra.mxu1 %v3661_v60 }
0x112c   : > { %v2492_v2 = vpop.f32.mrf.mxu0 }
0x112d   : > { %v2493_v3 = vadd.f32 %v2492_v2, %v2386_v1  ;;  %v2505_v4 = vpop.f32.mrf.mxu1  ;;  %v3580_v1 = vld [vmem:[%s5151_s12 + $0x68] sm:$0xf]  ;;  %v3828_v2 = vld [vmem:[%s5151_s12 + $0x70] sm:$0xf0] }
0x112f   : > { %v2506_v5 = vadd.f32 %v2505_v4, %v2493_v3  ;;  %v3577_v3 = vor.u32 %v3826_v52, %v3574_v63  ;;  %v3581_v4 = vor.u32 %v3828_v2, %v3580_v1  ;;  %v3665_v52 = vor.u32 %v3848_v58, %v3662_v59  ;;  %v3847_v63 = vld [vmem:[%s5152_s13 + $0x44] sm:$0xf0]  ;;  %v3846_v1 = vld [vmem:[%s5152_s13 + $0x44] sm:$0xf]  ;;  %v3654_v2 = vld [vmem:[%s5152_s13 + $0x48] sm:$0xf0] }
0x1131   : > { %v2509_v45 = vadd.f32 %v2506_v5, %v4813_v21  ;;  %2735 = vmatpush.bf16.msrb.mxu3 %v3577_v3  ;;  %2748 = vmatpush.bf16.msrb.mxu0 %v3581_v4  ;;  %v3560_v5 = vld [vmem:[%s5151_s12 + $0x48] sm:$0xf]  ;;  %v3653_v4 = vor.u32 %v3847_v63, %v3652_v61 }
0x1133   : > { %2512 = vadd.xlane.f32.xlu2 %v2509_v45  ;;  %2862 = vmatpush.bf16.msra.mxu1 %v3653_v4 }
0x1134   : > { %v2494_v6 = vpop.f32.mrf.mxu0 }
0x1135   : > { %v2507_v7 = vpop.f32.mrf.mxu1  ;;  %v3823_v6 = vld [vmem:[%s5151_s12 + $0x4c] sm:$0xf] }
0x11a6   : > { %v2513_v8 = vpop.xlane.xlu2 %2512 }
0x11a7   : > { %v2514_v10 = vmul.f32 %v2513_v8, %v4280_v41  ;;  %v3562_v8 = vld [vmem:[%s5151_s12 + $0x54] sm:$0xf0] }
0x11a9   : > { %v2515_v9 = vsub.f32 %v2509_v45, %v2514_v10  ;;  %v3824_v45 = vld [vmem:[%s5151_s12 + $0x50] sm:$0xf0]  ;;  %v3568_v10 = vld [vmem:[%s5151_s12 + $0x50] sm:$0xf] }
0x11aa   : > { %v3561_v7 = vor.u32 %v3824_v45, %v3560_v5  ;;  %v3657_v45 = vor.u32 %v3846_v1, %v3654_v2 }
0x11ab   : > { %v2516_v11 = vmul.f32 %v2515_v9, %v2515_v9 }
0x11ac   : > { %2723 = vmatpush.bf16.msra.mxu2 %v3561_v7  ;;  %v3845_v7 = vld [vmem:[%s5152_s13 + $0x34] sm:$0xf0] }
0x11ad   : > { %2517 = vadd.xlane.f32.xlu0 %v2516_v11  ;;  %v3565_v11 = vor.u32 %v3823_v6, %v3562_v8  ;;  %v3644_v6 = vld [vmem:[%s5152_s13 + $0x30] sm:$0xf]  ;;  %v3844_v8 = vld [vmem:[%s5152_s13 + $0x34] sm:$0xf] }
0x11af   : > { %2736 = vmatpush.bf16.msrb.mxu3 %v3565_v11  ;;  %v3645_v11 = vor.u32 %v3845_v7, %v3644_v6 }
0x11b1   : > { %2863 = vmatpush.bf16.msra.mxu1 %v3645_v11 }
0x1220   : > { %v2518_v12 = vpop.xlane.xlu0 %2517 }
0x1221   : > { %v2519_v13 = vmul.f32 %v2518_v12, %v4280_v41 }
0x1223   : > { %v2520_v14 = vadd.f32 1e-05, %v2519_v13  ;;  %v3548_v13 = vld [vmem:[%s5151_s12 + $0x30] sm:$0xf] }
0x1225   : > { %3914 = vrsqrt.f32 %v2520_v14  ;;  %vm2527_vm4 = vweird.f32 %v2520_v14 }
0x122b   : > { %v3915_v16 = vpop.eup %3914 }
0x122c   : > { %v2522_v17 = vmul.f32 %v3915_v16, %v2520_v14  ;;  %vm2528_vm3 = vweird.f32 %v3915_v16  ;;  %v3821_v14 = vld [vmem:[%s5151_s12 + $0x38] sm:$0xf0] }
0x122d   : > { %vm2529_vm5 = vmor %vm2527_vm4, %vm2528_vm3 }
0x122e   : > { %v2523_v19 = vmul.f32 %v3915_v16, %v2522_v17  ;;  %v3549_v17 = vor.u32 %v3821_v14, %v3548_v13 }
0x1230   : > { %v2524_v62 = vmul.f32 0.5, %v2523_v19  ;;  %v3550_v19 = vld [vmem:[%s5151_s12 + $0x3c] sm:$0xf0]  ;;  %2724 = vmatpush.bf16.msra.mxu2 %v3549_v17 }
0x1232   : > { %v2525_v20 = vsub.f32 1.5, %v2524_v62  ;;  %v3556_v62 = vld [vmem:[%s5151_s12 + $0x38] sm:$0xf] }
0x1234   : > { %v2526_v21 = vmul.f32 %v3915_v16, %v2525_v20  ;;  %v3822_v20 = vld [vmem:[%s5151_s12 + $0x40] sm:$0xf0] }
0x1236   : > { %v2530_v23 = vsel %vm2529_vm5, %v3915_v16, %v2526_v21  ;;  %v3820_v16 = vld [vmem:[%s5151_s12 + $0x34] sm:$0xf] }
0x1237   : > { %v2531_v22 = vmul.f32 %v2530_v23, %v2515_v9  ;;  %v3825_v9 = vld [vmem:[%s5151_s12 + $0x58] sm:$0xf0]  ;;  %v3553_v21 = vor.u32 %v3820_v16, %v3550_v19  ;;  %v3536_v23 = vld [vmem:[%s5151_s12 + $0x18] sm:$0xf]  ;;  %v2534_v19 = vld [vmem:[%s5142_s3 + $0x31] ss:$0 sm:$0xff] }
0x1238   : > { %v3569_v12 = vor.u32 %v3825_v9, %v3568_v10  ;;  %v3646_v10 = vld [vmem:[%s5152_s13 + $0x38] sm:$0xf0] }
0x1239   : > { %v2532_v26 = vmul.f32 %v2531_v22, %v2510_v15  ;;  %v3557_v15 = vor.u32 %v3822_v20, %v3556_v62  ;;  %2737 = vmatpush.bf16.msrb.mxu3 %v3553_v21  ;;  %v3818_v22 = vld [vmem:[%s5151_s12 + $0x20] sm:$0xf0]  ;;  %v3649_v13 = vor.u32 %v3844_v8, %v3646_v10  ;;  %v2535_v20 = vld [vmem:[%s5142_s3 + $0x32] ss:$0 sm:$0xff] }
0x123a   : > { %2749 = vmatpush.bf16.msrb.mxu0 %v3569_v12 }
0x123b   : > { %v2533_v27 = vadd.f32 %v2532_v26, %v2511_v24  ;;  %v3817_v24 = vld [vmem:[%s5151_s12 + $0x1c] sm:$0xf]  ;;  %v3537_v26 = vor.u32 %v3818_v22, %v3536_v23  ;;  %v3636_v22 = vld [vmem:[%s5152_s13 + $0x20] sm:$0xf] }
0x123d   : > { %2536 = vadd.xlane.f32.xlu2 %v2533_v27  ;;  %2725 = vmatpush.bf16.msra.mxu2 %v3537_v26 }
0x123e   : > { %2750 = vmatpush.bf16.msrb.mxu0 %v3557_v15 }
0x1241   : > { %2726 = vmatpush.bf16.msra.mxu2 %v3525_v35  ;;  %v3620_v35 = vld [vmem:[%s5152_s13] sm:$0xf] }
0x1242   : > { %2751 = vmatpush.bf16.msrb.mxu0 %v3545_v31  ;;  %v3840_v31 = vld [vmem:[%s5152_s13 + $0x14] sm:$0xf] }
0x1245   : > { %2872 = vmatpush.bf16.msrb.mxu2 %v3681_v51 }
0x12b0   : > { %v2537_v36 = vpop.xlane.xlu2 %2536 }
0x12b1   : > { %v2538_v37 = vmul.f32 %v2537_v36, %v4280_v41  ;;  %v3532_v36 = vld [vmem:[%s5151_s12 + $0x8] sm:$0xf] }
0x12b3   : > { %v4887_v38 = vsub.f32 %v2533_v27, %v2538_v37  ;;  %v3538_v27 = vld [vmem:[%s5151_s12 + $0x24] sm:$0xf0]  ;;  %v3816_v37 = vld [vmem:[%s5151_s12 + $0x10] sm:$0xf0] }
0x12b4   : > { %v3541_v30 = vor.u32 %v3817_v24, %v3538_v27  ;;  %v3533_v25 = vor.u32 %v3816_v37, %v3532_v36  ;;  %v3843_v24 = vld [vmem:[%s5152_s13 + $0x24] sm:$0xf0]  ;;  %v3638_v27 = vld [vmem:[%s5152_s13 + $0x28] sm:$0xf0]  ;;  %v3838_v36 = vld [vmem:[%s5152_s13 + $0x4] sm:$0xf] }
0x12b5   : > { %v2540_v39 = vmul.f32 %v4887_v38, %v4887_v38  ;;  %v3637_v26 = vor.u32 %v3843_v24, %v3636_v22 }
0x12b6   : > { %2738 = vmatpush.bf16.msrb.mxu3 %v3541_v30  ;;  %2752 = vmatpush.bf16.msrb.mxu0 %v3533_v25  ;;  %v3841_v30 = vld [vmem:[%s5152_s13 + $0x14] sm:$0xf0] }
0x12b7   : > { %2541 = vadd.xlane.f32.xlu0 %v2540_v39  ;;  %v3529_v39 = vor.u32 %v3814_v33, %v3526_v0  ;;  %2864 = vmatpush.bf16.msra.mxu1 %v3637_v26  ;;  %v3629_v32 = vor.u32 %v3841_v30, %v3628_v29  ;;  %v3633_v33 = vor.u32 %v3840_v31, %v3630_v18  ;;  %v3839_v0 = vld [vmem:[%s5152_s13 + $0x4] sm:$0xf0] }
0x12b8   : > { %v3621_v37 = vor.u32 %v3839_v0, %v3620_v35 }
0x12ba   : > { %2739 = vmatpush.bf16.msrb.mxu3 %v3529_v39  ;;  %v3622_v39 = vld [vmem:[%s5152_s13 + $0x8] sm:$0xf0] }
0x12bb   : > { %2865 = vmatpush.bf16.msra.mxu1 %v3629_v32  ;;  %v3625_v25 = vor.u32 %v3838_v36, %v3622_v39 }
0x12bf   : > { %2866 = vmatpush.bf16.msra.mxu1 %v3621_v37 }
0x132a   : > { %v2542_v40 = vpop.xlane.xlu0 %2541 }
0x132b   : > { %v2543_v46 = vmul.f32 %v2542_v40, %v4280_v41  ;;  %v3670_v41 = vld [vmem:[%s5152_s13 + $0x68] sm:$0xf0] }
0x132c   : > { %v3673_v34 = vor.u32 %v3850_v53, %v3670_v41  ;;  %v3682_v41 = vld [vmem:[%s5142_s3 + $0x34] ss:$8 sm:$0x3] }
0x132d   : > { %v2544_v54 = vadd.f32 1e-05, %v2543_v46  ;;  %v2891_v57 = vperm.slane %v3682_v41, 1 }
0x132e   : > { %2873 = vmatpush.bf16.msrb.mxu2 %v3673_v34 }
0x132f   : > { %3916 = vrsqrt.f32 %v2544_v54  ;;  %vm2551_vm7 = vweird.f32 %v2544_v54 }
0x1332   : > { %2874 = vmatpush.bf16.msrb.mxu2 %v3665_v52 }
0x1335   : > { %v3917_v3 = vpop.eup %3916 }
0x1336   : > { %v2546_v5 = vmul.f32 %v3917_v3, %v2544_v54  ;;  %2875 = vmatpush.bf16.msrb.mxu2 %v3657_v45  ;;  %vm2552_vm6 = vweird.f32 %v3917_v3  ;;  %v2890_v54 = vperm.slane %v3682_v41, 0 }
0x1337   : > { %vm2553_vm8 = vmor %vm2551_vm7, %vm2552_vm6 }
0x1338   : > { %v2547_v9 = vmul.f32 %v3917_v3, %v2546_v5 }
0x133a   : > { %v2548_v12 = vmul.f32 0.5, %v2547_v9  ;;  %2876 = vmatpush.bf16.msrb.mxu2 %v3649_v13 }
0x133c   : > { %v2549_v14 = vsub.f32 1.5, %v2548_v12 }
0x133e   : > { %v2550_v16 = vmul.f32 %v3917_v3, %v2549_v14 }
0x1340   : > { %v2554_v17 = vsel %vm2553_vm8, %v3917_v3, %v2550_v16 }
0x1341   : > { %v2555_v62 = vmul.f32 %v2554_v17, %v4887_v38  ;;  %v3842_v38 = vld [vmem:[%s5152_s13 + $0x24] sm:$0xf] }
0x1342   : > { %v3641_v28 = vor.u32 %v3842_v38, %v3638_v27 }
0x1343   : > { %v2556_v21 = vmul.f32 %v2555_v62, %v2534_v19 }
0x1344   : > { %2877 = vmatpush.bf16.msrb.mxu2 %v3641_v28 }
0x1345   : > { %v2557_v15 = vadd.f32 %v2556_v21, %v2535_v20 }
0x1347   : > { %v2558_v23 = vpack.c.bf16 %v2557_v15, %v2557_v15 }
0x1348   : > { %2878 = vmatpush.bf16.msrb.mxu2 %v3633_v33 }
0x1349   : > { %2727 = vmatmul.bf16.vlgmr.msra.gmra.mxu2 %v2558_v23  ;;  %2740 = vmatmul.bf16.vlgmr.msrb.gmra.mxu3 %v2558_v23 }
0x134a   : > { %2753 = vmatmul.bf16.vlgmr.msrb.gmra.mxu0 %v2558_v23 }
0x134c   : > { %2879 = vmatpush.bf16.msrb.mxu2 %v3625_v25 }
0x13c7   : > { %v2754_v40 = vpop.f32.mrf.mxu0 }
0x13cc   : > { %v2728_v43 = vpop.f32.mrf.mxu2  ;;  %v2741_v46 = vpop.f32.mrf.mxu3 }
0x13cd   : > { %v2759_v47 = vadd.f32 %v2758_v42, %v2728_v43 }
0x13cf   : > { %v2761_v48 = vadd.f32 %v2760_v44, %v2759_v47  ;;  %v2756_v49 = vpop.f32.mrf.mxu0 }
0x13d1   : > { %v2762_v50 = vpack.c.bf16 %v2761_v48, %v2761_v48 }
0x13d3   : > { %2867 = vmatmul.bf16.vlgmr.msra.gmra.mxu1 %v2762_v50  ;;  %2880 = vmatmul.bf16.vlgmr.msrb.gmra.mxu2 %v2762_v50 }
0x13d4   : > { %v2730_v51 = vpop.f32.mrf.mxu2  ;;  %v2743_v53 = vpop.f32.mrf.mxu3 }
0x1450   : > { %v2868_v55 = vpop.f32.mrf.mxu1 }
0x1451   : > { %v2885_v34 = vadd.f32 %v2868_v55, %v2741_v46 }
0x1453   : > { %v2894_v56 = vadd.f32 %v2890_v54, %v2885_v34 }
0x1455   : > { %2896 = vst [vmem:[%s481_s18] sm:$0xff] %v2894_v56 }
0x1456   : > { %v2881_v58 = vpop.f32.mrf.mxu2 }
0x1457   : > { %v2886_v59 = vadd.f32 %v2881_v58, %v2754_v40 }
0x1458   : > { %v2870_v60 = vpop.f32.mrf.mxu1 }
0x1459   : > { %v2895_v52 = vadd.f32 %v2891_v57, %v2886_v59 }
0x145b   : > { %2897 = vst [vmem:[%s481_s18 + $0x8] sm:$0xff] %v2895_v52 }
0x145e   : > { %v2883_v61 = vpop.f32.mrf.mxu2 }
0x145f PF: > { %s24_s29 = sadd.s32 1, %s3924_s29  }
0x1460   : > { %p21_p4 = scmp.ge.s32.totalorder %s24_s29, 4  }
0x1462   :  { %23 = sbr.rel (!%p21_p4) target bundleno = 1 (0x1), region = 114 }

</bundles_post_ra>
